<compile_context>
chip_gen: v6e
topology: v6e:2x2x1
jax: 0.10.0
libtpu: 0.0.40
codegen_flags: <defaults>
</compile_context>

<pallas_src>
import functools

import jax
import jax.numpy as jnp
from jax.experimental import pallas as pl
from jax.experimental.pallas import tpu as pltpu

IN_DIM = 1024
H1_DIM = 2000
H2_DIM = 100

H1_PAD = 2048   # next multiple of 128
H2_PAD = 128    # next multiple of 128

BATCH_TILE = 256  # fills MXU rows on v6e/v7x (2x128 on v5e); keeps f32 h1 tile at 2 MiB


def _round_up(n, m):
    return ((n + m - 1) // m) * m


def _mlp_multitask_kernel(x_ref, w1_ref, b1_ref, w2_ref, b2_ref,
                          w3_ref, b3_ref, o_ref):
    # fc1 + ReLU  (bf16 MXU inputs, f32 accumulation; bias add / ReLU in f32)
    h1 = jnp.dot(x_ref[...], w1_ref[...], preferred_element_type=jnp.float32)
    h1 = jnp.maximum(h1 + b1_ref[...], 0.0)
    # Dropout(p=0.25) is identity in eval mode -> nothing to do here.

    # fc2 + ReLU
    h2 = jnp.dot(h1.astype(jnp.bfloat16), w2_ref[...],
                 preferred_element_type=jnp.float32)
    h2 = jnp.maximum(h2 + b2_ref[...], 0.0)

    # all n_tasks heads fused into one (H2_PAD, Tp) matmul, then sigmoid (EUP)
    logits = jnp.dot(h2.astype(jnp.bfloat16), w3_ref[...],
                     preferred_element_type=jnp.float32)
    o_ref[...] = jax.nn.sigmoid(logits + b3_ref[...])


def pad_params(w1, b1, w2, b2, w3, b3):
    """Pad + cast weights ONCE (outside the jit'd per-call forward).

    Weights are (in_features, out_features) — transposed vs PyTorch nn.Linear.
    Zero padding is inert through matmul/ReLU; padded outputs are sliced off.
    """
    n_tasks = w3.shape[1]
    Tp = _round_up(max(n_tasks, 128), 128)

    w1p = jnp.zeros((IN_DIM, H1_PAD), jnp.bfloat16).at[:, :H1_DIM].set(
        w1.astype(jnp.bfloat16))
    b1p = jnp.zeros((1, H1_PAD), jnp.float32).at[:, :H1_DIM].set(
        b1[None, :].astype(jnp.float32))

    w2p = jnp.zeros((H1_PAD, H2_PAD), jnp.bfloat16).at[:H1_DIM, :H2_DIM].set(
        w2.astype(jnp.bfloat16))
    b2p = jnp.zeros((1, H2_PAD), jnp.float32).at[:, :H2_DIM].set(
        b2[None, :].astype(jnp.float32))

    w3p = jnp.zeros((H2_PAD, Tp), jnp.bfloat16).at[:H2_DIM, :n_tasks].set(
        w3.astype(jnp.bfloat16))
    b3p = jnp.zeros((1, Tp), jnp.float32).at[:, :n_tasks].set(
        b3[None, :].astype(jnp.float32))

    return w1p, b1p, w2p, b2p, w3p, b3p


@functools.partial(jax.jit, static_argnames=("n_tasks",))
def chembl_multitask_forward(x, w1p, b1p, w2p, b2p, w3p, b3p, *, n_tasks):
    """x: (B, 1024) f32/bf16.  Returns (B, n_tasks) f32 sigmoid head outputs."""
    B = x.shape[0]
    Tp = w3p.shape[1]

    # Pick batch tile: whole (8-rounded) batch if small, else 256-row tiles.
    if B <= BATCH_TILE:
        Bp = _round_up(max(B, 8), 8)
        tb = Bp
    else:
        Bp = _round_up(B, BATCH_TILE)
        tb = BATCH_TILE

    xp = x.astype(jnp.bfloat16)
    if Bp != B:
        xp = jnp.zeros((Bp, IN_DIM), jnp.bfloat16).at[:B].set(xp)

    resident = lambda i: (0, 0)  # weights/biases stay put across batch tiles
    out = pl.pallas_call(
        _mlp_multitask_kernel,
        out_shape=jax.ShapeDtypeStruct((Bp, Tp), jnp.float32),
        grid=(Bp // tb,),
        in_specs=[
            pl.BlockSpec((tb, IN_DIM), lambda i: (i, 0)),   # x tile (streams)
            pl.BlockSpec((IN_DIM, H1_PAD), resident),       # W1
            pl.BlockSpec((1, H1_PAD), resident),            # b1
            pl.BlockSpec((H1_PAD, H2_PAD), resident),       # W2
            pl.BlockSpec((1, H2_PAD), resident),            # b2
            pl.BlockSpec((H2_PAD, Tp), resident),           # W3 (fused heads)
            pl.BlockSpec((1, Tp), resident),                # b3
        ],
        out_specs=pl.BlockSpec((tb, Tp), lambda i: (i, 0)),
        compiler_params=pltpu.CompilerParams(
            dimension_semantics=("parallel",),
            vmem_limit_bytes=32 << 20,
        ),
    )(xp, w1p, b1p, w2p, b2p, w3p, b3p)

    return out[:B, :n_tasks]


def init_params(key, n_tasks):
    """Deterministic init mimicking PyTorch nn.Linear default U(-1/sqrt(fan_in), ...)."""
    ks = jax.random.split(key, 6)

    def lin(kw, kb, fan_in, fan_out):
        bound = 1.0 / jnp.sqrt(fan_in)
        w = jax.random.uniform(kw, (fan_in, fan_out), jnp.float32, -bound, bound)
        b = jax.random.uniform(kb, (fan_out,), jnp.float32, -bound, bound)
        return w, b

    w1, b1 = lin(ks[0], ks[1], IN_DIM, H1_DIM)
    w2, b2 = lin(ks[2], ks[3], H1_DIM, H2_DIM)
    # n_tasks heads of Linear(100, 1), packed column-wise into (100, n_tasks)
    w3, b3 = lin(ks[4], ks[5], H2_DIM, n_tasks)
    return w1, b1, w2, b2, w3, b3


def reference_forward(x, w1, b1, w2, b2, w3, b3):
    """Same-precision JAX reference (bf16 inputs/weights, f32 accumulation)."""
    xb = x.astype(jnp.bfloat16)
    h1 = jnp.maximum(
        jnp.dot(xb, w1.astype(jnp.bfloat16),
                preferred_element_type=jnp.float32) + b1, 0.0)
    h2 = jnp.maximum(
        jnp.dot(h1.astype(jnp.bfloat16), w2.astype(jnp.bfloat16),
                preferred_element_type=jnp.float32) + b2, 0.0)
    logits = jnp.dot(h2.astype(jnp.bfloat16), w3.astype(jnp.bfloat16),
                     preferred_element_type=jnp.float32) + b3
    return jax.nn.sigmoid(logits)


if __name__ == "__main__":
    n_tasks = 5
    batch = 4

    key = jax.random.PRNGKey(0)
    kx, kp = jax.random.split(key)
    x = jax.random.normal(kx, (batch, IN_DIM), jnp.float32)
    params = init_params(kp, n_tasks)

    # Pad/cast weights once (hoisted out of the per-call forward).
    padded = pad_params(*params)

    out = chembl_multitask_forward(x, *padded, n_tasks=n_tasks)
    out = jax.block_until_ready(out)

    # list-of-(B,1) outputs matching the PyTorch module's return structure
    out_list = [out[:, i:i + 1] for i in range(n_tasks)]

    ref = reference_forward(x, *params)
    assert out.shape == (batch, n_tasks)
    assert len(out_list) == n_tasks and out_list[0].shape == (batch, 1)
    assert jnp.allclose(out, ref, atol=2e-3, rtol=2e-3), "mismatch vs JAX reference"

    print("KERNEL_OK")
</pallas_src>

<mosaic_0001>
module attributes {stable_mosaic.version = 11 : i64} {
  func.func @_mlp_multitask_kernel(%arg0: i32, %arg1: memref<8x1024xbf16, #tpu.memory_space<vmem>>, %arg2: memref<1024x2048xbf16, #tpu.memory_space<vmem>>, %arg3: memref<1x2048xf32, #tpu.memory_space<vmem>>, %arg4: memref<2048x128xbf16, #tpu.memory_space<vmem>>, %arg5: memref<1x128xf32, #tpu.memory_space<vmem>>, %arg6: memref<128x128xbf16, #tpu.memory_space<vmem>>, %arg7: memref<1x128xf32, #tpu.memory_space<vmem>>, %arg8: memref<8x128xf32, #tpu.memory_space<vmem>>) attributes {dimension_semantics = [#tpu.dimension_semantics<parallel>], iteration_bounds = array<i64: 1>, scalar_prefetch = 0 : i64, scratch_operands = 0 : i64, tpu.core_type = #tpu.core_type<tc>, window_params = [{transform_indices = @transform_0, window_bounds = array<i64: 8, 1024>}, {pipeline_mode = #tpu.pipeline_mode<synchronous>, transform_indices = @transform_1, window_bounds = array<i64: 1024, 2048>}, {pipeline_mode = #tpu.pipeline_mode<synchronous>, transform_indices = @transform_2, window_bounds = array<i64: 1, 2048>}, {pipeline_mode = #tpu.pipeline_mode<synchronous>, transform_indices = @transform_3, window_bounds = array<i64: 2048, 128>}, {pipeline_mode = #tpu.pipeline_mode<synchronous>, transform_indices = @transform_4, window_bounds = array<i64: 1, 128>}, {pipeline_mode = #tpu.pipeline_mode<synchronous>, transform_indices = @transform_5, window_bounds = array<i64: 128, 128>}, {pipeline_mode = #tpu.pipeline_mode<synchronous>, transform_indices = @transform_6, window_bounds = array<i64: 1, 128>}, {transform_indices = @transform_7, window_bounds = array<i64: 8, 128>}]} {
    %c0 = arith.constant 0 : index
    %c0_0 = arith.constant 0 : index
    %0 = vector.load %arg1[%c0, %c0_0] : memref<8x1024xbf16, #tpu.memory_space<vmem>>, vector<8x1024xbf16>
    %c0_1 = arith.constant 0 : index
    %c0_2 = arith.constant 0 : index
    %1 = vector.load %arg2[%c0_1, %c0_2] : memref<1024x2048xbf16, #tpu.memory_space<vmem>>, vector<1024x2048xbf16>
    %cst = arith.constant dense<0.000000e+00> : vector<8x2048xf32>
    %2 = tpu.matmul %0, %1, %cst {dimension_numbers = #tpu.dot_dimension_numbers<[1], [0], [0], [1], [0, 0, 1, 1], [], []>} : vector<8x1024xbf16>, vector<1024x2048xbf16>, vector<8x2048xf32> -> vector<8x2048xf32>
    %c0_3 = arith.constant 0 : index
    %c0_4 = arith.constant 0 : index
    %3 = vector.load %arg3[%c0_3, %c0_4] : memref<1x2048xf32, #tpu.memory_space<vmem>>, vector<1x2048xf32>
    %4 = vector.broadcast %3 : vector<1x2048xf32> to vector<8x2048xf32>
    %5 = arith.addf %2, %4 : vector<8x2048xf32>
    %cst_5 = arith.constant 0.000000e+00 : f32
    %6 = vector.broadcast %cst_5 : f32 to vector<8x2048xf32>
    %7 = arith.maximumf %5, %6 : vector<8x2048xf32>
    %8 = arith.truncf %7 : vector<8x2048xf32> to vector<8x2048xbf16>
    %c0_6 = arith.constant 0 : index
    %c0_7 = arith.constant 0 : index
    %9 = vector.load %arg4[%c0_6, %c0_7] : memref<2048x128xbf16, #tpu.memory_space<vmem>>, vector<2048x128xbf16>
    %cst_8 = arith.constant dense<0.000000e+00> : vector<8x128xf32>
    %10 = tpu.matmul %8, %9, %cst_8 {dimension_numbers = #tpu.dot_dimension_numbers<[1], [0], [0], [1], [0, 0, 1, 1], [], []>} : vector<8x2048xbf16>, vector<2048x128xbf16>, vector<8x128xf32> -> vector<8x128xf32>
    %c0_9 = arith.constant 0 : index
    %c0_10 = arith.constant 0 : index
    %11 = vector.load %arg5[%c0_9, %c0_10] : memref<1x128xf32, #tpu.memory_space<vmem>>, vector<1x128xf32>
    %12 = vector.broadcast %11 : vector<1x128xf32> to vector<8x128xf32>
    %13 = arith.addf %10, %12 : vector<8x128xf32>
    %cst_11 = arith.constant 0.000000e+00 : f32
    %14 = vector.broadcast %cst_11 : f32 to vector<8x128xf32>
    %15 = arith.maximumf %13, %14 : vector<8x128xf32>
    %16 = arith.truncf %15 : vector<8x128xf32> to vector<8x128xbf16>
    %c0_12 = arith.constant 0 : index
    %c0_13 = arith.constant 0 : index
    %17 = vector.load %arg6[%c0_12, %c0_13] : memref<128x128xbf16, #tpu.memory_space<vmem>>, vector<128x128xbf16>
    %cst_14 = arith.constant dense<0.000000e+00> : vector<8x128xf32>
    %18 = tpu.matmul %16, %17, %cst_14 {dimension_numbers = #tpu.dot_dimension_numbers<[1], [0], [0], [1], [0, 0, 1, 1], [], []>} : vector<8x128xbf16>, vector<128x128xbf16>, vector<8x128xf32> -> vector<8x128xf32>
    %c0_15 = arith.constant 0 : index
    %c0_16 = arith.constant 0 : index
    %19 = vector.load %arg7[%c0_15, %c0_16] : memref<1x128xf32, #tpu.memory_space<vmem>>, vector<1x128xf32>
    %20 = vector.broadcast %19 : vector<1x128xf32> to vector<8x128xf32>
    %21 = arith.addf %18, %20 : vector<8x128xf32>
    %22 = arith.negf %21 : vector<8x128xf32>
    %23 = math.exp %22 : vector<8x128xf32>
    %cst_17 = arith.constant 1.000000e+00 : f32
    %24 = vector.broadcast %cst_17 : f32 to vector<8x128xf32>
    %25 = arith.addf %24, %23 : vector<8x128xf32>
    %26 = arith.divf %24, %25 : vector<8x128xf32>
    %c0_18 = arith.constant 0 : index
    %c0_19 = arith.constant 0 : index
    %27 = vector.load %arg8[%c0_18, %c0_19] : memref<8x128xf32, #tpu.memory_space<vmem>>, vector<8x128xf32>
    tpu.vector_store %arg8[%c0_18, %c0_19], %26 {strides = array<i32>} : memref<8x128xf32, #tpu.memory_space<vmem>>, vector<8x128xf32>,
    return
  }
  func.func @transform_0(%arg0: i32) -> (i32, i32) {
    %c0_i32 = arith.constant 0 : i32
    %c0_i32_0 = arith.constant 0 : i32
    return %arg0, %c0_i32 : i32, i32
  }
  func.func @transform_1(%arg0: i32) -> (i32, i32) {
    %c0_i32 = arith.constant 0 : i32
    %c0_i32_0 = arith.constant 0 : i32
    %c0_i32_1 = arith.constant 0 : i32
    return %c0_i32, %c0_i32_0 : i32, i32
  }
  func.func @transform_2(%arg0: i32) -> (i32, i32) {
    %c0_i32 = arith.constant 0 : i32
    %c0_i32_0 = arith.constant 0 : i32
    %c0_i32_1 = arith.constant 0 : i32
    return %c0_i32, %c0_i32_0 : i32, i32
  }
  func.func @transform_3(%arg0: i32) -> (i32, i32) {
    %c0_i32 = arith.constant 0 : i32
    %c0_i32_0 = arith.constant 0 : i32
    %c0_i32_1 = arith.constant 0 : i32
    return %c0_i32, %c0_i32_0 : i32, i32
  }
  func.func @transform_4(%arg0: i32) -> (i32, i32) {
    %c0_i32 = arith.constant 0 : i32
    %c0_i32_0 = arith.constant 0 : i32
    %c0_i32_1 = arith.constant 0 : i32
    return %c0_i32, %c0_i32_0 : i32, i32
  }
  func.func @transform_5(%arg0: i32) -> (i32, i32) {
    %c0_i32 = arith.constant 0 : i32
    %c0_i32_0 = arith.constant 0 : i32
    %c0_i32_1 = arith.constant 0 : i32
    return %c0_i32, %c0_i32_0 : i32, i32
  }
  func.func @transform_6(%arg0: i32) -> (i32, i32) {
    %c0_i32 = arith.constant 0 : i32
    %c0_i32_0 = arith.constant 0 : i32
    %c0_i32_1 = arith.constant 0 : i32
    return %c0_i32, %c0_i32_0 : i32, i32
  }
  func.func @transform_7(%arg0: i32) -> (i32, i32) {
    %c0_i32 = arith.constant 0 : i32
    %c0_i32_0 = arith.constant 0 : i32
    return %arg0, %c0_i32 : i32, i32
  }
}

</mosaic_0001>

<bundles_post_ra>
// kernel: chembl_multitask_forward.1
= control target key start
LH: loop header
LB: loop body
LE: loop exit
PB: predicated region body
PF: predicated region fallthrough
CT: control target
= control target key end

     0   :  { %12 = vsyncpa [#allocation3], 0  ;;  %s11189_s0 = inlined_call_operand.vmem [shape: bf16[8,1024], index: 0, kind: input, shape index: {}]   ;;  %s11190_s1 = inlined_call_operand.hbm [shape: bf16[1024,2048], index: 1, kind: input, shape index: {}]   ;;  %s11191_s2 = inlined_call_operand.hbm [shape: f32[1,2048], index: 2, kind: input, shape index: {}]   ;;  %s11192_s3 = inlined_call_operand.hbm [shape: bf16[2048,128], index: 3, kind: input, shape index: {}]   ;;  %s11193_s4 = inlined_call_operand.hbm [shape: f32[1,128], index: 4, kind: input, shape index: {}]   ;;  %s11194_s5 = inlined_call_operand.hbm [shape: bf16[128,128], index: 5, kind: input, shape index: {}]   ;;  %s11195_s6 = inlined_call_operand.hbm [shape: f32[1,128], index: 6, kind: input, shape index: {}]   ;;  %s11196_s7 = inlined_call_operand.vmem [shape: f32[8,128], index: 7, kind: output, shape index: {}]  }
   0x1   :  { %13 = vsyncpa [#allocation5], 0 }
   0x2   :  { %14 = vsyncpa [#allocation8], 0 }
   0x3   :  { %15 = vsyncpa [#allocation11], 0  ;;  %s10851_s24 = smov [#allocation4]   ;;  %s10852_s26 = smov [#allocation7]  }
   0x4   :  { %s36_s25 = sshll.u32 %s10851_s24, 4  ;;  %s58_s27 = sshll.u32 %s10852_s26, 4  ;;  %s37_s25 = int_to_ptr.vmem [resolvable:$true] %s36_s25  ;;  %s59_s27 = int_to_ptr.vmem [resolvable:$true] %s58_s27 }
   0x5   :  { %s10731_s28 = scalar_lea.vmem %s37_s25, 256  ;;  %p10736_p1 = scmp.lt.s32.totalorder %s37_s25, %s37_s25 }
   0x6   :  { %p10732_p0 = scmp.ne.s32.totalorder %s37_s25, %s10731_s28  ;;  %p10737_p2 = scmp.lt.s32.totalorder %s10731_s28, %s10731_s28 }
   0x8   :  { %p10738_p3 = por %p10737_p2, %p10736_p1 }
   0xa   :  { %p10739_p4 = pnand %p10738_p3, %p10732_p0 }
   0xc   :  { %10742 = shalt.err (!%p10739_p4)
}
   0xd   :  { %39 = dma.hbm_to_vmem [thread:$0]  %s11191_s2, 256, %s37_s25, [#allocation5]  }
   0xe   :  { %s10751_s8 = scalar_lea.vmem %s59_s27, 16  ;;  %s10755_s9 = scalar_lea.vmem %s59_s27, 32 }
   0xf   :  { %p10752_p5 = scmp.ne.s32.totalorder %s59_s27, %s10751_s8  ;;  %p10756_p6 = scmp.lt.s32.totalorder %s59_s27, %s59_s27 }
  0x10   :  { %p10757_p7 = scmp.lt.s32.totalorder %s10755_s9, %s10751_s8 }
  0x12   :  { %p10758_p8 = por %p10757_p7, %p10756_p6 }
  0x14   :  { %p10759_p9 = pnand %p10758_p8, %p10752_p5 }
  0x16   :  { %10762 = shalt.err (!%p10759_p9)
}
  0x17   :  { %61 = dma.hbm_to_vmem [thread:$0]  %s11193_s4, 16, %s59_s27, [#allocation8]  }
  0x18   :  { %s10853_s12 = smov [#allocation2]  }
  0x19   :  { %s23_s13 = sshll.u32 %s10853_s12, 4  ;;  %s24_s13 = int_to_ptr.vmem [resolvable:$true] %s23_s13 }
  0x1a   :  { %s10771_s14 = scalar_lea.vmem %s24_s13, 131072  ;;  %p10776_p11 = scmp.lt.s32.totalorder %s24_s13, %s24_s13 }
  0x1b   :  { %p10772_p10 = scmp.ne.s32.totalorder %s24_s13, %s10771_s14  ;;  %p10777_p12 = scmp.lt.s32.totalorder %s10771_s14, %s10771_s14 }
  0x1d   :  { %p10778_p13 = por %p10777_p12, %p10776_p11 }
  0x1f   :  { %p10779_p0 = pnand %p10778_p13, %p10772_p10 }
  0x21   :  { %10782 = shalt.err (!%p10779_p0)
}
  0x22   :  { %s10854_s2 = smov 1024   ;;  %s10855_s15 = smov 64  }
  0x23   :  { %29 = dma.hbm_to_vmem [thread:$0]  %s11190_s1, 131072, %s24_s13, [#allocation3], %s10854_s2, %s10854_s2, %s10855_s15  }
  0x24   :  { %s10856_s18 = smov [#allocation6]  }
  0x25   :  { %s45_s19 = sshll.u32 %s10856_s18, 4  ;;  %s46_s19 = int_to_ptr.vmem [resolvable:$true] %s45_s19 }
  0x26   :  { %s10791_s4 = scalar_lea.vmem %s46_s19, 16384  ;;  %p10796_p2 = scmp.lt.s32.totalorder %s46_s19, %s46_s19 }
  0x27   :  { %p10792_p1 = scmp.ne.s32.totalorder %s46_s19, %s10791_s4  ;;  %p10797_p3 = scmp.lt.s32.totalorder %s10791_s4, %s10791_s4 }
  0x29   :  { %p10798_p4 = por %p10797_p3, %p10796_p2 }
  0x2b   :  { %p10799_p5 = pnand %p10798_p4, %p10792_p1 }
  0x2d   :  { %10802 = shalt.err (!%p10799_p5)
}
  0x2e   :  { %s10857_s20 = smov 4   ;;  %s10858_s23 = smov [#allocation9]  }
  0x2f   :  { %51 = dma.hbm_to_vmem [thread:$0]  %s11192_s3, 16384, %s46_s19, [#allocation5], %s10855_s15, %s10855_s15, %s10857_s20  }
  0x30   :  { %s67_s24 = sshll.u32 %s10858_s23, 4  ;;  %s10859_s25 = smov [#allocation10]   ;;  %s68_s24 = int_to_ptr.vmem [resolvable:$true] %s67_s24 }
  0x31   :  { %s80_s1 = sshll.u32 %s10859_s25, 4  ;;  %s10811_s26 = scalar_lea.vmem %s68_s24, 1024  ;;  %s81_s1 = int_to_ptr.vmem [resolvable:$true] %s80_s1 }
  0x32   :  { %p10812_p6 = scmp.ne.s32.totalorder %s68_s24, %s10811_s26  ;;  %p10816_p7 = scmp.lt.s32.totalorder %s68_s24, %s68_s24 }
  0x33   :  { %p10817_p8 = scmp.lt.s32.totalorder %s10811_s26, %s10811_s26 }
  0x35   :  { %p10818_p9 = por %p10817_p8, %p10816_p7 }
  0x37   :  { %p10819_p10 = pnand %p10818_p9, %p10812_p6 }
  0x39   :  { %10822 = shalt.err (!%p10819_p10)
}
  0x3a   :  { %73 = dma.hbm_to_vmem [thread:$0]  %s11194_s5, 1024, %s68_s24, [#allocation8], %s10855_s15, %s10855_s15, %s10857_s20  }
  0x3b   :  { %s10831_s29 = scalar_lea.vmem %s81_s1, 16  ;;  %s10835_s3 = scalar_lea.vmem %s81_s1, 32 }
  0x3c   :  { %p10832_p11 = scmp.ne.s32.totalorder %s81_s1, %s10831_s29  ;;  %p10836_p12 = scmp.lt.s32.totalorder %s81_s1, %s81_s1 }
  0x3d   :  { %p10837_p13 = scmp.lt.s32.totalorder %s10835_s3, %s10831_s29 }
  0x3f   :  { %p10838_p0 = por %p10837_p13, %p10836_p12 }
  0x41   :  { %p10839_p1 = pnand %p10838_p0, %p10832_p11 }
  0x43   :  { %10842 = shalt.err (!%p10839_p1)
}
  0x44   :  { %83 = dma.hbm_to_vmem [thread:$0]  %s11195_s6, 16, %s81_s1, [#allocation11]  }
  0x45   :  { %10843 = dma.done.wait [#allocation3], 131072  }
  0x46   :  { %10844 = vsyncadd [#allocation3], 4294836224 }
  0x47   :  { %10845 = dma.done.wait [#allocation5], 16640  }
  0x48   :  { %10846 = vsyncadd [#allocation5], 4294950656 }
  0x49   :  { %10847 = dma.done.wait [#allocation8], 1040  }
  0x4a   :  { %10848 = vsyncadd [#allocation8], 4294966256 }
  0x4b   :  { %10849 = dma.done.wait [#allocation11], 16  }
  0x4c   :  { %10850 = vsyncadd [#allocation11], 4294967280  ;;  %v219_v0 = vld [vmem:[#allocation2 + $0x380] sm:$0xff]  ;;  %v10928_v54 = vld [vmem:[%s11189_s0 + $0x8] sm:$0xff]  ;;  %vm10861_vm0 = vmmov 0  }
  0x4d   :  { %v227_v1 = vld [vmem:[#allocation2 + $0x3c0] sm:$0xff]  ;;  %v10936_v59 = vcombine.high %v10928_v54, %v10928_v54 }
  0x4e   :  { %v475_v2 = vld [vmem:[#allocation2 + $0xb80] sm:$0xff]  ;;  %v9307_v3 = vcombine.high %v219_v0, %v227_v1  ;;  %v9306_v5 = vcombine.low %v219_v0, %v227_v1 }
  0x4f   :  { %v483_v4 = vld [vmem:[#allocation2 + $0xbc0] sm:$0xff]  ;;  %6436 = vmatprep.mubr.bf16.mxu1 %v10936_v59 }
  0x50   :  { %v203_v6 = vld [vmem:[#allocation2 + $0x300] sm:$0xff]  ;;  %v9563_v8 = vcombine.high %v475_v2, %v483_v4  ;;  %v9562_v9 = vcombine.low %v475_v2, %v483_v4  ;;  %6363 = vmatprep.subr.bf16.mxu0 %v9307_v3 }
  0x51   :  { %v211_v7 = vld [vmem:[#allocation2 + $0x340] sm:$0xff]  ;;  %6364 = vmatpush1.bf16.msra.mxu0 %v9306_v5 }
  0x52   :  { %v9291_v10 = vcombine.high %v203_v6, %v211_v7  ;;  %v459_v11 = vld [vmem:[#allocation2 + $0xb00] sm:$0xff]  ;;  %6404 = vmatprep.subr.bf16.mxu1 %v9563_v8  ;;  %v9290_v18 = vcombine.low %v203_v6, %v211_v7 }
  0x53   :  { %v467_v12 = vld [vmem:[#allocation2 + $0xb40] sm:$0xff]  ;;  %6405 = vmatpush1.bf16.msra.mxu1 %v9562_v9 }
  0x54   :  { %v187_v13 = vld [vmem:[#allocation2 + $0x280] sm:$0xff]  ;;  %v9547_v14 = vcombine.high %v459_v11, %v467_v12  ;;  %6365 = vmatprep.subr.bf16.mxu0 %v9291_v10  ;;  %v9546_v19 = vcombine.low %v459_v11, %v467_v12 }
  0x55   :  { %v195_v15 = vld [vmem:[#allocation2 + $0x2c0] sm:$0xff]  ;;  %6366 = vmatpush1.bf16.msra.mxu0 %v9290_v18 }
  0x56   :  { %v443_v16 = vld [vmem:[#allocation2 + $0xa80] sm:$0xff]  ;;  %v9275_v20 = vcombine.high %v187_v13, %v195_v15  ;;  %6406 = vmatprep.subr.bf16.mxu1 %v9547_v14  ;;  %v9274_v26 = vcombine.low %v187_v13, %v195_v15 }
  0x57   :  { %v451_v17 = vld [vmem:[#allocation2 + $0xac0] sm:$0xff]  ;;  %6407 = vmatpush1.bf16.msra.mxu1 %v9546_v19 }
  0x58   :  { %v9531_v21 = vcombine.high %v443_v16, %v451_v17  ;;  %v171_v22 = vld [vmem:[#allocation2 + $0x200] sm:$0xff]  ;;  %6367 = vmatprep.subr.bf16.mxu0 %v9275_v20  ;;  %v9530_v27 = vcombine.low %v443_v16, %v451_v17 }
  0x59   :  { %v179_v23 = vld [vmem:[#allocation2 + $0x240] sm:$0xff]  ;;  %6368 = vmatpush1.bf16.msra.mxu0 %v9274_v26 }
  0x5a   :  { %v427_v24 = vld [vmem:[#allocation2 + $0xa00] sm:$0xff]  ;;  %v9259_v28 = vcombine.high %v171_v22, %v179_v23  ;;  %6408 = vmatprep.subr.bf16.mxu1 %v9531_v21  ;;  %v9258_v34 = vcombine.low %v171_v22, %v179_v23 }
  0x5b   :  { %v435_v25 = vld [vmem:[#allocation2 + $0xa40] sm:$0xff]  ;;  %6409 = vmatpush1.bf16.msra.mxu1 %v9530_v27 }
  0x5c   :  { %v9515_v29 = vcombine.high %v427_v24, %v435_v25  ;;  %v155_v30 = vld [vmem:[#allocation2 + $0x180] sm:$0xff]  ;;  %6369 = vmatprep.subr.bf16.mxu0 %v9259_v28  ;;  %v9514_v35 = vcombine.low %v427_v24, %v435_v25 }
  0x5d   :  { %v163_v31 = vld [vmem:[#allocation2 + $0x1c0] sm:$0xff]  ;;  %6370 = vmatpush1.bf16.msra.mxu0 %v9258_v34 }
  0x5e   :  { %v411_v32 = vld [vmem:[#allocation2 + $0x980] sm:$0xff]  ;;  %v9243_v36 = vcombine.high %v155_v30, %v163_v31  ;;  %6410 = vmatprep.subr.bf16.mxu1 %v9515_v29  ;;  %v9242_v42 = vcombine.low %v155_v30, %v163_v31 }
  0x5f   :  { %v419_v33 = vld [vmem:[#allocation2 + $0x9c0] sm:$0xff]  ;;  %6411 = vmatpush1.bf16.msra.mxu1 %v9514_v35 }
  0x60   :  { %v9499_v37 = vcombine.high %v411_v32, %v419_v33  ;;  %v139_v38 = vld [vmem:[#allocation2 + $0x100] sm:$0xff]  ;;  %6371 = vmatprep.subr.bf16.mxu0 %v9243_v36  ;;  %v9498_v43 = vcombine.low %v411_v32, %v419_v33 }
  0x61   :  { %v147_v39 = vld [vmem:[#allocation2 + $0x140] sm:$0xff]  ;;  %6372 = vmatpush1.bf16.msra.mxu0 %v9242_v42 }
  0x62   :  { %v395_v40 = vld [vmem:[#allocation2 + $0x900] sm:$0xff]  ;;  %v9227_v44 = vcombine.high %v139_v38, %v147_v39  ;;  %6412 = vmatprep.subr.bf16.mxu1 %v9499_v37  ;;  %v9226_v50 = vcombine.low %v139_v38, %v147_v39 }
  0x63   :  { %v403_v41 = vld [vmem:[#allocation2 + $0x940] sm:$0xff]  ;;  %6413 = vmatpush1.bf16.msra.mxu1 %v9498_v43 }
  0x64   :  { %v9483_v45 = vcombine.high %v395_v40, %v403_v41  ;;  %v123_v46 = vld [vmem:[#allocation2 + $0x80] sm:$0xff]  ;;  %6373 = vmatprep.subr.bf16.mxu0 %v9227_v44  ;;  %v9482_v51 = vcombine.low %v395_v40, %v403_v41 }
  0x65   :  { %v131_v47 = vld [vmem:[#allocation2 + $0xc0] sm:$0xff]  ;;  %6374 = vmatpush1.bf16.msra.mxu0 %v9226_v50 }
  0x66   :  { %v379_v48 = vld [vmem:[#allocation2 + $0x880] sm:$0xff]  ;;  %v9211_v52 = vcombine.high %v123_v46, %v131_v47  ;;  %6414 = vmatprep.subr.bf16.mxu1 %v9483_v45  ;;  %v9210_v62 = vcombine.low %v123_v46, %v131_v47 }
  0x67   :  { %v387_v49 = vld [vmem:[#allocation2 + $0x8c0] sm:$0xff]  ;;  %6415 = vmatpush1.bf16.msra.mxu1 %v9482_v51 }
  0x68   :  { %v10923_v53 = vld [vmem:[%s11189_s0] sm:$0xff]  ;;  %v9467_v55 = vcombine.high %v379_v48, %v387_v49  ;;  %6375 = vmatprep.subr.bf16.mxu0 %v9211_v52  ;;  %v9466_v63 = vcombine.low %v379_v48, %v387_v49 }
  0x69   :  { %v107_v56 = vld [vmem:[#allocation2] sm:$0xff]  ;;  %v10932_v58 = vcombine.high %v10923_v53, %v10923_v53  ;;  %6376 = vmatpush1.bf16.msra.mxu0 %v9210_v62 }
  0x6a   :  { %v115_v57 = vld [vmem:[#allocation2 + $0x40] sm:$0xff]  ;;  %6416 = vmatprep.subr.bf16.mxu1 %v9467_v55 }
  0x6b   :  { %v363_v60 = vld [vmem:[#allocation2 + $0x800] sm:$0xff]  ;;  %6395 = vmatprep.mubr.bf16.mxu0 %v10932_v58  ;;  %v9195_v0 = vcombine.high %v107_v56, %v115_v57  ;;  %v9194_v6 = vcombine.low %v107_v56, %v115_v57  ;;  %6417 = vmatpush1.bf16.msra.mxu1 %v9466_v63 }
  0x6c   :  { %v371_v61 = vld [vmem:[#allocation2 + $0x840] sm:$0xff] }
  0x6d   :  { %v9451_v1 = vcombine.high %v363_v60, %v371_v61  ;;  %v347_v2 = vld [vmem:[#allocation2 + $0x780] sm:$0xff]  ;;  %6377 = vmatprep.subr.bf16.mxu0 %v9195_v0  ;;  %v9450_v7 = vcombine.low %v363_v60, %v371_v61 }
  0x6e   :  { %v355_v3 = vld [vmem:[#allocation2 + $0x7c0] sm:$0xff]  ;;  %6378 = vmatpush1.bf16.msra.mxu0 %v9194_v6 }
  0x6f   :  { %v603_v4 = vld [vmem:[#allocation2 + $0xf80] sm:$0xff]  ;;  %v9435_v8 = vcombine.high %v347_v2, %v355_v3  ;;  %6418 = vmatprep.subr.bf16.mxu1 %v9451_v1  ;;  %v9434_v14 = vcombine.low %v347_v2, %v355_v3 }
  0x70   :  { %v611_v5 = vld [vmem:[#allocation2 + $0xfc0] sm:$0xff]  ;;  %6419 = vmatpush1.bf16.msra.mxu1 %v9450_v7 }
  0x71   :  { %v9691_v9 = vcombine.high %v603_v4, %v611_v5  ;;  %v331_v10 = vld [vmem:[#allocation2 + $0x700] sm:$0xff]  ;;  %6379 = vmatprep.subr.bf16.mxu0 %v9435_v8  ;;  %v9690_v15 = vcombine.low %v603_v4, %v611_v5 }
  0x72   :  { %v339_v11 = vld [vmem:[#allocation2 + $0x740] sm:$0xff]  ;;  %6380 = vmatpush2.bf16.msra.mxu0 %v9434_v14 }
  0x73   :  { %v587_v12 = vld [vmem:[#allocation2 + $0xf00] sm:$0xff]  ;;  %v9419_v16 = vcombine.high %v331_v10, %v339_v11  ;;  %6420 = vmatprep.subr.bf16.mxu1 %v9691_v9  ;;  %v9418_v22 = vcombine.low %v331_v10, %v339_v11 }
  0x74   :  { %v595_v13 = vld [vmem:[#allocation2 + $0xf40] sm:$0xff]  ;;  %6421 = vmatpush2.bf16.msra.mxu1 %v9690_v15 }
  0x75   :  { %v9675_v17 = vcombine.high %v587_v12, %v595_v13  ;;  %v315_v18 = vld [vmem:[#allocation2 + $0x680] sm:$0xff]  ;;  %6381 = vmatprep.subr.bf16.mxu0 %v9419_v16  ;;  %v9674_v23 = vcombine.low %v587_v12, %v595_v13  ;;  %v10942_v16 = vcombine.low %v10923_v53, %v10923_v53 }
  0x76   :  { %v323_v19 = vld [vmem:[#allocation2 + $0x6c0] sm:$0xff]  ;;  %6382 = vmatpush2.bf16.msra.mxu0 %v9418_v22  ;;  %v10956_v22 = vld [vmem:[%s11189_s0 + $0x18] sm:$0xff] }
  0x77   :  { %v571_v20 = vld [vmem:[#allocation2 + $0xe80] sm:$0xff]  ;;  %v9403_v24 = vcombine.high %v315_v18, %v323_v19  ;;  %6422 = vmatprep.subr.bf16.mxu1 %v9675_v17  ;;  %v9402_v30 = vcombine.low %v315_v18, %v323_v19  ;;  %v10947_v19 = vld [vmem:[%s11189_s0 + $0x10] sm:$0xff] }
  0x78   :  { %v579_v21 = vld [vmem:[#allocation2 + $0xec0] sm:$0xff]  ;;  %6423 = vmatpush2.bf16.msra.mxu1 %v9674_v23 }
  0x79   :  { %v9659_v25 = vcombine.high %v571_v20, %v579_v21  ;;  %v299_v26 = vld [vmem:[#allocation2 + $0x600] sm:$0xff]  ;;  %6383 = vmatprep.subr.bf16.mxu0 %v9403_v24  ;;  %v9658_v31 = vcombine.low %v571_v20, %v579_v21  ;;  %v10951_v20 = vcombine.low %v10928_v54, %v10928_v54  ;;  %v10960_v54 = vcombine.high %v10947_v19, %v10947_v19 }
  0x7a   :  { %v307_v27 = vld [vmem:[#allocation2 + $0x640] sm:$0xff]  ;;  %6384 = vmatpush2.bf16.msra.mxu0 %v9402_v30 }
  0x7b   :  { %v555_v28 = vld [vmem:[#allocation2 + $0xe00] sm:$0xff]  ;;  %v9387_v32 = vcombine.high %v299_v26, %v307_v27  ;;  %6424 = vmatprep.subr.bf16.mxu1 %v9659_v25  ;;  %v9386_v38 = vcombine.low %v299_v26, %v307_v27 }
  0x7c   :  { %v563_v29 = vld [vmem:[#allocation2 + $0xe40] sm:$0xff]  ;;  %6425 = vmatpush2.bf16.msra.mxu1 %v9658_v31 }
  0x7d   :  { %v9643_v33 = vcombine.high %v555_v28, %v563_v29  ;;  %v283_v34 = vld [vmem:[#allocation2 + $0x580] sm:$0xff]  ;;  %6385 = vmatprep.subr.bf16.mxu0 %v9387_v32  ;;  %v9642_v39 = vcombine.low %v555_v28, %v563_v29  ;;  %v10965_v29 = vcombine.high %v10956_v22, %v10956_v22 }
  0x7e   :  { %v291_v35 = vld [vmem:[#allocation2 + $0x5c0] sm:$0xff]  ;;  %6386 = vmatpush2.bf16.msra.mxu0 %v9386_v38 }
  0x7f   :  { %v539_v36 = vld [vmem:[#allocation2 + $0xd80] sm:$0xff]  ;;  %v9371_v40 = vcombine.high %v283_v34, %v291_v35  ;;  %6426 = vmatprep.subr.bf16.mxu1 %v9643_v33  ;;  %v9370_v46 = vcombine.low %v283_v34, %v291_v35 }
  0x80   :  { %v547_v37 = vld [vmem:[#allocation2 + $0xdc0] sm:$0xff]  ;;  %6427 = vmatpush2.bf16.msra.mxu1 %v9642_v39 }
  0x81   :  { %v9627_v41 = vcombine.high %v539_v36, %v547_v37  ;;  %v267_v42 = vld [vmem:[#allocation2 + $0x500] sm:$0xff]  ;;  %6387 = vmatprep.subr.bf16.mxu0 %v9371_v40  ;;  %v9626_v47 = vcombine.low %v539_v36, %v547_v37 }
  0x82   :  { %v275_v43 = vld [vmem:[#allocation2 + $0x540] sm:$0xff]  ;;  %6388 = vmatpush2.bf16.msra.mxu0 %v9370_v46 }
  0x83   :  { %v523_v44 = vld [vmem:[#allocation2 + $0xd00] sm:$0xff]  ;;  %v9355_v48 = vcombine.high %v267_v42, %v275_v43  ;;  %6428 = vmatprep.subr.bf16.mxu1 %v9627_v41  ;;  %v9354_v56 = vcombine.low %v267_v42, %v275_v43 }
  0x84   :  { %v531_v45 = vld [vmem:[#allocation2 + $0xd40] sm:$0xff]  ;;  %6429 = vmatpush2.bf16.msra.mxu1 %v9626_v47 }
  0x85   :  { %v9611_v49 = vcombine.high %v523_v44, %v531_v45  ;;  %v251_v50 = vld [vmem:[#allocation2 + $0x480] sm:$0xff]  ;;  %6389 = vmatprep.subr.bf16.mxu0 %v9355_v48  ;;  %v9610_v57 = vcombine.low %v523_v44, %v531_v45 }
  0x86   :  { %v259_v51 = vld [vmem:[#allocation2 + $0x4c0] sm:$0xff]  ;;  %6390 = vmatpush2.bf16.msra.mxu0 %v9354_v56 }
  0x87   :  { %v507_v52 = vld [vmem:[#allocation2 + $0xc80] sm:$0xff]  ;;  %v9339_v60 = vcombine.high %v251_v50, %v259_v51  ;;  %6430 = vmatprep.subr.bf16.mxu1 %v9611_v49  ;;  %v9338_v2 = vcombine.low %v251_v50, %v259_v51 }
  0x88   :  { %v515_v55 = vld [vmem:[#allocation2 + $0xcc0] sm:$0xff]  ;;  %6431 = vmatpush2.bf16.msra.mxu1 %v9610_v57 }
  0x89   :  { %v9595_v61 = vcombine.high %v507_v52, %v515_v55  ;;  %v235_v62 = vld [vmem:[#allocation2 + $0x400] sm:$0xff]  ;;  %6391 = vmatprep.subr.bf16.mxu0 %v9339_v60  ;;  %v9594_v3 = vcombine.low %v507_v52, %v515_v55 }
  0x8a   :  { %v243_v63 = vld [vmem:[#allocation2 + $0x440] sm:$0xff]  ;;  %6392 = vmatpush2.bf16.msra.mxu0 %v9338_v2 }
  0x8b   :  { %v491_v0 = vld [vmem:[#allocation2 + $0xc00] sm:$0xff]  ;;  %v9323_v4 = vcombine.high %v235_v62, %v243_v63  ;;  %6432 = vmatprep.subr.bf16.mxu1 %v9595_v61  ;;  %v9322_v10 = vcombine.low %v235_v62, %v243_v63 }
  0x8c   :  { %v499_v1 = vld [vmem:[#allocation2 + $0xc40] sm:$0xff]  ;;  %6433 = vmatpush2.bf16.msra.mxu1 %v9594_v3 }
  0x8d   :  { %v9579_v5 = vcombine.high %v491_v0, %v499_v1  ;;  %v731_v6 = vld [vmem:[#allocation2 + $0x1380] sm:$0xff]  ;;  %6393 = vmatprep.subr.bf16.mxu0 %v9323_v4  ;;  %v9578_v11 = vcombine.low %v491_v0, %v499_v1 }
  0x8e   :  { %v739_v7 = vld [vmem:[#allocation2 + $0x13c0] sm:$0xff]  ;;  %6394 = vmatpush2.bf16.msra.mxu0 %v9322_v10 }
  0x8f   :  { %v987_v8 = vld [vmem:[#allocation2 + $0x1b80] sm:$0xff]  ;;  %v9819_v12 = vcombine.high %v731_v6, %v739_v7  ;;  %6434 = vmatprep.subr.bf16.mxu1 %v9579_v5  ;;  %v9818_v21 = vcombine.low %v731_v6, %v739_v7 }
  0x90   :  { %v995_v9 = vld [vmem:[#allocation2 + $0x1bc0] sm:$0xff]  ;;  %6435 = vmatpush2.bf16.msra.mxu1 %v9578_v11 }
  0x91   :  { %v10075_v13 = vcombine.high %v987_v8, %v995_v9  ;;  %v715_v14 = vld [vmem:[#allocation2 + $0x1300] sm:$0xff]  ;;  %6445 = vmatprep.subr.bf16.mxu0 %v9819_v12  ;;  %v10074_v53 = vcombine.low %v987_v8, %v995_v9  ;;  %6396 = vmatmul.mubr.bf16.vlgmr.msra.gmra.mxu0 %v10942_v16 }
  0x92   :  { %v723_v15 = vld [vmem:[#allocation2 + $0x1340] sm:$0xff]  ;;  %6446 = vmatpush1.bf16.msra.mxu0 %v9818_v21  ;;  %6477 = vmatprep.mubr.bf16.mxu0 %v10960_v54 }
  0x93   :  { %v971_v17 = vld [vmem:[#allocation2 + $0x1b00] sm:$0xff]  ;;  %v9803_v23 = vcombine.high %v715_v14, %v723_v15  ;;  %6486 = vmatprep.subr.bf16.mxu1 %v10075_v13  ;;  %6437 = vmatmul.mubr.bf16.vlgmr.msra.gmra.mxu1 %v10951_v20  ;;  %v9802_v30 = vcombine.low %v715_v14, %v723_v15 }
  0x94   :  { %v979_v18 = vld [vmem:[#allocation2 + $0x1b40] sm:$0xff]  ;;  %6487 = vmatpush1.bf16.msra.mxu1 %v10074_v53  ;;  %6518 = vmatprep.mubr.bf16.mxu1 %v10965_v29 }
  0x95   :  { %v699_v24 = vld [vmem:[#allocation2 + $0x1280] sm:$0xff]  ;;  %v10059_v26 = vcombine.high %v971_v17, %v979_v18  ;;  %6447 = vmatprep.subr.bf16.mxu0 %v9803_v23  ;;  %v10058_v31 = vcombine.low %v971_v17, %v979_v18 }
  0x96   :  { %v707_v25 = vld [vmem:[#allocation2 + $0x12c0] sm:$0xff]  ;;  %6448 = vmatpush1.bf16.msra.mxu0 %v9802_v30 }
  0x97   :  { %v955_v27 = vld [vmem:[#allocation2 + $0x1a80] sm:$0xff]  ;;  %v9787_v32 = vcombine.high %v699_v24, %v707_v25  ;;  %6488 = vmatprep.subr.bf16.mxu1 %v10059_v26  ;;  %v9786_v38 = vcombine.low %v699_v24, %v707_v25 }
  0x98   :  { %v963_v28 = vld [vmem:[#allocation2 + $0x1ac0] sm:$0xff]  ;;  %6489 = vmatpush1.bf16.msra.mxu1 %v10058_v31 }
  0x99   :  { %v683_v33 = vld [vmem:[#allocation2 + $0x1200] sm:$0xff]  ;;  %v10043_v36 = vcombine.high %v955_v27, %v963_v28  ;;  %6449 = vmatprep.subr.bf16.mxu0 %v9787_v32  ;;  %v10042_v39 = vcombine.low %v955_v27, %v963_v28 }
  0x9a   :  { %v691_v34 = vld [vmem:[#allocation2 + $0x1240] sm:$0xff]  ;;  %6450 = vmatpush1.bf16.msra.mxu0 %v9786_v38 }
  0x9b   :  { %v939_v35 = vld [vmem:[#allocation2 + $0x1a00] sm:$0xff]  ;;  %v9771_v40 = vcombine.high %v683_v33, %v691_v34  ;;  %6490 = vmatprep.subr.bf16.mxu1 %v10043_v36  ;;  %v9770_v46 = vcombine.low %v683_v33, %v691_v34 }
  0x9c   :  { %v947_v37 = vld [vmem:[#allocation2 + $0x1a40] sm:$0xff]  ;;  %6491 = vmatpush1.bf16.msra.mxu1 %v10042_v39 }
  0x9d   :  { %v667_v41 = vld [vmem:[#allocation2 + $0x1180] sm:$0xff]  ;;  %v10027_v44 = vcombine.high %v939_v35, %v947_v37  ;;  %6451 = vmatprep.subr.bf16.mxu0 %v9771_v40  ;;  %v10026_v47 = vcombine.low %v939_v35, %v947_v37 }
  0x9e   :  { %v675_v42 = vld [vmem:[#allocation2 + $0x11c0] sm:$0xff]  ;;  %6452 = vmatpush1.bf16.msra.mxu0 %v9770_v46 }
  0x9f   :  { %v923_v43 = vld [vmem:[#allocation2 + $0x1980] sm:$0xff]  ;;  %v9755_v48 = vcombine.high %v667_v41, %v675_v42  ;;  %6492 = vmatprep.subr.bf16.mxu1 %v10027_v44  ;;  %v9754_v56 = vcombine.low %v667_v41, %v675_v42 }
  0xa0   :  { %v931_v45 = vld [vmem:[#allocation2 + $0x19c0] sm:$0xff]  ;;  %6493 = vmatpush1.bf16.msra.mxu1 %v10026_v47 }
  0xa1   :  { %v651_v49 = vld [vmem:[#allocation2 + $0x1100] sm:$0xff]  ;;  %v10011_v52 = vcombine.high %v923_v43, %v931_v45  ;;  %6453 = vmatprep.subr.bf16.mxu0 %v9755_v48  ;;  %v10010_v57 = vcombine.low %v923_v43, %v931_v45 }
  0xa2   :  { %v659_v50 = vld [vmem:[#allocation2 + $0x1140] sm:$0xff]  ;;  %6454 = vmatpush1.bf16.msra.mxu0 %v9754_v56 }
  0xa3   :  { %v907_v51 = vld [vmem:[#allocation2 + $0x1900] sm:$0xff]  ;;  %v9739_v60 = vcombine.high %v651_v49, %v659_v50  ;;  %6494 = vmatprep.subr.bf16.mxu1 %v10011_v52  ;;  %v9738_v2 = vcombine.low %v651_v49, %v659_v50 }
  0xa4   :  { %v915_v55 = vld [vmem:[#allocation2 + $0x1940] sm:$0xff]  ;;  %6495 = vmatpush1.bf16.msra.mxu1 %v10010_v57 }
  0xa5   :  { %v635_v61 = vld [vmem:[#allocation2 + $0x1080] sm:$0xff]  ;;  %v9995_v0 = vcombine.high %v907_v51, %v915_v55  ;;  %6455 = vmatprep.subr.bf16.mxu0 %v9739_v60  ;;  %v9994_v3 = vcombine.low %v907_v51, %v915_v55 }
  0xa6   :  { %v643_v62 = vld [vmem:[#allocation2 + $0x10c0] sm:$0xff]  ;;  %6456 = vmatpush1.bf16.msra.mxu0 %v9738_v2 }
  0xa7   :  { %v891_v63 = vld [vmem:[#allocation2 + $0x1880] sm:$0xff]  ;;  %v9723_v4 = vcombine.high %v635_v61, %v643_v62  ;;  %6496 = vmatprep.subr.bf16.mxu1 %v9995_v0  ;;  %v9722_v10 = vcombine.low %v635_v61, %v643_v62 }
  0xa8   :  { %v899_v1 = vld [vmem:[#allocation2 + $0x18c0] sm:$0xff]  ;;  %6497 = vmatpush1.bf16.msra.mxu1 %v9994_v3 }
  0xa9   :  { %v619_v5 = vld [vmem:[#allocation2 + $0x1000] sm:$0xff]  ;;  %v9979_v8 = vcombine.high %v891_v63, %v899_v1  ;;  %6457 = vmatprep.subr.bf16.mxu0 %v9723_v4  ;;  %v9978_v11 = vcombine.low %v891_v63, %v899_v1 }
  0xaa   :  { %v627_v6 = vld [vmem:[#allocation2 + $0x1040] sm:$0xff]  ;;  %6458 = vmatpush1.bf16.msra.mxu0 %v9722_v10 }
  0xab   :  { %v875_v7 = vld [vmem:[#allocation2 + $0x1800] sm:$0xff]  ;;  %v9707_v12 = vcombine.high %v619_v5, %v627_v6  ;;  %6498 = vmatprep.subr.bf16.mxu1 %v9979_v8  ;;  %v9706_v21 = vcombine.low %v619_v5, %v627_v6 }
  0xac   :  { %v883_v9 = vld [vmem:[#allocation2 + $0x1840] sm:$0xff]  ;;  %6499 = vmatpush1.bf16.msra.mxu1 %v9978_v11 }
  0xad   :  { %v859_v13 = vld [vmem:[#allocation2 + $0x1780] sm:$0xff]  ;;  %v9963_v17 = vcombine.high %v875_v7, %v883_v9  ;;  %6459 = vmatprep.subr.bf16.mxu0 %v9707_v12  ;;  %v9962_v53 = vcombine.low %v875_v7, %v883_v9 }
  0xae   :  { %v867_v14 = vld [vmem:[#allocation2 + $0x17c0] sm:$0xff]  ;;  %6460 = vmatpush1.bf16.msra.mxu0 %v9706_v21 }
  0xaf   :  { %v1115_v15 = vld [vmem:[#allocation2 + $0x1f80] sm:$0xff]  ;;  %v9947_v23 = vcombine.high %v859_v13, %v867_v14  ;;  %6500 = vmatprep.subr.bf16.mxu1 %v9963_v17  ;;  %v9946_v30 = vcombine.low %v859_v13, %v867_v14 }
  0xb0   :  { %v1123_v18 = vld [vmem:[#allocation2 + $0x1fc0] sm:$0xff]  ;;  %6501 = vmatpush1.bf16.msra.mxu1 %v9962_v53 }
  0xb1   :  { %v843_v24 = vld [vmem:[#allocation2 + $0x1700] sm:$0xff]  ;;  %v10203_v27 = vcombine.high %v1115_v15, %v1123_v18  ;;  %6461 = vmatprep.subr.bf16.mxu0 %v9947_v23  ;;  %v10202_v31 = vcombine.low %v1115_v15, %v1123_v18 }
  0xb2   :  { %v851_v25 = vld [vmem:[#allocation2 + $0x1740] sm:$0xff]  ;;  %6462 = vmatpush2.bf16.msra.mxu0 %v9946_v30 }
  0xb3   :  { %v1099_v26 = vld [vmem:[#allocation2 + $0x1f00] sm:$0xff]  ;;  %v9931_v32 = vcombine.high %v843_v24, %v851_v25  ;;  %6502 = vmatprep.subr.bf16.mxu1 %v10203_v27  ;;  %v9930_v38 = vcombine.low %v843_v24, %v851_v25  ;;  %v220_v24 = vld [vmem:[#allocation2 + $0x388] sm:$0xff] }
  0xb4   :  { %v1107_v28 = vld [vmem:[#allocation2 + $0x1f40] sm:$0xff]  ;;  %6503 = vmatpush2.bf16.msra.mxu1 %v10202_v31  ;;  %v228_v25 = vld [vmem:[#allocation2 + $0x3c8] sm:$0xff] }
  0xb5   :  { %v827_v33 = vld [vmem:[#allocation2 + $0x1680] sm:$0xff]  ;;  %v10187_v36 = vcombine.high %v1099_v26, %v1107_v28  ;;  %6463 = vmatprep.subr.bf16.mxu0 %v9931_v32  ;;  %v10186_v39 = vcombine.low %v1099_v26, %v1107_v28  ;;  %v476_v26 = vld [vmem:[#allocation2 + $0xb88] sm:$0xff]  ;;  %v9309_v32 = vcombine.high %v220_v24, %v228_v25 }
  0xb6   :  { %v835_v34 = vld [vmem:[#allocation2 + $0x16c0] sm:$0xff]  ;;  %6464 = vmatpush2.bf16.msra.mxu0 %v9930_v38  ;;  %v484_v28 = vld [vmem:[#allocation2 + $0xbc8] sm:$0xff]  ;;  %v10972_v38 = vcombine.low %v10947_v19, %v10947_v19 }
  0xb7   :  { %v1083_v35 = vld [vmem:[#allocation2 + $0x1e80] sm:$0xff]  ;;  %v9915_v40 = vcombine.high %v827_v33, %v835_v34  ;;  %6504 = vmatprep.subr.bf16.mxu1 %v10187_v36  ;;  %v9914_v46 = vcombine.low %v827_v33, %v835_v34  ;;  %v204_v33 = vld [vmem:[#allocation2 + $0x308] sm:$0xff]  ;;  %v9565_v36 = vcombine.high %v476_v26, %v484_v28 }
  0xb8   :  { %v1091_v37 = vld [vmem:[#allocation2 + $0x1ec0] sm:$0xff]  ;;  %6505 = vmatpush2.bf16.msra.mxu1 %v10186_v39  ;;  %v212_v34 = vld [vmem:[#allocation2 + $0x348] sm:$0xff]  ;;  %v10976_v39 = vcombine.low %v10956_v22, %v10956_v22 }
  0xb9   :  { %v811_v41 = vld [vmem:[#allocation2 + $0x1600] sm:$0xff]  ;;  %v10171_v44 = vcombine.high %v1083_v35, %v1091_v37  ;;  %6465 = vmatprep.subr.bf16.mxu0 %v9915_v40  ;;  %v10170_v47 = vcombine.low %v1083_v35, %v1091_v37  ;;  %v460_v35 = vld [vmem:[#allocation2 + $0xb08] sm:$0xff]  ;;  %v9308_v40 = vcombine.low %v220_v24, %v228_v25  ;;  %v9292_v19 = vcombine.low %v204_v33, %v212_v34 }
  0xba   :  { %v819_v42 = vld [vmem:[#allocation2 + $0x1640] sm:$0xff]  ;;  %6466 = vmatpush2.bf16.msra.mxu0 %v9914_v46  ;;  %v468_v37 = vld [vmem:[#allocation2 + $0xb48] sm:$0xff] }
  0xbb   :  { %v1067_v43 = vld [vmem:[#allocation2 + $0x1e00] sm:$0xff]  ;;  %v9899_v48 = vcombine.high %v811_v41, %v819_v42  ;;  %6506 = vmatprep.subr.bf16.mxu1 %v10171_v44  ;;  %v9898_v56 = vcombine.low %v811_v41, %v819_v42  ;;  %v9564_v41 = vcombine.low %v476_v26, %v484_v28  ;;  %v9293_v42 = vcombine.high %v204_v33, %v212_v34  ;;  %v444_v46 = vld [vmem:[#allocation2 + $0xa88] sm:$0xff] }
  0xbc   :  { %v1075_v45 = vld [vmem:[#allocation2 + $0x1e40] sm:$0xff]  ;;  %6507 = vmatpush2.bf16.msra.mxu1 %v10170_v47  ;;  %v9549_v44 = vcombine.high %v460_v35, %v468_v37  ;;  %v452_v47 = vld [vmem:[#allocation2 + $0xac8] sm:$0xff]  ;;  %v9548_v22 = vcombine.low %v460_v35, %v468_v37 }
  0xbd   :  { %v795_v49 = vld [vmem:[#allocation2 + $0x1580] sm:$0xff]  ;;  %v10155_v52 = vcombine.high %v1067_v43, %v1075_v45  ;;  %6467 = vmatprep.subr.bf16.mxu0 %v9899_v48  ;;  %v10154_v57 = vcombine.low %v1067_v43, %v1075_v45  ;;  %v188_v43 = vld [vmem:[#allocation2 + $0x288] sm:$0xff] }
  0xbe   :  { %v803_v50 = vld [vmem:[#allocation2 + $0x15c0] sm:$0xff]  ;;  %6468 = vmatpush2.bf16.msra.mxu0 %v9898_v56  ;;  %v196_v45 = vld [vmem:[#allocation2 + $0x2c8] sm:$0xff] }
  0xbf   :  { %v1051_v51 = vld [vmem:[#allocation2 + $0x1d80] sm:$0xff]  ;;  %v9883_v60 = vcombine.high %v795_v49, %v803_v50  ;;  %6508 = vmatprep.subr.bf16.mxu1 %v10155_v52  ;;  %v9882_v2 = vcombine.low %v795_v49, %v803_v50  ;;  %v9277_v48 = vcombine.high %v188_v43, %v196_v45  ;;  %v172_v49 = vld [vmem:[#allocation2 + $0x208] sm:$0xff]  ;;  %v9533_v52 = vcombine.high %v444_v46, %v452_v47 }
  0xc0   :  { %v1059_v55 = vld [vmem:[#allocation2 + $0x1dc0] sm:$0xff]  ;;  %6509 = vmatpush2.bf16.msra.mxu1 %v10154_v57  ;;  %v180_v50 = vld [vmem:[#allocation2 + $0x248] sm:$0xff]  ;;  %v9276_v56 = vcombine.low %v188_v43, %v196_v45  ;;  %v9532_v57 = vcombine.low %v444_v46, %v452_v47 }
  0xc1   :  { %v779_v61 = vld [vmem:[#allocation2 + $0x1500] sm:$0xff]  ;;  %v10139_v0 = vcombine.high %v1051_v51, %v1059_v55  ;;  %6469 = vmatprep.subr.bf16.mxu0 %v9883_v60  ;;  %v10138_v3 = vcombine.low %v1051_v51, %v1059_v55  ;;  %v428_v51 = vld [vmem:[#allocation2 + $0xa08] sm:$0xff]  ;;  %v9261_v60 = vcombine.high %v172_v49, %v180_v50 }
  0xc2   :  { %v787_v62 = vld [vmem:[#allocation2 + $0x1540] sm:$0xff]  ;;  %6470 = vmatpush2.bf16.msra.mxu0 %v9882_v2  ;;  %v436_v55 = vld [vmem:[#allocation2 + $0xa48] sm:$0xff]  ;;  %v9260_v2 = vcombine.low %v172_v49, %v180_v50 }
  0xc3   :  { %v1035_v63 = vld [vmem:[#allocation2 + $0x1d00] sm:$0xff]  ;;  %v9867_v4 = vcombine.high %v779_v61, %v787_v62  ;;  %6510 = vmatprep.subr.bf16.mxu1 %v10139_v0  ;;  %v9866_v10 = vcombine.low %v779_v61, %v787_v62  ;;  %v156_v61 = vld [vmem:[#allocation2 + $0x188] sm:$0xff]  ;;  %v9517_v0 = vcombine.high %v428_v51, %v436_v55 }
  0xc4   :  { %v1043_v1 = vld [vmem:[#allocation2 + $0x1d40] sm:$0xff]  ;;  %6511 = vmatpush2.bf16.msra.mxu1 %v10138_v3  ;;  %v164_v62 = vld [vmem:[#allocation2 + $0x1c8] sm:$0xff]  ;;  %v9516_v3 = vcombine.low %v428_v51, %v436_v55 }
  0xc5   :  { %v763_v5 = vld [vmem:[#allocation2 + $0x1480] sm:$0xff]  ;;  %v10123_v8 = vcombine.high %v1035_v63, %v1043_v1  ;;  %6471 = vmatprep.subr.bf16.mxu0 %v9867_v4  ;;  %v10122_v11 = vcombine.low %v1035_v63, %v1043_v1  ;;  %v412_v63 = vld [vmem:[#allocation2 + $0x988] sm:$0xff]  ;;  %v9245_v4 = vcombine.high %v156_v61, %v164_v62 }
  0xc6   :  { %v771_v6 = vld [vmem:[#allocation2 + $0x14c0] sm:$0xff]  ;;  %6472 = vmatpush2.bf16.msra.mxu0 %v9866_v10  ;;  %v420_v1 = vld [vmem:[#allocation2 + $0x9c8] sm:$0xff]  ;;  %v9244_v10 = vcombine.low %v156_v61, %v164_v62 }
  0xc7   :  { %v1019_v7 = vld [vmem:[#allocation2 + $0x1c80] sm:$0xff]  ;;  %v9851_v12 = vcombine.high %v763_v5, %v771_v6  ;;  %6512 = vmatprep.subr.bf16.mxu1 %v10123_v8  ;;  %v9850_v21 = vcombine.low %v763_v5, %v771_v6  ;;  %v140_v5 = vld [vmem:[#allocation2 + $0x108] sm:$0xff]  ;;  %v9501_v8 = vcombine.high %v412_v63, %v420_v1 }
  0xc8   :  { %v1027_v9 = vld [vmem:[#allocation2 + $0x1cc0] sm:$0xff]  ;;  %6513 = vmatpush2.bf16.msra.mxu1 %v10122_v11  ;;  %v148_v6 = vld [vmem:[#allocation2 + $0x148] sm:$0xff]  ;;  %v9500_v11 = vcombine.low %v412_v63, %v420_v1 }
  0xc9   :  { %v747_v13 = vld [vmem:[#allocation2 + $0x1400] sm:$0xff]  ;;  %v10107_v17 = vcombine.high %v1019_v7, %v1027_v9  ;;  %6473 = vmatprep.subr.bf16.mxu0 %v9851_v12  ;;  %v10106_v53 = vcombine.low %v1019_v7, %v1027_v9  ;;  %v396_v7 = vld [vmem:[#allocation2 + $0x908] sm:$0xff]  ;;  %v9229_v12 = vcombine.high %v140_v5, %v148_v6 }
  0xca   :  { %v755_v14 = vld [vmem:[#allocation2 + $0x1440] sm:$0xff]  ;;  %6474 = vmatpush2.bf16.msra.mxu0 %v9850_v21  ;;  %v404_v9 = vld [vmem:[#allocation2 + $0x948] sm:$0xff]  ;;  %v9228_v21 = vcombine.low %v140_v5, %v148_v6 }
  0xcb   :  { %v1003_v15 = vld [vmem:[#allocation2 + $0x1c00] sm:$0xff]  ;;  %v9835_v23 = vcombine.high %v747_v13, %v755_v14  ;;  %6514 = vmatprep.subr.bf16.mxu1 %v10107_v17  ;;  %v9834_v30 = vcombine.low %v747_v13, %v755_v14  ;;  %v124_v13 = vld [vmem:[#allocation2 + $0x88] sm:$0xff]  ;;  %v9485_v17 = vcombine.high %v396_v7, %v404_v9 }
  0xcc   :  { %v1011_v18 = vld [vmem:[#allocation2 + $0x1c40] sm:$0xff]  ;;  %6515 = vmatpush2.bf16.msra.mxu1 %v10106_v53  ;;  %v132_v14 = vld [vmem:[#allocation2 + $0xc8] sm:$0xff]  ;;  %v9484_v53 = vcombine.low %v396_v7, %v404_v9 }
  0xcd   :  { %v10091_v27 = vcombine.high %v1003_v15, %v1011_v18  ;;  %6475 = vmatprep.subr.bf16.mxu0 %v9835_v23  ;;  %v10090_v31 = vcombine.low %v1003_v15, %v1011_v18  ;;  %v380_v15 = vld [vmem:[#allocation2 + $0x888] sm:$0xff]  ;;  %v9213_v23 = vcombine.high %v124_v13, %v132_v14 }
  0xce   :  { %6476 = vmatpush2.bf16.msra.mxu0 %v9834_v30  ;;  %v388_v18 = vld [vmem:[#allocation2 + $0x8c8] sm:$0xff]  ;;  %v9212_v30 = vcombine.low %v124_v13, %v132_v14 }
  0xcf   :  { %6516 = vmatprep.subr.bf16.mxu1 %v10091_v27  ;;  %6527 = vmatprep.subr.bf16.mxu0 %v9309_v32  ;;  %v108_v24 = vld [vmem:[#allocation2 + $0x8] sm:$0xff]  ;;  %v9469_v27 = vcombine.high %v380_v15, %v388_v18 }
  0xd0   :  { %6517 = vmatpush2.bf16.msra.mxu1 %v10090_v31  ;;  %v116_v25 = vld [vmem:[#allocation2 + $0x48] sm:$0xff]  ;;  %v9468_v31 = vcombine.low %v380_v15, %v388_v18 }
  0xd1   :  { %6568 = vmatprep.subr.bf16.mxu1 %v9565_v36  ;;  %6478 = vmatmul.mubr.bf16.vlgmr.msra.gmra.mxu0 %v10972_v38  ;;  %v364_v26 = vld [vmem:[#allocation2 + $0x808] sm:$0xff]  ;;  %v9197_v32 = vcombine.high %v108_v24, %v116_v25 }
  0xd2   :  { %6528 = vmatpush1.bf16.msra.mxu0 %v9308_v40  ;;  %6559 = vmatprep.mubr.bf16.mxu0 %v10932_v58  ;;  %v372_v28 = vld [vmem:[#allocation2 + $0x848] sm:$0xff]  ;;  %v9196_v40 = vcombine.low %v108_v24, %v116_v25 }
  0xd3   :  { %6519 = vmatmul.mubr.bf16.vlgmr.msra.gmra.mxu1 %v10976_v39  ;;  %6529 = vmatprep.subr.bf16.mxu0 %v9293_v42  ;;  %v348_v33 = vld [vmem:[#allocation2 + $0x788] sm:$0xff]  ;;  %v9453_v36 = vcombine.high %v364_v26, %v372_v28 }
  0xd4   :  { %6569 = vmatpush1.bf16.msra.mxu1 %v9564_v41  ;;  %6600 = vmatprep.mubr.bf16.mxu1 %v10936_v59  ;;  %v356_v34 = vld [vmem:[#allocation2 + $0x7c8] sm:$0xff]  ;;  %v9452_v41 = vcombine.low %v364_v26, %v372_v28 }
  0xd5   :  { %6570 = vmatprep.subr.bf16.mxu1 %v9549_v44  ;;  %v604_v35 = vld [vmem:[#allocation2 + $0xf88] sm:$0xff]  ;;  %v9437_v42 = vcombine.high %v348_v33, %v356_v34 }
  0xd6   :  { %6530 = vmatpush1.bf16.msra.mxu0 %v9292_v19  ;;  %v612_v37 = vld [vmem:[#allocation2 + $0xfc8] sm:$0xff]  ;;  %v9436_v19 = vcombine.low %v348_v33, %v356_v34 }
  0xd7   :  { %6531 = vmatprep.subr.bf16.mxu0 %v9277_v48  ;;  %v332_v43 = vld [vmem:[#allocation2 + $0x708] sm:$0xff]  ;;  %v9693_v46 = vcombine.high %v604_v35, %v612_v37 }
  0xd8   :  { %6571 = vmatpush1.bf16.msra.mxu1 %v9548_v22  ;;  %v340_v44 = vld [vmem:[#allocation2 + $0x748] sm:$0xff]  ;;  %v9692_v22 = vcombine.low %v604_v35, %v612_v37 }
  0xd9   :  { %6572 = vmatprep.subr.bf16.mxu1 %v9533_v52  ;;  %v588_v45 = vld [vmem:[#allocation2 + $0xf08] sm:$0xff]  ;;  %v9421_v48 = vcombine.high %v332_v43, %v340_v44 }
  0xda   :  { %6532 = vmatpush1.bf16.msra.mxu0 %v9276_v56  ;;  %v596_v47 = vld [vmem:[#allocation2 + $0xf48] sm:$0xff]  ;;  %v9420_v56 = vcombine.low %v332_v43, %v340_v44 }
  0xdb   :  { %6533 = vmatprep.subr.bf16.mxu0 %v9261_v60  ;;  %v316_v49 = vld [vmem:[#allocation2 + $0x688] sm:$0xff]  ;;  %v9677_v52 = vcombine.high %v588_v45, %v596_v47 }
  0xdc   :  { %6573 = vmatpush1.bf16.msra.mxu1 %v9532_v57  ;;  %v324_v50 = vld [vmem:[#allocation2 + $0x6c8] sm:$0xff]  ;;  %v9676_v57 = vcombine.low %v588_v45, %v596_v47 }
  0xdd   :  { %6574 = vmatprep.subr.bf16.mxu1 %v9517_v0  ;;  %v572_v51 = vld [vmem:[#allocation2 + $0xe88] sm:$0xff]  ;;  %v9405_v60 = vcombine.high %v316_v49, %v324_v50 }
  0xde   :  { %6534 = vmatpush1.bf16.msra.mxu0 %v9260_v2  ;;  %v580_v55 = vld [vmem:[#allocation2 + $0xec8] sm:$0xff]  ;;  %v9404_v2 = vcombine.low %v316_v49, %v324_v50 }
  0xdf   :  { %6535 = vmatprep.subr.bf16.mxu0 %v9245_v4  ;;  %v300_v61 = vld [vmem:[#allocation2 + $0x608] sm:$0xff]  ;;  %v9661_v0 = vcombine.high %v572_v51, %v580_v55 }
  0xe0   :  { %6575 = vmatpush1.bf16.msra.mxu1 %v9516_v3  ;;  %v308_v62 = vld [vmem:[#allocation2 + $0x648] sm:$0xff]  ;;  %v9660_v3 = vcombine.low %v572_v51, %v580_v55 }
  0xe1   :  { %6576 = vmatprep.subr.bf16.mxu1 %v9501_v8  ;;  %v556_v63 = vld [vmem:[#allocation2 + $0xe08] sm:$0xff]  ;;  %v9389_v4 = vcombine.high %v300_v61, %v308_v62 }
  0xe2   :  { %6536 = vmatpush1.bf16.msra.mxu0 %v9244_v10  ;;  %v564_v1 = vld [vmem:[#allocation2 + $0xe48] sm:$0xff]  ;;  %v9388_v10 = vcombine.low %v300_v61, %v308_v62 }
  0xe3   :  { %6537 = vmatprep.subr.bf16.mxu0 %v9229_v12  ;;  %v284_v5 = vld [vmem:[#allocation2 + $0x588] sm:$0xff]  ;;  %v9645_v8 = vcombine.high %v556_v63, %v564_v1 }
  0xe4   :  { %6577 = vmatpush1.bf16.msra.mxu1 %v9500_v11  ;;  %v292_v6 = vld [vmem:[#allocation2 + $0x5c8] sm:$0xff]  ;;  %v9644_v11 = vcombine.low %v556_v63, %v564_v1 }
  0xe5   :  { %6578 = vmatprep.subr.bf16.mxu1 %v9485_v17  ;;  %v540_v7 = vld [vmem:[#allocation2 + $0xd88] sm:$0xff]  ;;  %v9373_v12 = vcombine.high %v284_v5, %v292_v6 }
  0xe6   :  { %6538 = vmatpush1.bf16.msra.mxu0 %v9228_v21  ;;  %v548_v9 = vld [vmem:[#allocation2 + $0xdc8] sm:$0xff]  ;;  %v9372_v21 = vcombine.low %v284_v5, %v292_v6 }
  0xe7   :  { %6539 = vmatprep.subr.bf16.mxu0 %v9213_v23  ;;  %v268_v13 = vld [vmem:[#allocation2 + $0x508] sm:$0xff]  ;;  %v9629_v17 = vcombine.high %v540_v7, %v548_v9 }
  0xe8   :  { %6579 = vmatpush1.bf16.msra.mxu1 %v9484_v53  ;;  %v276_v14 = vld [vmem:[#allocation2 + $0x548] sm:$0xff]  ;;  %v9628_v53 = vcombine.low %v540_v7, %v548_v9 }
  0xe9   :  { %6580 = vmatprep.subr.bf16.mxu1 %v9469_v27  ;;  %v524_v15 = vld [vmem:[#allocation2 + $0xd08] sm:$0xff]  ;;  %v9357_v23 = vcombine.high %v268_v13, %v276_v14 }
  0xea   :  { %6540 = vmatpush1.bf16.msra.mxu0 %v9212_v30  ;;  %v532_v18 = vld [vmem:[#allocation2 + $0xd48] sm:$0xff]  ;;  %v9356_v30 = vcombine.low %v268_v13, %v276_v14 }
  0xeb   :  { %6541 = vmatprep.subr.bf16.mxu0 %v9197_v32  ;;  %v252_v24 = vld [vmem:[#allocation2 + $0x488] sm:$0xff]  ;;  %v9613_v27 = vcombine.high %v524_v15, %v532_v18 }
  0xec   :  { %6581 = vmatpush1.bf16.msra.mxu1 %v9468_v31  ;;  %v260_v25 = vld [vmem:[#allocation2 + $0x4c8] sm:$0xff]  ;;  %v9612_v31 = vcombine.low %v524_v15, %v532_v18 }
  0xed   :  { %6582 = vmatprep.subr.bf16.mxu1 %v9453_v36  ;;  %v508_v26 = vld [vmem:[#allocation2 + $0xc88] sm:$0xff]  ;;  %v9341_v32 = vcombine.high %v252_v24, %v260_v25 }
  0xee   :  { %6542 = vmatpush1.bf16.msra.mxu0 %v9196_v40  ;;  %v516_v28 = vld [vmem:[#allocation2 + $0xcc8] sm:$0xff]  ;;  %v9340_v40 = vcombine.low %v252_v24, %v260_v25 }
  0xef   :  { %6543 = vmatprep.subr.bf16.mxu0 %v9437_v42  ;;  %v236_v33 = vld [vmem:[#allocation2 + $0x408] sm:$0xff]  ;;  %v9597_v36 = vcombine.high %v508_v26, %v516_v28 }
  0xf0   :  { %6583 = vmatpush1.bf16.msra.mxu1 %v9452_v41  ;;  %v244_v34 = vld [vmem:[#allocation2 + $0x448] sm:$0xff]  ;;  %v9596_v41 = vcombine.low %v508_v26, %v516_v28 }
  0xf1   :  { %6584 = vmatprep.subr.bf16.mxu1 %v9693_v46  ;;  %v492_v35 = vld [vmem:[#allocation2 + $0xc08] sm:$0xff]  ;;  %v9325_v42 = vcombine.high %v236_v33, %v244_v34 }
  0xf2   :  { %6544 = vmatpush2.bf16.msra.mxu0 %v9436_v19  ;;  %v500_v37 = vld [vmem:[#allocation2 + $0xc48] sm:$0xff]  ;;  %v9324_v19 = vcombine.low %v236_v33, %v244_v34 }
  0xf3   :  { %6545 = vmatprep.subr.bf16.mxu0 %v9421_v48  ;;  %v732_v43 = vld [vmem:[#allocation2 + $0x1388] sm:$0xff]  ;;  %v9581_v46 = vcombine.high %v492_v35, %v500_v37 }
  0xf4   :  { %6585 = vmatpush2.bf16.msra.mxu1 %v9692_v22  ;;  %v740_v44 = vld [vmem:[#allocation2 + $0x13c8] sm:$0xff]  ;;  %v9580_v22 = vcombine.low %v492_v35, %v500_v37 }
  0xf5   :  { %6586 = vmatprep.subr.bf16.mxu1 %v9677_v52  ;;  %v988_v45 = vld [vmem:[#allocation2 + $0x1b88] sm:$0xff]  ;;  %v9821_v48 = vcombine.high %v732_v43, %v740_v44 }
  0xf6   :  { %6546 = vmatpush2.bf16.msra.mxu0 %v9420_v56  ;;  %v996_v47 = vld [vmem:[#allocation2 + $0x1bc8] sm:$0xff]  ;;  %v9820_v56 = vcombine.low %v732_v43, %v740_v44 }
  0xf7   :  { %6547 = vmatprep.subr.bf16.mxu0 %v9405_v60  ;;  %v716_v49 = vld [vmem:[#allocation2 + $0x1308] sm:$0xff]  ;;  %v10077_v52 = vcombine.high %v988_v45, %v996_v47 }
  0xf8   :  { %6587 = vmatpush2.bf16.msra.mxu1 %v9676_v57  ;;  %v724_v50 = vld [vmem:[#allocation2 + $0x1348] sm:$0xff]  ;;  %v10076_v57 = vcombine.low %v988_v45, %v996_v47 }
  0xf9   :  { %6588 = vmatprep.subr.bf16.mxu1 %v9661_v0  ;;  %v972_v51 = vld [vmem:[#allocation2 + $0x1b08] sm:$0xff]  ;;  %v9805_v60 = vcombine.high %v716_v49, %v724_v50 }
  0xfa   :  { %6548 = vmatpush2.bf16.msra.mxu0 %v9404_v2  ;;  %v980_v55 = vld [vmem:[#allocation2 + $0x1b48] sm:$0xff]  ;;  %v9804_v2 = vcombine.low %v716_v49, %v724_v50 }
  0xfb   :  { %6549 = vmatprep.subr.bf16.mxu0 %v9389_v4  ;;  %v700_v61 = vld [vmem:[#allocation2 + $0x1288] sm:$0xff]  ;;  %v10061_v0 = vcombine.high %v972_v51, %v980_v55 }
  0xfc   :  { %6589 = vmatpush2.bf16.msra.mxu1 %v9660_v3  ;;  %v708_v62 = vld [vmem:[#allocation2 + $0x12c8] sm:$0xff]  ;;  %v10060_v3 = vcombine.low %v972_v51, %v980_v55 }
  0xfd   :  { %6590 = vmatprep.subr.bf16.mxu1 %v9645_v8  ;;  %v956_v63 = vld [vmem:[#allocation2 + $0x1a88] sm:$0xff]  ;;  %v9789_v4 = vcombine.high %v700_v61, %v708_v62 }
  0xfe   :  { %6550 = vmatpush2.bf16.msra.mxu0 %v9388_v10  ;;  %v964_v1 = vld [vmem:[#allocation2 + $0x1ac8] sm:$0xff]  ;;  %v9788_v10 = vcombine.low %v700_v61, %v708_v62 }
  0xff   :  { %6551 = vmatprep.subr.bf16.mxu0 %v9373_v12  ;;  %v684_v5 = vld [vmem:[#allocation2 + $0x1208] sm:$0xff]  ;;  %v10045_v8 = vcombine.high %v956_v63, %v964_v1 }
 0x100   :  { %6591 = vmatpush2.bf16.msra.mxu1 %v9644_v11  ;;  %v692_v6 = vld [vmem:[#allocation2 + $0x1248] sm:$0xff]  ;;  %v10044_v11 = vcombine.low %v956_v63, %v964_v1 }
 0x101   :  { %6592 = vmatprep.subr.bf16.mxu1 %v9629_v17  ;;  %v940_v7 = vld [vmem:[#allocation2 + $0x1a08] sm:$0xff]  ;;  %v9773_v12 = vcombine.high %v684_v5, %v692_v6 }
 0x102   :  { %6552 = vmatpush2.bf16.msra.mxu0 %v9372_v21  ;;  %v948_v9 = vld [vmem:[#allocation2 + $0x1a48] sm:$0xff]  ;;  %v9772_v21 = vcombine.low %v684_v5, %v692_v6 }
 0x103   :  { %6553 = vmatprep.subr.bf16.mxu0 %v9357_v23  ;;  %v668_v13 = vld [vmem:[#allocation2 + $0x1188] sm:$0xff]  ;;  %v10029_v15 = vcombine.high %v940_v7, %v948_v9 }
 0x104   :  { %6593 = vmatpush2.bf16.msra.mxu1 %v9628_v53  ;;  %v676_v14 = vld [vmem:[#allocation2 + $0x11c8] sm:$0xff]  ;;  %v10028_v53 = vcombine.low %v940_v7, %v948_v9 }
 0x105   :  { %6594 = vmatprep.subr.bf16.mxu1 %v9613_v27  ;;  %v924_v17 = vld [vmem:[#allocation2 + $0x1988] sm:$0xff]  ;;  %v9757_v23 = vcombine.high %v668_v13, %v676_v14 }
 0x106   :  { %6554 = vmatpush2.bf16.msra.mxu0 %v9356_v30  ;;  %v932_v18 = vld [vmem:[#allocation2 + $0x19c8] sm:$0xff]  ;;  %v9756_v30 = vcombine.low %v668_v13, %v676_v14 }
 0x107   :  { %6555 = vmatprep.subr.bf16.mxu0 %v9341_v32  ;;  %v10013_v24 = vcombine.high %v924_v17, %v932_v18  ;;  %v652_v25 = vld [vmem:[#allocation2 + $0x1108] sm:$0xff] }
 0x108   :  { %6595 = vmatpush2.bf16.msra.mxu1 %v9612_v31  ;;  %v660_v26 = vld [vmem:[#allocation2 + $0x1148] sm:$0xff]  ;;  %v10012_v31 = vcombine.low %v924_v17, %v932_v18 }
 0x109   :  { %6596 = vmatprep.subr.bf16.mxu1 %v9597_v36  ;;  %v908_v27 = vld [vmem:[#allocation2 + $0x1908] sm:$0xff]  ;;  %v9741_v32 = vcombine.high %v652_v25, %v660_v26 }
 0x10a   :  { %6556 = vmatpush2.bf16.msra.mxu0 %v9340_v40  ;;  %v916_v28 = vld [vmem:[#allocation2 + $0x1948] sm:$0xff]  ;;  %v9740_v40 = vcombine.low %v652_v25, %v660_v26 }
 0x10b   :  { %6557 = vmatprep.subr.bf16.mxu0 %v9325_v42  ;;  %v9997_v33 = vcombine.high %v908_v27, %v916_v28  ;;  %v636_v34 = vld [vmem:[#allocation2 + $0x1088] sm:$0xff] }
 0x10c   :  { %6597 = vmatpush2.bf16.msra.mxu1 %v9596_v41  ;;  %v644_v35 = vld [vmem:[#allocation2 + $0x10c8] sm:$0xff]  ;;  %v9996_v41 = vcombine.low %v908_v27, %v916_v28 }
 0x10d   :  { %6598 = vmatprep.subr.bf16.mxu1 %v9581_v46  ;;  %v892_v36 = vld [vmem:[#allocation2 + $0x1888] sm:$0xff]  ;;  %v9725_v42 = vcombine.high %v636_v34, %v644_v35 }
 0x10e   :  { %6558 = vmatpush2.bf16.msra.mxu0 %v9324_v19  ;;  %v900_v37 = vld [vmem:[#allocation2 + $0x18c8] sm:$0xff]  ;;  %v9724_v19 = vcombine.low %v636_v34, %v644_v35 }
 0x10f   :  { %6609 = vmatprep.subr.bf16.mxu0 %v9821_v48  ;;  %v9981_v43 = vcombine.high %v892_v36, %v900_v37  ;;  %v620_v44 = vld [vmem:[#allocation2 + $0x1008] sm:$0xff] }
 0x110   :  { %6599 = vmatpush2.bf16.msra.mxu1 %v9580_v22  ;;  %v628_v45 = vld [vmem:[#allocation2 + $0x1048] sm:$0xff]  ;;  %v9980_v22 = vcombine.low %v892_v36, %v900_v37 }
 0x111   :  { %6650 = vmatprep.subr.bf16.mxu1 %v10077_v52  ;;  %6560 = vmatmul.mubr.bf16.vlgmr.msra.gmra.mxu0 %v10942_v16  ;;  %v876_v46 = vld [vmem:[#allocation2 + $0x1808] sm:$0xff]  ;;  %v9709_v48 = vcombine.high %v620_v44, %v628_v45 }
 0x112   :  { %6610 = vmatpush1.bf16.msra.mxu0 %v9820_v56  ;;  %6641 = vmatprep.mubr.bf16.mxu0 %v10960_v54  ;;  %v884_v47 = vld [vmem:[#allocation2 + $0x1848] sm:$0xff]  ;;  %v9708_v56 = vcombine.low %v620_v44, %v628_v45 }
 0x113   :  { %6601 = vmatmul.mubr.bf16.vlgmr.msra.gmra.mxu1 %v10951_v20  ;;  %6611 = vmatprep.subr.bf16.mxu0 %v9805_v60  ;;  %v9965_v49 = vcombine.high %v876_v46, %v884_v47  ;;  %v860_v50 = vld [vmem:[#allocation2 + $0x1788] sm:$0xff] }
 0x114   :  { %6651 = vmatpush1.bf16.msra.mxu1 %v10076_v57  ;;  %6682 = vmatprep.mubr.bf16.mxu1 %v10965_v29  ;;  %v868_v51 = vld [vmem:[#allocation2 + $0x17c8] sm:$0xff]  ;;  %v9964_v57 = vcombine.low %v876_v46, %v884_v47 }
 0x115   :  { %6652 = vmatprep.subr.bf16.mxu1 %v10061_v0  ;;  %v1116_v52 = vld [vmem:[#allocation2 + $0x1f88] sm:$0xff]  ;;  %v9949_v60 = vcombine.high %v860_v50, %v868_v51 }
 0x116   :  { %6612 = vmatpush1.bf16.msra.mxu0 %v9804_v2  ;;  %v1124_v55 = vld [vmem:[#allocation2 + $0x1fc8] sm:$0xff]  ;;  %v9948_v2 = vcombine.low %v860_v50, %v868_v51 }
 0x117   :  { %6613 = vmatprep.subr.bf16.mxu0 %v9789_v4  ;;  %v10205_v61 = vcombine.high %v1116_v52, %v1124_v55  ;;  %v844_v62 = vld [vmem:[#allocation2 + $0x1708] sm:$0xff] }
 0x118   :  { %6653 = vmatpush1.bf16.msra.mxu1 %v10060_v3  ;;  %v852_v63 = vld [vmem:[#allocation2 + $0x1748] sm:$0xff]  ;;  %v10204_v3 = vcombine.low %v1116_v52, %v1124_v55 }
 0x119   :  { %6654 = vmatprep.subr.bf16.mxu1 %v10045_v8  ;;  %v1100_v0 = vld [vmem:[#allocation2 + $0x1f08] sm:$0xff]  ;;  %v9933_v4 = vcombine.high %v844_v62, %v852_v63 }
 0x11a   :  { %6614 = vmatpush1.bf16.msra.mxu0 %v9788_v10  ;;  %v1108_v1 = vld [vmem:[#allocation2 + $0x1f48] sm:$0xff]  ;;  %v9932_v10 = vcombine.low %v844_v62, %v852_v63 }
 0x11b   :  { %6615 = vmatprep.subr.bf16.mxu0 %v9773_v12  ;;  %v10189_v5 = vcombine.high %v1100_v0, %v1108_v1  ;;  %v828_v6 = vld [vmem:[#allocation2 + $0x1688] sm:$0xff] }
 0x11c   :  { %6655 = vmatpush1.bf16.msra.mxu1 %v10044_v11  ;;  %v836_v7 = vld [vmem:[#allocation2 + $0x16c8] sm:$0xff]  ;;  %v10188_v11 = vcombine.low %v1100_v0, %v1108_v1  ;;  %v221_v0 = vld [vmem:[#allocation2 + $0x390] sm:$0xff] }
 0x11d   :  { %6656 = vmatprep.subr.bf16.mxu1 %v10029_v15  ;;  %v1084_v8 = vld [vmem:[#allocation2 + $0x1e88] sm:$0xff]  ;;  %v9917_v12 = vcombine.high %v828_v6, %v836_v7  ;;  %v229_v1 = vld [vmem:[#allocation2 + $0x3d0] sm:$0xff] }
 0x11e   :  { %6616 = vmatpush1.bf16.msra.mxu0 %v9772_v21  ;;  %v1092_v9 = vld [vmem:[#allocation2 + $0x1ec8] sm:$0xff]  ;;  %v9916_v21 = vcombine.low %v828_v6, %v836_v7  ;;  %v10989_v7 = vld [vmem:[#allocation4] sm:$0xff] }
 0x11f   :  { %6617 = vmatprep.subr.bf16.mxu0 %v9757_v23  ;;  %v10173_v13 = vcombine.high %v1084_v8, %v1092_v9  ;;  %v812_v14 = vld [vmem:[#allocation2 + $0x1608] sm:$0xff] }
 0x120   :  { %6657 = vmatpush1.bf16.msra.mxu1 %v10028_v53  ;;  %v820_v15 = vld [vmem:[#allocation2 + $0x1648] sm:$0xff]  ;;  %v10172_v53 = vcombine.low %v1084_v8, %v1092_v9  ;;  %v9311_v8 = vcombine.high %v221_v0, %v229_v1 }
 0x121   :  { %6658 = vmatprep.subr.bf16.mxu1 %v10013_v24  ;;  %v1068_v17 = vld [vmem:[#allocation2 + $0x1e08] sm:$0xff]  ;;  %v9901_v23 = vcombine.high %v812_v14, %v820_v15 }
 0x122   :  { %6618 = vmatpush1.bf16.msra.mxu0 %v9756_v30  ;;  %v1076_v18 = vld [vmem:[#allocation2 + $0x1e48] sm:$0xff]  ;;  %v9900_v30 = vcombine.low %v812_v14, %v820_v15  ;;  %v469_v14 = vld [vmem:[#allocation2 + $0xb50] sm:$0xff] }
 0x123   :  { %6619 = vmatprep.subr.bf16.mxu0 %v9741_v32  ;;  %v10157_v24 = vcombine.high %v1068_v17, %v1076_v18  ;;  %v796_v25 = vld [vmem:[#allocation2 + $0x1588] sm:$0xff] }
 0x124   :  { %6659 = vmatpush1.bf16.msra.mxu1 %v10012_v31  ;;  %v804_v26 = vld [vmem:[#allocation2 + $0x15c8] sm:$0xff]  ;;  %v10156_v31 = vcombine.low %v1068_v17, %v1076_v18  ;;  %v9310_v17 = vcombine.low %v221_v0, %v229_v1 }
 0x125   :  { %6660 = vmatprep.subr.bf16.mxu1 %v9997_v33  ;;  %v1052_v27 = vld [vmem:[#allocation2 + $0x1d88] sm:$0xff]  ;;  %v9885_v32 = vcombine.high %v796_v25, %v804_v26 }
 0x126   :  { %6620 = vmatpush1.bf16.msra.mxu0 %v9740_v40  ;;  %v1060_v28 = vld [vmem:[#allocation2 + $0x1dc8] sm:$0xff]  ;;  %v9884_v40 = vcombine.low %v796_v25, %v804_v26  ;;  %v197_v25 = vld [vmem:[#allocation2 + $0x2d0] sm:$0xff] }
 0x127   :  { %6621 = vmatprep.subr.bf16.mxu0 %v9725_v42  ;;  %v10141_v33 = vcombine.high %v1052_v27, %v1060_v28  ;;  %v780_v34 = vld [vmem:[#allocation2 + $0x1508] sm:$0xff] }
 0x128   :  { %6661 = vmatpush1.bf16.msra.mxu1 %v9996_v41  ;;  %v788_v35 = vld [vmem:[#allocation2 + $0x1548] sm:$0xff]  ;;  %v10140_v41 = vcombine.low %v1052_v27, %v1060_v28  ;;  %v445_v27 = vld [vmem:[#allocation2 + $0xa90] sm:$0xff] }
 0x129   :  { %6662 = vmatprep.subr.bf16.mxu1 %v9981_v43  ;;  %v1036_v36 = vld [vmem:[#allocation2 + $0x1d08] sm:$0xff]  ;;  %v9869_v42 = vcombine.high %v780_v34, %v788_v35  ;;  %v453_v28 = vld [vmem:[#allocation2 + $0xad0] sm:$0xff] }
 0x12a   :  { %6622 = vmatpush1.bf16.msra.mxu0 %v9724_v19  ;;  %v1044_v37 = vld [vmem:[#allocation2 + $0x1d48] sm:$0xff]  ;;  %v9868_v19 = vcombine.low %v780_v34, %v788_v35 }
 0x12b   :  { %6623 = vmatprep.subr.bf16.mxu0 %v9709_v48  ;;  %v10125_v43 = vcombine.high %v1036_v36, %v1044_v37  ;;  %v764_v44 = vld [vmem:[#allocation2 + $0x1488] sm:$0xff]  ;;  %v10124_v48 = vcombine.low %v1036_v36, %v1044_v37 }
 0x12c   :  { %6663 = vmatpush1.bf16.msra.mxu1 %v9980_v22  ;;  %v772_v45 = vld [vmem:[#allocation2 + $0x14c8] sm:$0xff]  ;;  %v1135_v22 = vlaneseq }
 0x12d   :  { %6664 = vmatprep.subr.bf16.mxu1 %v9965_v49  ;;  %v1020_v46 = vld [vmem:[#allocation2 + $0x1c88] sm:$0xff]  ;;  %v9853_v49 = vcombine.high %v764_v44, %v772_v45 }
 0x12e   :  { %6624 = vmatpush1.bf16.msra.mxu0 %v9708_v56  ;;  %v1028_v47 = vld [vmem:[#allocation2 + $0x1cc8] sm:$0xff] }
 0x12f   :  { %6625 = vmatprep.subr.bf16.mxu0 %v9949_v60  ;;  %v10109_v50 = vcombine.high %v1020_v46, %v1028_v47  ;;  %v748_v51 = vld [vmem:[#allocation2 + $0x1408] sm:$0xff]  ;;  %v10986_v60 = vshrl.u32 %v1135_v22, 7 }
 0x130   :  { %6665 = vmatpush1.bf16.msra.mxu1 %v9964_v57  ;;  %v756_v52 = vld [vmem:[#allocation2 + $0x1448] sm:$0xff]  ;;  %v9852_v57 = vcombine.low %v764_v44, %v772_v45  ;;  %v429_v45 = vld [vmem:[#allocation2 + $0xa10] sm:$0xff] }
 0x131   :  { %6666 = vmatprep.subr.bf16.mxu1 %v10205_v61  ;;  %v1004_v55 = vld [vmem:[#allocation2 + $0x1c08] sm:$0xff]  ;;  %v10108_v61 = vcombine.low %v1020_v46, %v1028_v47  ;;  %v9837_v62 = vcombine.high %v748_v51, %v756_v52  ;;  %v437_v46 = vld [vmem:[#allocation2 + $0xa50] sm:$0xff] }
 0x132   :  { %6626 = vmatpush2.bf16.msra.mxu0 %v9948_v2  ;;  %v1012_v56 = vld [vmem:[#allocation2 + $0x1c48] sm:$0xff]  ;;  %v477_v2 = vld [vmem:[#allocation2 + $0xb90] sm:$0xff] }
 0x133   :  { %6627 = vmatprep.subr.bf16.mxu0 %v9933_v4  ;;  %v10093_v63 = vcombine.high %v1004_v55, %v1012_v56  ;;  %v9836_v4 = vcombine.low %v748_v51, %v756_v52  ;;  %v10092_v6 = vcombine.low %v1004_v55, %v1012_v56  ;;  %v9519_v52 = vcombine.high %v429_v45, %v437_v46  ;;  %v157_v55 = vld [vmem:[#allocation2 + $0x190] sm:$0xff] }
 0x134   :  { %6667 = vmatpush2.bf16.msra.mxu1 %v10204_v3  ;;  %v485_v3 = vld [vmem:[#allocation2 + $0xbd0] sm:$0xff] }
 0x135   :  { %6668 = vmatprep.subr.bf16.mxu1 %v10189_v5  ;;  %v1137_v5 = vsub.s32 0, %v10986_v60  ;;  %v9567_v9 = vcombine.high %v477_v2, %v485_v3  ;;  %v9566_v18 = vcombine.low %v477_v2, %v485_v3  ;;  %v165_v56 = vld [vmem:[#allocation2 + $0x1d0] sm:$0xff] }
 0x136   :  { %6628 = vmatpush2.bf16.msra.mxu0 %v9932_v10  ;;  %v1141_v10 = vsub.s32 1, %v10986_v60  ;;  %v9247_v0 = vcombine.high %v157_v55, %v165_v56  ;;  %v141_v2 = vld [vmem:[#allocation2 + $0x110] sm:$0xff] }
 0x137   :  { %6629 = vmatprep.subr.bf16.mxu0 %v9917_v12  ;;  %v213_v12 = vld [vmem:[#allocation2 + $0x350] sm:$0xff]  ;;  %v1138_v15 = vrot.slane %v10989_v7, %v1137_v5 }
 0x138   :  { %6669 = vmatpush2.bf16.msra.mxu1 %v10188_v11  ;;  %v205_v11 = vld [vmem:[#allocation2 + $0x310] sm:$0xff] }
 0x139   :  { %6670 = vmatprep.subr.bf16.mxu1 %v10173_v13  ;;  %v461_v13 = vld [vmem:[#allocation2 + $0xb10] sm:$0xff] }
 0x13a   :  { %6630 = vmatpush2.bf16.msra.mxu0 %v9916_v21  ;;  %v9295_v21 = vcombine.high %v205_v11, %v213_v12  ;;  %v9550_v34 = vcombine.low %v461_v13, %v469_v14  ;;  %v149_v3 = vld [vmem:[#allocation2 + $0x150] sm:$0xff] }
 0x13b   :  { %6631 = vmatprep.subr.bf16.mxu0 %v9901_v23  ;;  %v9551_v23 = vcombine.high %v461_v13, %v469_v14  ;;  %v125_v13 = vld [vmem:[#allocation2 + $0x90] sm:$0xff] }
 0x13c   :  { %6671 = vmatpush2.bf16.msra.mxu1 %v10172_v53  ;;  %v1142_v53 = vrot.slane %v10989_v7, %v1141_v10  ;;  %v133_v14 = vld [vmem:[#allocation2 + $0xd0] sm:$0xff] }
 0x13d   :  { %6672 = vmatprep.subr.bf16.mxu1 %v10157_v24  ;;  %v189_v24 = vld [vmem:[#allocation2 + $0x290] sm:$0xff] }
 0x13e   :  { %6632 = vmatpush2.bf16.msra.mxu0 %v9900_v30  ;;  %v9279_v35 = vcombine.high %v189_v24, %v197_v25  ;;  %v9278_v22 = vcombine.low %v189_v24, %v197_v25  ;;  %v109_v24 = vld [vmem:[#allocation2 + $0x10] sm:$0xff] }
 0x13f   :  { %6633 = vmatprep.subr.bf16.mxu0 %v9885_v32  ;;  %v9294_v32 = vcombine.low %v205_v11, %v213_v12  ;;  %v9231_v11 = vcombine.high %v141_v2, %v149_v3  ;;  %v117_v25 = vld [vmem:[#allocation2 + $0x50] sm:$0xff] }
 0x140   :  { %6673 = vmatpush2.bf16.msra.mxu1 %v10156_v31 }
 0x141   :  { %6674 = vmatprep.subr.bf16.mxu1 %v10141_v33 }
 0x142   :  { %6634 = vmatpush2.bf16.msra.mxu0 %v9884_v40 }
 0x143   :  { %6635 = vmatprep.subr.bf16.mxu0 %v9869_v42  ;;  %v173_v42 = vld [vmem:[#allocation2 + $0x210] sm:$0xff] }
 0x144   :  { %6675 = vmatpush2.bf16.msra.mxu1 %v10140_v41  ;;  %v9535_v41 = vcombine.high %v445_v27, %v453_v28 }
 0x145   :  { %6676 = vmatprep.subr.bf16.mxu1 %v10125_v43  ;;  %v181_v43 = vld [vmem:[#allocation2 + $0x250] sm:$0xff] }
 0x146   :  { %6636 = vmatpush2.bf16.msra.mxu0 %v9868_v19 }
 0x147   :  { %6637 = vmatprep.subr.bf16.mxu0 %v9853_v49  ;;  %v9534_v49 = vcombine.low %v445_v27, %v453_v28  ;;  %v373_v27 = vld [vmem:[#allocation2 + $0x850] sm:$0xff]  ;;  %v9214_v28 = vcombine.low %v125_v13, %v133_v14 }
 0x148   :  { %6677 = vmatpush2.bf16.msra.mxu1 %v10124_v48 }
 0x149   :  { %6678 = vmatprep.subr.bf16.mxu1 %v10109_v50  ;;  %v9263_v50 = vcombine.high %v173_v42, %v181_v43 }
 0x14a   :  { %6638 = vmatpush2.bf16.msra.mxu0 %v9852_v57  ;;  %v413_v57 = vld [vmem:[#allocation2 + $0x990] sm:$0xff] }
 0x14b   :  { %6639 = vmatprep.subr.bf16.mxu0 %v9837_v62  ;;  %v9262_v62 = vcombine.low %v173_v42, %v181_v43 }
 0x14c   :  { %6679 = vmatpush2.bf16.msra.mxu1 %v10108_v61  ;;  %v421_v61 = vld [vmem:[#allocation2 + $0x9d0] sm:$0xff] }
 0x14d   :  { %6680 = vmatprep.subr.bf16.mxu1 %v10093_v63  ;;  %v9518_v63 = vcombine.low %v429_v45, %v437_v46  ;;  %v9503_v1 = vcombine.high %v413_v57, %v421_v61  ;;  %v341_v45 = vld [vmem:[#allocation2 + $0x750] sm:$0xff] }
 0x14e   :  { %6640 = vmatpush2.bf16.msra.mxu0 %v9836_v4  ;;  %v397_v4 = vld [vmem:[#allocation2 + $0x910] sm:$0xff] }
 0x14f   :  { %6691 = vmatprep.subr.bf16.mxu0 %v9311_v8  ;;  %v9246_v8 = vcombine.low %v157_v55, %v165_v56  ;;  %v589_v46 = vld [vmem:[#allocation2 + $0xf10] sm:$0xff] }
 0x150   :  { %6681 = vmatpush2.bf16.msra.mxu1 %v10092_v6  ;;  %v405_v6 = vld [vmem:[#allocation2 + $0x950] sm:$0xff] }
 0x151   :  { %6732 = vmatprep.subr.bf16.mxu1 %v9567_v9  ;;  %v6397_v26 = vpop.f32.mrf.mxu0  ;;  %6642 = vmatmul.mubr.bf16.vlgmr.msra.gmra.mxu0 %v10972_v38  ;;  %v9502_v9 = vcombine.low %v413_v57, %v421_v61  ;;  %v9487_v12 = vcombine.high %v397_v4, %v405_v6  ;;  %v573_v55 = vld [vmem:[#allocation2 + $0xe90] sm:$0xff] }
 0x152   :  { %v6398_v30 = vadd.f32 %v6397_v26, %v1138_v15  ;;  %6692 = vmatpush1.bf16.msra.mxu0 %v9310_v17  ;;  %6723 = vmatprep.mubr.bf16.mxu0 %v10932_v58  ;;  %v381_v15 = vld [vmem:[#allocation2 + $0x890] sm:$0xff] }
 0x153   :  { %v6438_v31 = vpop.f32.mrf.mxu1  ;;  %6683 = vmatmul.mubr.bf16.vlgmr.msra.gmra.mxu1 %v10976_v39  ;;  %v6399_v33 = vpop.f32.mrf.mxu0  ;;  %6693 = vmatprep.subr.bf16.mxu0 %v9295_v21  ;;  %v389_v17 = vld [vmem:[#allocation2 + $0x8d0] sm:$0xff]  ;;  %v9486_v21 = vcombine.low %v397_v4, %v405_v6 }
 0x154   :  { %6733 = vmatpush1.bf16.msra.mxu1 %v9566_v18  ;;  %v11000_v36 = vadd.f32 %v6438_v31, %v6398_v30  ;;  %v6400_v37 = vadd.f32 %v6399_v33, %v1142_v53  ;;  %6764 = vmatprep.mubr.bf16.mxu1 %v10936_v59  ;;  %v9230_v18 = vcombine.low %v141_v2, %v149_v3  ;;  %v365_v26 = vld [vmem:[#allocation2 + $0x810] sm:$0xff] }
 0x155   :  { %v6440_v40 = vpop.f32.mrf.mxu1  ;;  %6734 = vmatprep.subr.bf16.mxu1 %v9551_v23  ;;  %v6401_v44 = vpop.f32.mrf.mxu0  ;;  %v9215_v53 = vcombine.high %v125_v13, %v133_v14  ;;  %v9471_v23 = vcombine.high %v381_v15, %v389_v17  ;;  %v9470_v30 = vcombine.low %v381_v15, %v389_v17  ;;  %v9199_v31 = vcombine.high %v109_v24, %v117_v25  ;;  %v349_v33 = vld [vmem:[#allocation2 + $0x790] sm:$0xff] }
 0x156   :  { %v11004_v47 = vadd.f32 %v6440_v40, %v6400_v37  ;;  %6694 = vmatpush1.bf16.msra.mxu0 %v9294_v32  ;;  %v9455_v32 = vcombine.high %v365_v26, %v373_v27  ;;  %v613_v37 = vld [vmem:[#allocation2 + $0xfd0] sm:$0xff]  ;;  %v9198_v40 = vcombine.low %v109_v24, %v117_v25 }
 0x157   :  { %v6442_v19 = vpop.f32.mrf.mxu1  ;;  %v6402_v48 = vpop.f32.mrf.mxu0  ;;  %6695 = vmatprep.subr.bf16.mxu0 %v9279_v35  ;;  %v605_v35 = vld [vmem:[#allocation2 + $0xf90] sm:$0xff] }
 0x158   :  { %6735 = vmatpush1.bf16.msra.mxu1 %v9550_v34  ;;  %v357_v34 = vld [vmem:[#allocation2 + $0x7d0] sm:$0xff]  ;;  %v9695_v43 = vcombine.high %v605_v35, %v613_v37  ;;  %v9694_v48 = vcombine.low %v605_v35, %v613_v37 }
 0x159   :  { %v6443_v51 = vpop.f32.mrf.mxu1  ;;  %6736 = vmatprep.subr.bf16.mxu1 %v9535_v41  ;;  %v9454_v41 = vcombine.low %v365_v26, %v373_v27  ;;  %v9439_v42 = vcombine.high %v349_v33, %v357_v34  ;;  %v333_v44 = vld [vmem:[#allocation2 + $0x710] sm:$0xff] }
 0x15a   :  { %6696 = vmatpush1.bf16.msra.mxu0 %v9278_v22  ;;  %v597_v19 = vld [vmem:[#allocation2 + $0xf50] sm:$0xff]  ;;  %v9438_v22 = vcombine.low %v349_v33, %v357_v34  ;;  %v9422_v57 = vcombine.low %v333_v44, %v341_v45 }
 0x15b   :  { %6697 = vmatprep.subr.bf16.mxu0 %v9263_v50  ;;  %v9679_v50 = vcombine.high %v589_v46, %v597_v19  ;;  %v317_v51 = vld [vmem:[#allocation2 + $0x690] sm:$0xff]  ;;  %v9678_v61 = vcombine.low %v589_v46, %v597_v19 }
 0x15c   :  { %6737 = vmatpush1.bf16.msra.mxu1 %v9534_v49  ;;  %v9423_v49 = vcombine.high %v333_v44, %v341_v45  ;;  %v581_v56 = vld [vmem:[#allocation2 + $0xed0] sm:$0xff] }
 0x15d   :  { %6738 = vmatprep.subr.bf16.mxu1 %v9519_v52  ;;  %v325_v52 = vld [vmem:[#allocation2 + $0x6d0] sm:$0xff]  ;;  %v9662_v6 = vcombine.low %v573_v55, %v581_v56 }
 0x15e   :  { %6698 = vmatpush1.bf16.msra.mxu0 %v9262_v62  ;;  %v9407_v62 = vcombine.high %v317_v51, %v325_v52  ;;  %v557_v2 = vld [vmem:[#allocation2 + $0xe10] sm:$0xff]  ;;  %v9406_v4 = vcombine.low %v317_v51, %v325_v52 }
 0x15f   :  { %6699 = vmatprep.subr.bf16.mxu0 %v9247_v0  ;;  %v301_v0 = vld [vmem:[#allocation2 + $0x610] sm:$0xff] }
 0x160   :  { %6739 = vmatpush1.bf16.msra.mxu1 %v9518_v63  ;;  %v9663_v63 = vcombine.high %v573_v55, %v581_v56  ;;  %v565_v3 = vld [vmem:[#allocation2 + $0xe50] sm:$0xff] }
 0x161   :  { %6740 = vmatprep.subr.bf16.mxu1 %v9503_v1  ;;  %v309_v1 = vld [vmem:[#allocation2 + $0x650] sm:$0xff]  ;;  %v9646_v17 = vcombine.low %v557_v2, %v565_v3 }
 0x162   :  { %6700 = vmatpush1.bf16.msra.mxu0 %v9246_v8  ;;  %v9391_v8 = vcombine.high %v301_v0, %v309_v1  ;;  %v541_v13 = vld [vmem:[#allocation2 + $0xd90] sm:$0xff]  ;;  %v9390_v15 = vcombine.low %v301_v0, %v309_v1 }
 0x163   :  { %6701 = vmatprep.subr.bf16.mxu0 %v9231_v11  ;;  %v285_v11 = vld [vmem:[#allocation2 + $0x590] sm:$0xff] }
 0x164   :  { %6741 = vmatpush1.bf16.msra.mxu1 %v9502_v9  ;;  %v9647_v9 = vcombine.high %v557_v2, %v565_v3  ;;  %v549_v14 = vld [vmem:[#allocation2 + $0xdd0] sm:$0xff] }
 0x165   :  { %6742 = vmatprep.subr.bf16.mxu1 %v9487_v12  ;;  %v293_v12 = vld [vmem:[#allocation2 + $0x5d0] sm:$0xff]  ;;  %v9630_v27 = vcombine.low %v541_v13, %v549_v14 }
 0x166   :  { %6702 = vmatpush1.bf16.msra.mxu0 %v9230_v18  ;;  %v9375_v18 = vcombine.high %v285_v11, %v293_v12  ;;  %v525_v24 = vld [vmem:[#allocation2 + $0xd10] sm:$0xff]  ;;  %v9374_v26 = vcombine.low %v285_v11, %v293_v12 }
 0x167   :  { %6703 = vmatprep.subr.bf16.mxu0 %v9215_v53  ;;  %v269_v53 = vld [vmem:[#allocation2 + $0x510] sm:$0xff] }
 0x168   :  { %6743 = vmatpush1.bf16.msra.mxu1 %v9486_v21  ;;  %v9631_v21 = vcombine.high %v541_v13, %v549_v14  ;;  %v533_v25 = vld [vmem:[#allocation2 + $0xd50] sm:$0xff] }
 0x169   :  { %6744 = vmatprep.subr.bf16.mxu1 %v9471_v23  ;;  %v277_v23 = vld [vmem:[#allocation2 + $0x550] sm:$0xff]  ;;  %v9614_v37 = vcombine.low %v525_v24, %v533_v25 }
 0x16a   :  { %6704 = vmatpush1.bf16.msra.mxu0 %v9214_v28  ;;  %v9359_v28 = vcombine.high %v269_v53, %v277_v23  ;;  %v509_v33 = vld [vmem:[#allocation2 + $0xc90] sm:$0xff]  ;;  %v9358_v35 = vcombine.low %v269_v53, %v277_v23 }
 0x16b   :  { %6705 = vmatprep.subr.bf16.mxu0 %v9199_v31  ;;  %v253_v31 = vld [vmem:[#allocation2 + $0x490] sm:$0xff] }
 0x16c   :  { %6745 = vmatpush1.bf16.msra.mxu1 %v9470_v30  ;;  %v9615_v30 = vcombine.high %v525_v24, %v533_v25  ;;  %v517_v34 = vld [vmem:[#allocation2 + $0xcd0] sm:$0xff] }
 0x16d   :  { %6746 = vmatprep.subr.bf16.mxu1 %v9455_v32  ;;  %v261_v32 = vld [vmem:[#allocation2 + $0x4d0] sm:$0xff]  ;;  %v9598_v19 = vcombine.low %v509_v33, %v517_v34 }
 0x16e   :  { %6706 = vmatpush1.bf16.msra.mxu0 %v9198_v40  ;;  %v9343_v40 = vcombine.high %v253_v31, %v261_v32  ;;  %v493_v44 = vld [vmem:[#allocation2 + $0xc10] sm:$0xff]  ;;  %v9342_v46 = vcombine.low %v253_v31, %v261_v32 }
 0x16f   :  { %6707 = vmatprep.subr.bf16.mxu0 %v9439_v42  ;;  %v237_v42 = vld [vmem:[#allocation2 + $0x410] sm:$0xff] }
 0x170   :  { %6747 = vmatpush1.bf16.msra.mxu1 %v9454_v41  ;;  %v9599_v41 = vcombine.high %v509_v33, %v517_v34  ;;  %v501_v45 = vld [vmem:[#allocation2 + $0xc50] sm:$0xff] }
 0x171   :  { %6748 = vmatprep.subr.bf16.mxu1 %v9695_v43  ;;  %v245_v43 = vld [vmem:[#allocation2 + $0x450] sm:$0xff]  ;;  %v9582_v56 = vcombine.low %v493_v44, %v501_v45 }
 0x172   :  { %6708 = vmatpush2.bf16.msra.mxu0 %v9438_v22  ;;  %v9327_v22 = vcombine.high %v237_v42, %v245_v43  ;;  %v989_v51 = vld [vmem:[#allocation2 + $0x1b90] sm:$0xff]  ;;  %v9326_v55 = vcombine.low %v237_v42, %v245_v43 }
 0x173   :  { %6709 = vmatprep.subr.bf16.mxu0 %v9423_v49  ;;  %v733_v49 = vld [vmem:[#allocation2 + $0x1390] sm:$0xff] }
 0x174   :  { %6749 = vmatpush2.bf16.msra.mxu1 %v9694_v48  ;;  %v9583_v48 = vcombine.high %v493_v44, %v501_v45  ;;  %v997_v52 = vld [vmem:[#allocation2 + $0x1bd0] sm:$0xff] }
 0x175   :  { %6750 = vmatprep.subr.bf16.mxu1 %v9679_v50  ;;  %v741_v50 = vld [vmem:[#allocation2 + $0x13d0] sm:$0xff]  ;;  %v10078_v3 = vcombine.low %v989_v51, %v997_v52 }
 0x176   :  { %6710 = vmatpush2.bf16.msra.mxu0 %v9422_v57  ;;  %v9823_v57 = vcombine.high %v733_v49, %v741_v50  ;;  %v973_v0 = vld [vmem:[#allocation2 + $0x1b10] sm:$0xff]  ;;  %v9822_v2 = vcombine.low %v733_v49, %v741_v50 }
 0x177   :  { %6711 = vmatprep.subr.bf16.mxu0 %v9407_v62  ;;  %v717_v62 = vld [vmem:[#allocation2 + $0x1310] sm:$0xff] }
 0x178   :  { %6751 = vmatpush2.bf16.msra.mxu1 %v9678_v61  ;;  %v10079_v61 = vcombine.high %v989_v51, %v997_v52  ;;  %v981_v1 = vld [vmem:[#allocation2 + $0x1b50] sm:$0xff] }
 0x179   :  { %6752 = vmatprep.subr.bf16.mxu1 %v9663_v63  ;;  %v725_v63 = vld [vmem:[#allocation2 + $0x1350] sm:$0xff] }
 0x17a   :  { %6712 = vmatpush2.bf16.msra.mxu0 %v9406_v4  ;;  %v9807_v4 = vcombine.high %v717_v62, %v725_v63  ;;  %v957_v12 = vld [vmem:[#allocation2 + $0x1a90] sm:$0xff] }
 0x17b   :  { %6713 = vmatprep.subr.bf16.mxu0 %v9391_v8  ;;  %v701_v8 = vld [vmem:[#allocation2 + $0x1290] sm:$0xff] }
 0x17c   :  { %6753 = vmatpush2.bf16.msra.mxu1 %v9662_v6  ;;  %v10063_v6 = vcombine.high %v973_v0, %v981_v1  ;;  %v965_v13 = vld [vmem:[#allocation2 + $0x1ad0] sm:$0xff] }
 0x17d   :  { %6754 = vmatprep.subr.bf16.mxu1 %v9647_v9  ;;  %v709_v9 = vld [vmem:[#allocation2 + $0x12d0] sm:$0xff] }
 0x17e   :  { %6714 = vmatpush2.bf16.msra.mxu0 %v9390_v15  ;;  %v9791_v53 = vcombine.high %v701_v8, %v709_v9  ;;  %v949_v31 = vld [vmem:[#allocation2 + $0x1a50] sm:$0xff]  ;;  %v9790_v34 = vcombine.low %v701_v8, %v709_v9 }
 0x17f   :  { %6715 = vmatprep.subr.bf16.mxu0 %v9375_v18  ;;  %v669_v42 = vld [vmem:[#allocation2 + $0x1190] sm:$0xff] }
 0x180   :  { %6755 = vmatpush2.bf16.msra.mxu1 %v9646_v17  ;;  %v9806_v17 = vcombine.low %v717_v62, %v725_v63  ;;  %v677_v43 = vld [vmem:[#allocation2 + $0x11d0] sm:$0xff] }
 0x181   :  { %6756 = vmatprep.subr.bf16.mxu1 %v9631_v21  ;;  %v10062_v21 = vcombine.low %v973_v0, %v981_v1  ;;  %v925_v44 = vld [vmem:[#allocation2 + $0x1990] sm:$0xff] }
 0x182   :  { %6716 = vmatpush2.bf16.msra.mxu0 %v9374_v26  ;;  %v10047_v26 = vcombine.high %v957_v12, %v965_v13  ;;  %v933_v45 = vld [vmem:[#allocation2 + $0x19d0] sm:$0xff] }
 0x183   :  { %6717 = vmatprep.subr.bf16.mxu0 %v9359_v28  ;;  %v693_v28 = vld [vmem:[#allocation2 + $0x1250] sm:$0xff] }
 0x184   :  { %6757 = vmatpush2.bf16.msra.mxu1 %v9630_v27  ;;  %v685_v27 = vld [vmem:[#allocation2 + $0x1210] sm:$0xff] }
 0x185   :  { %6758 = vmatprep.subr.bf16.mxu1 %v9615_v30  ;;  %v941_v30 = vld [vmem:[#allocation2 + $0x1a10] sm:$0xff] }
 0x186   :  { %6718 = vmatpush2.bf16.msra.mxu0 %v9358_v35  ;;  %v653_v49 = vld [vmem:[#allocation2 + $0x1110] sm:$0xff] }
 0x187   :  { %6719 = vmatprep.subr.bf16.mxu0 %v9343_v40  ;;  %v661_v50 = vld [vmem:[#allocation2 + $0x1150] sm:$0xff] }
 0x188   :  { %6759 = vmatpush2.bf16.msra.mxu1 %v9614_v37  ;;  %v9775_v37 = vcombine.high %v685_v27, %v693_v28  ;;  %v909_v51 = vld [vmem:[#allocation2 + $0x1910] sm:$0xff] }
 0x189   :  { %6760 = vmatprep.subr.bf16.mxu1 %v9599_v41  ;;  %v10031_v41 = vcombine.high %v941_v30, %v949_v31  ;;  %v917_v52 = vld [vmem:[#allocation2 + $0x1950] sm:$0xff] }
 0x18a   :  { %6720 = vmatpush2.bf16.msra.mxu0 %v9342_v46  ;;  %v9774_v46 = vcombine.low %v685_v27, %v693_v28  ;;  %v637_v62 = vld [vmem:[#allocation2 + $0x1090] sm:$0xff] }
 0x18b   :  { %6721 = vmatprep.subr.bf16.mxu0 %v9327_v22  ;;  %v9759_v22 = vcombine.high %v669_v42, %v677_v43  ;;  %v645_v63 = vld [vmem:[#allocation2 + $0x10d0] sm:$0xff] }
 0x18c   :  { %6761 = vmatpush2.bf16.msra.mxu1 %v9598_v19  ;;  %v10030_v19 = vcombine.low %v941_v30, %v949_v31  ;;  %v893_v0 = vld [vmem:[#allocation2 + $0x1890] sm:$0xff] }
 0x18d   :  { %6762 = vmatprep.subr.bf16.mxu1 %v9583_v48  ;;  %v10015_v48 = vcombine.high %v925_v44, %v933_v45  ;;  %v901_v1 = vld [vmem:[#allocation2 + $0x18d0] sm:$0xff] }
 0x18e   :  { %6722 = vmatpush2.bf16.msra.mxu0 %v9326_v55  ;;  %v9758_v55 = vcombine.low %v669_v42, %v677_v43  ;;  %v621_v8 = vld [vmem:[#allocation2 + $0x1010] sm:$0xff] }
 0x18f   :  { %6773 = vmatprep.subr.bf16.mxu0 %v9823_v57  ;;  %v9743_v57 = vcombine.high %v653_v49, %v661_v50  ;;  %v629_v9 = vld [vmem:[#allocation2 + $0x1050] sm:$0xff] }
 0x190   :  { %6763 = vmatpush2.bf16.msra.mxu1 %v9582_v56  ;;  %v10014_v56 = vcombine.low %v925_v44, %v933_v45  ;;  %v853_v30 = vld [vmem:[#allocation2 + $0x1750] sm:$0xff] }
 0x191   :  { %6814 = vmatprep.subr.bf16.mxu1 %v10079_v61  ;;  %v6479_v11 = vpop.f32.mrf.mxu0  ;;  %6724 = vmatmul.mubr.bf16.vlgmr.msra.gmra.mxu0 %v10942_v16  ;;  %v9999_v61 = vcombine.high %v909_v51, %v917_v52  ;;  %v1101_v31 = vld [vmem:[#allocation2 + $0x1f10] sm:$0xff] }
 0x192   :  { %v6480_v14 = vadd.f32 %v6479_v11, %v11000_v36  ;;  %6774 = vmatpush1.bf16.msra.mxu0 %v9822_v2  ;;  %6805 = vmatprep.mubr.bf16.mxu0 %v10960_v54  ;;  %v9742_v2 = vcombine.low %v653_v49, %v661_v50  ;;  %v877_v11 = vld [vmem:[#allocation2 + $0x1810] sm:$0xff] }
 0x193   :  { %v6520_v15 = vpop.f32.mrf.mxu1  ;;  %6765 = vmatmul.mubr.bf16.vlgmr.msra.gmra.mxu1 %v10951_v20  ;;  %v6481_v18 = vpop.f32.mrf.mxu0  ;;  %6775 = vmatprep.subr.bf16.mxu0 %v9807_v4  ;;  %v9727_v4 = vcombine.high %v637_v62, %v645_v63  ;;  %v1085_v42 = vld [vmem:[#allocation2 + $0x1e90] sm:$0xff] }
 0x194   :  { %6815 = vmatpush1.bf16.msra.mxu1 %v10078_v3  ;;  %v11009_v23 = vadd.f32 %v6520_v15, %v6480_v14  ;;  %v6482_v24 = vadd.f32 %v6481_v18, %v11004_v47  ;;  %6846 = vmatprep.mubr.bf16.mxu1 %v10965_v29  ;;  %v10046_v47 = vcombine.low %v957_v12, %v965_v13  ;;  %v885_v12 = vld [vmem:[#allocation2 + $0x1850] sm:$0xff] }
 0x195   :  { %v6522_v25 = vpop.f32.mrf.mxu1  ;;  %6816 = vmatprep.subr.bf16.mxu1 %v10063_v6  ;;  %v6483_v36 = vpop.f32.mrf.mxu0  ;;  %v9998_v3 = vcombine.low %v909_v51, %v917_v52  ;;  %v9983_v6 = vcombine.high %v893_v0, %v901_v1  ;;  %v9726_v13 = vcombine.low %v637_v62, %v645_v63  ;;  %v9982_v14 = vcombine.low %v893_v0, %v901_v1  ;;  %v861_v18 = vld [vmem:[#allocation2 + $0x1790] sm:$0xff] }
 0x196   :  { %v11014_v32 = vadd.f32 %v6522_v25, %v6482_v24  ;;  %6776 = vmatpush1.bf16.msra.mxu0 %v9806_v17  ;;  %v9711_v15 = vcombine.high %v621_v8, %v629_v9  ;;  %v9967_v17 = vcombine.high %v877_v11, %v885_v12  ;;  %v1125_v24 = vld [vmem:[#allocation2 + $0x1fd0] sm:$0xff]  ;;  %v9710_v25 = vcombine.low %v621_v8, %v629_v9 }
 0x197   :  { %v6524_v33 = vpop.f32.mrf.mxu1  ;;  %v6484_v35 = vpop.f32.mrf.mxu0  ;;  %6777 = vmatprep.subr.bf16.mxu0 %v9791_v53  ;;  %v1117_v53 = vld [vmem:[#allocation2 + $0x1f90] sm:$0xff] }
 0x198   :  { %6817 = vmatpush1.bf16.msra.mxu1 %v10062_v21  ;;  %v869_v21 = vld [vmem:[#allocation2 + $0x17d0] sm:$0xff]  ;;  %v10207_v28 = vcombine.high %v1117_v53, %v1125_v24  ;;  %v10206_v35 = vcombine.low %v1117_v53, %v1125_v24 }
 0x199   :  { %v6525_v40 = vpop.f32.mrf.mxu1  ;;  %6818 = vmatprep.subr.bf16.mxu1 %v10047_v26  ;;  %v9966_v26 = vcombine.low %v877_v11, %v885_v12  ;;  %v9951_v27 = vcombine.high %v861_v18, %v869_v21  ;;  %v845_v36 = vld [vmem:[#allocation2 + $0x1710] sm:$0xff] }
 0x19a   :  { %6778 = vmatpush1.bf16.msra.mxu0 %v9790_v34  ;;  %v1109_v33 = vld [vmem:[#allocation2 + $0x1f50] sm:$0xff]  ;;  %v9950_v34 = vcombine.low %v861_v18, %v869_v21  ;;  %v9934_v44 = vcombine.low %v845_v36, %v853_v30 }
 0x19b   :  { %6779 = vmatprep.subr.bf16.mxu0 %v9775_v37  ;;  %v10191_v37 = vcombine.high %v1101_v31, %v1109_v33  ;;  %v829_v40 = vld [vmem:[#allocation2 + $0x1690] sm:$0xff]  ;;  %v10190_v45 = vcombine.low %v1101_v31, %v1109_v33 }
 0x19c   :  { %6819 = vmatpush1.bf16.msra.mxu1 %v10046_v47  ;;  %v9935_v47 = vcombine.high %v845_v36, %v853_v30  ;;  %v1093_v43 = vld [vmem:[#allocation2 + $0x1ed0] sm:$0xff] }
 0x19d   :  { %6820 = vmatprep.subr.bf16.mxu1 %v10031_v41  ;;  %v837_v41 = vld [vmem:[#allocation2 + $0x16d0] sm:$0xff]  ;;  %v10174_v52 = vcombine.low %v1085_v42, %v1093_v43 }
 0x19e   :  { %6780 = vmatpush1.bf16.msra.mxu0 %v9774_v46  ;;  %v9919_v46 = vcombine.high %v829_v40, %v837_v41  ;;  %v1069_v49 = vld [vmem:[#allocation2 + $0x1e10] sm:$0xff]  ;;  %v9918_v51 = vcombine.low %v829_v40, %v837_v41  ;;  %v478_v40 = vld [vmem:[#allocation2 + $0xb98] sm:$0xff] }
 0x19f   :  { %6781 = vmatprep.subr.bf16.mxu0 %v9759_v22  ;;  %v813_v22 = vld [vmem:[#allocation2 + $0x1610] sm:$0xff]  ;;  %v486_v41 = vld [vmem:[#allocation2 + $0xbd8] sm:$0xff] }
 0x1a0   :  { %6821 = vmatpush1.bf16.msra.mxu1 %v10030_v19  ;;  %v10175_v19 = vcombine.high %v1085_v42, %v1093_v43  ;;  %v1077_v50 = vld [vmem:[#allocation2 + $0x1e50] sm:$0xff]  ;;  %v1145_v43 = vsub.s32 2, %v10986_v60 }
 0x1a1   :  { %6822 = vmatprep.subr.bf16.mxu1 %v10015_v48  ;;  %v821_v48 = vld [vmem:[#allocation2 + $0x1650] sm:$0xff]  ;;  %v10158_v1 = vcombine.low %v1069_v49, %v1077_v50 }
 0x1a2   :  { %6782 = vmatpush1.bf16.msra.mxu0 %v9758_v55  ;;  %v9903_v55 = vcombine.high %v813_v22, %v821_v48  ;;  %v1053_v62 = vld [vmem:[#allocation2 + $0x1d90] sm:$0xff]  ;;  %v9902_v0 = vcombine.low %v813_v22, %v821_v48  ;;  %v206_v22 = vld [vmem:[#allocation2 + $0x318] sm:$0xff] }
 0x1a3   :  { %6783 = vmatprep.subr.bf16.mxu0 %v9743_v57  ;;  %v797_v57 = vld [vmem:[#allocation2 + $0x1590] sm:$0xff]  ;;  %v214_v48 = vld [vmem:[#allocation2 + $0x358] sm:$0xff] }
 0x1a4   :  { %6823 = vmatpush1.bf16.msra.mxu1 %v10014_v56  ;;  %v10159_v56 = vcombine.high %v1069_v49, %v1077_v50  ;;  %v1061_v63 = vld [vmem:[#allocation2 + $0x1dd0] sm:$0xff]  ;;  %v462_v49 = vld [vmem:[#allocation2 + $0xb18] sm:$0xff] }
 0x1a5   :  { %6824 = vmatprep.subr.bf16.mxu1 %v9999_v61  ;;  %v805_v61 = vld [vmem:[#allocation2 + $0x15d0] sm:$0xff]  ;;  %v10142_v12 = vcombine.low %v1053_v62, %v1061_v63  ;;  %v470_v50 = vld [vmem:[#allocation2 + $0xb58] sm:$0xff] }
 0x1a6   :  { %6784 = vmatpush1.bf16.msra.mxu0 %v9742_v2  ;;  %v9887_v2 = vcombine.high %v797_v57, %v805_v61  ;;  %v1037_v8 = vld [vmem:[#allocation2 + $0x1d10] sm:$0xff]  ;;  %v9886_v11 = vcombine.low %v797_v57, %v805_v61  ;;  %v9553_v61 = vcombine.high %v462_v49, %v470_v50 }
 0x1a7   :  { %6785 = vmatprep.subr.bf16.mxu0 %v9727_v4  ;;  %v781_v4 = vld [vmem:[#allocation2 + $0x1510] sm:$0xff] }
 0x1a8   :  { %6825 = vmatpush1.bf16.msra.mxu1 %v9998_v3  ;;  %v10143_v3 = vcombine.high %v1053_v62, %v1061_v63  ;;  %v1045_v9 = vld [vmem:[#allocation2 + $0x1d50] sm:$0xff]  ;;  %v190_v62 = vld [vmem:[#allocation2 + $0x298] sm:$0xff] }
 0x1a9   :  { %6826 = vmatprep.subr.bf16.mxu1 %v9983_v6  ;;  %v789_v6 = vld [vmem:[#allocation2 + $0x1550] sm:$0xff]  ;;  %v10126_v24 = vcombine.low %v1037_v8, %v1045_v9  ;;  %v198_v63 = vld [vmem:[#allocation2 + $0x2d8] sm:$0xff] }
 0x1aa   :  { %6786 = vmatpush1.bf16.msra.mxu0 %v9726_v13  ;;  %v9871_v13 = vcombine.high %v781_v4, %v789_v6  ;;  %v1021_v18 = vld [vmem:[#allocation2 + $0x1c90] sm:$0xff]  ;;  %v9870_v53 = vcombine.low %v781_v4, %v789_v6  ;;  %v9296_v6 = vcombine.low %v206_v22, %v214_v48 }
 0x1ab   :  { %6787 = vmatprep.subr.bf16.mxu0 %v9711_v15  ;;  %v765_v15 = vld [vmem:[#allocation2 + $0x1490] sm:$0xff] }
 0x1ac   :  { %6827 = vmatpush1.bf16.msra.mxu1 %v9982_v14  ;;  %v10127_v14 = vcombine.high %v1037_v8, %v1045_v9  ;;  %v1029_v21 = vld [vmem:[#allocation2 + $0x1cd0] sm:$0xff]  ;;  %v9552_v9 = vcombine.low %v462_v49, %v470_v50 }
 0x1ad   :  { %6828 = vmatprep.subr.bf16.mxu1 %v9967_v17  ;;  %v773_v17 = vld [vmem:[#allocation2 + $0x14d0] sm:$0xff]  ;;  %v10110_v33 = vcombine.low %v1021_v18, %v1029_v21 }
 0x1ae   :  { %6788 = vmatpush1.bf16.msra.mxu0 %v9710_v25  ;;  %v9855_v25 = vcombine.high %v765_v15, %v773_v17  ;;  %v1005_v36 = vld [vmem:[#allocation2 + $0x1c10] sm:$0xff]  ;;  %v9854_v31 = vcombine.low %v765_v15, %v773_v17  ;;  %v174_v15 = vld [vmem:[#allocation2 + $0x218] sm:$0xff] }
 0x1af   :  { %6789 = vmatprep.subr.bf16.mxu0 %v9951_v27  ;;  %v749_v27 = vld [vmem:[#allocation2 + $0x1410] sm:$0xff]  ;;  %v182_v17 = vld [vmem:[#allocation2 + $0x258] sm:$0xff] }
 0x1b0   :  { %6829 = vmatpush1.bf16.msra.mxu1 %v9966_v26  ;;  %v10111_v26 = vcombine.high %v1021_v18, %v1029_v21  ;;  %v1013_v30 = vld [vmem:[#allocation2 + $0x1c50] sm:$0xff]  ;;  %v430_v21 = vld [vmem:[#allocation2 + $0xa18] sm:$0xff] }
 0x1b1   :  { %6830 = vmatprep.subr.bf16.mxu1 %v10207_v28  ;;  %v757_v28 = vld [vmem:[#allocation2 + $0x1450] sm:$0xff] }
 0x1b2   :  { %6790 = vmatpush2.bf16.msra.mxu0 %v9950_v34  ;;  %v9839_v34 = vcombine.high %v749_v27, %v757_v28  ;;  %v9838_v42 = vcombine.low %v749_v27, %v757_v28 }
 0x1b3   :  { %6791 = vmatprep.subr.bf16.mxu0 %v9935_v47  ;;  %v222_v47 = vld [vmem:[#allocation2 + $0x398] sm:$0xff] }
 0x1b4   :  { %6831 = vmatpush2.bf16.msra.mxu1 %v10206_v35  ;;  %v10095_v35 = vcombine.high %v1005_v36, %v1013_v30 }
 0x1b5   :  { %6832 = vmatprep.subr.bf16.mxu1 %v10191_v37  ;;  %v230_v37 = vld [vmem:[#allocation2 + $0x3d8] sm:$0xff] }
 0x1b6   :  { %6792 = vmatpush2.bf16.msra.mxu0 %v9934_v44  ;;  %v10094_v44 = vcombine.low %v1005_v36, %v1013_v30  ;;  %v9265_v36 = vcombine.high %v174_v15, %v182_v17 }
 0x1b7   :  { %6793 = vmatprep.subr.bf16.mxu0 %v9919_v46  ;;  %v9569_v46 = vcombine.high %v478_v40, %v486_v41 }
 0x1b8   :  { %6833 = vmatpush2.bf16.msra.mxu1 %v10190_v45  ;;  %v9313_v45 = vcombine.high %v222_v47, %v230_v37 }
 0x1b9   :  { %6834 = vmatprep.subr.bf16.mxu1 %v10175_v19  ;;  %v1149_v19 = vsub.s32 3, %v10986_v60 }
 0x1ba   :  { %6794 = vmatpush2.bf16.msra.mxu0 %v9918_v51  ;;  %v1146_v51 = vrot.slane %v10989_v7, %v1145_v43 }
 0x1bb   :  { %6795 = vmatprep.subr.bf16.mxu0 %v9903_v55  ;;  %v9568_v55 = vcombine.low %v478_v40, %v486_v41  ;;  %v1150_v57 = vrot.slane %v10989_v7, %v1149_v19 }
 0x1bc   :  { %6835 = vmatpush2.bf16.msra.mxu1 %v10174_v52  ;;  %v9312_v52 = vcombine.low %v222_v47, %v230_v37  ;;  %v422_v47 = vld [vmem:[#allocation2 + $0x9d8] sm:$0xff]  ;;  %v9264_v37 = vcombine.low %v174_v15, %v182_v17 }
 0x1bd   :  { %6836 = vmatprep.subr.bf16.mxu1 %v10159_v56  ;;  %v9297_v56 = vcombine.high %v206_v22, %v214_v48  ;;  %v406_v22 = vld [vmem:[#allocation2 + $0x958] sm:$0xff] }
 0x1be   :  { %6796 = vmatpush2.bf16.msra.mxu0 %v9902_v0  ;;  %v614_v15 = vld [vmem:[#allocation2 + $0xfd8] sm:$0xff] }
 0x1bf   :  { %6797 = vmatprep.subr.bf16.mxu0 %v9887_v2  ;;  %v454_v2 = vld [vmem:[#allocation2 + $0xad8] sm:$0xff] }
 0x1c0   :  { %6837 = vmatpush2.bf16.msra.mxu1 %v10158_v1  ;;  %v446_v1 = vld [vmem:[#allocation2 + $0xa98] sm:$0xff] }
 0x1c1   :  { %6838 = vmatprep.subr.bf16.mxu1 %v10143_v3  ;;  %v9536_v28 = vcombine.low %v446_v1, %v454_v2 }
 0x1c2   :  { %6798 = vmatpush2.bf16.msra.mxu0 %v9886_v11  ;;  %v9281_v11 = vcombine.high %v190_v62, %v198_v63 }
 0x1c3   :  { %6799 = vmatprep.subr.bf16.mxu0 %v9871_v13 }
 0x1c4   :  { %6839 = vmatpush2.bf16.msra.mxu1 %v10142_v12 }
 0x1c5   :  { %6840 = vmatprep.subr.bf16.mxu1 %v10127_v14  ;;  %v9537_v14 = vcombine.high %v446_v1, %v454_v2  ;;  %v110_v1 = vld [vmem:[#allocation2 + $0x18] sm:$0xff] }
 0x1c6   :  { %6800 = vmatpush2.bf16.msra.mxu0 %v9870_v53  ;;  %v438_v53 = vld [vmem:[#allocation2 + $0xa58] sm:$0xff] }
 0x1c7   :  { %6801 = vmatprep.subr.bf16.mxu0 %v9855_v25  ;;  %v9520_v40 = vcombine.low %v430_v21, %v438_v53  ;;  %v118_v2 = vld [vmem:[#allocation2 + $0x58] sm:$0xff] }
 0x1c8   :  { %6841 = vmatpush2.bf16.msra.mxu1 %v10126_v24  ;;  %v9200_v17 = vcombine.low %v110_v1, %v118_v2 }
 0x1c9   :  { %6842 = vmatprep.subr.bf16.mxu1 %v10111_v26  ;;  %v9280_v26 = vcombine.low %v190_v62, %v198_v63 }
 0x1ca   :  { %6802 = vmatpush2.bf16.msra.mxu0 %v9854_v31  ;;  %v9521_v31 = vcombine.high %v430_v21, %v438_v53 }
 0x1cb   :  { %6803 = vmatprep.subr.bf16.mxu0 %v9839_v34  ;;  %v166_v34 = vld [vmem:[#allocation2 + $0x1d8] sm:$0xff] }
 0x1cc   :  { %6843 = vmatpush2.bf16.msra.mxu1 %v10110_v33  ;;  %v158_v33 = vld [vmem:[#allocation2 + $0x198] sm:$0xff] }
 0x1cd   :  { %6844 = vmatprep.subr.bf16.mxu1 %v10095_v35  ;;  %v414_v35 = vld [vmem:[#allocation2 + $0x998] sm:$0xff]  ;;  %v9249_v41 = vcombine.high %v158_v33, %v166_v34  ;;  %v9248_v48 = vcombine.low %v158_v33, %v166_v34 }
 0x1ce   :  { %6804 = vmatpush2.bf16.msra.mxu0 %v9838_v42  ;;  %v9505_v42 = vcombine.high %v414_v35, %v422_v47  ;;  %v9504_v49 = vcombine.low %v414_v35, %v422_v47  ;;  %v318_v34 = vld [vmem:[#allocation2 + $0x698] sm:$0xff] }
 0x1cf   :  { %6855 = vmatprep.subr.bf16.mxu0 %v9313_v45  ;;  %v150_v45 = vld [vmem:[#allocation2 + $0x158] sm:$0xff] }
 0x1d0   :  { %6845 = vmatpush2.bf16.msra.mxu1 %v10094_v44  ;;  %v142_v44 = vld [vmem:[#allocation2 + $0x118] sm:$0xff] }
 0x1d1   :  { %6896 = vmatprep.subr.bf16.mxu1 %v9569_v46  ;;  %v6561_v0 = vpop.f32.mrf.mxu0  ;;  %6806 = vmatmul.mubr.bf16.vlgmr.msra.gmra.mxu0 %v10972_v38  ;;  %v398_v46 = vld [vmem:[#allocation2 + $0x918] sm:$0xff]  ;;  %v9233_v50 = vcombine.high %v142_v44, %v150_v45 }
 0x1d2   :  { %v6562_v3 = vadd.f32 %v6561_v0, %v1146_v51  ;;  %6856 = vmatpush1.bf16.msra.mxu0 %v9312_v52  ;;  %6887 = vmatprep.mubr.bf16.mxu0 %v10932_v58  ;;  %v9489_v51 = vcombine.high %v398_v46, %v406_v22  ;;  %v126_v52 = vld [vmem:[#allocation2 + $0x98] sm:$0xff]  ;;  %v9488_v62 = vcombine.low %v398_v46, %v406_v22 }
 0x1d3   :  { %v6602_v4 = vpop.f32.mrf.mxu1  ;;  %6847 = vmatmul.mubr.bf16.vlgmr.msra.gmra.mxu1 %v10976_v39  ;;  %v6563_v8 = vpop.f32.mrf.mxu0  ;;  %6857 = vmatprep.subr.bf16.mxu0 %v9297_v56  ;;  %v382_v56 = vld [vmem:[#allocation2 + $0x898] sm:$0xff] }
 0x1d4   :  { %6897 = vmatpush1.bf16.msra.mxu1 %v9568_v55  ;;  %v11026_v7 = vadd.f32 %v6602_v4, %v6562_v3  ;;  %v6564_v12 = vadd.f32 %v6563_v8, %v1150_v57  ;;  %6928 = vmatprep.mubr.bf16.mxu1 %v10936_v59  ;;  %v134_v55 = vld [vmem:[#allocation2 + $0xd8] sm:$0xff] }
 0x1d5   :  { %v6604_v13 = vpop.f32.mrf.mxu1  ;;  %6898 = vmatprep.subr.bf16.mxu1 %v9553_v61  ;;  %v6565_v18 = vpop.f32.mrf.mxu0  ;;  %v390_v57 = vld [vmem:[#allocation2 + $0x8d8] sm:$0xff]  ;;  %v9232_v61 = vcombine.low %v142_v44, %v150_v45  ;;  %v9217_v63 = vcombine.high %v126_v52, %v134_v55 }
 0x1d6   :  { %v11030_v24 = vadd.f32 %v6604_v13, %v6564_v12  ;;  %6858 = vmatpush1.bf16.msra.mxu0 %v9296_v6  ;;  %v9473_v0 = vcombine.high %v382_v56, %v390_v57  ;;  %v366_v3 = vld [vmem:[#allocation2 + $0x818] sm:$0xff]  ;;  %v9216_v6 = vcombine.low %v126_v52, %v134_v55  ;;  %v9472_v8 = vcombine.low %v382_v56, %v390_v57 }
 0x1d7   :  { %v6606_v25 = vpop.f32.mrf.mxu1  ;;  %v6566_v27 = vpop.f32.mrf.mxu0  ;;  %6859 = vmatprep.subr.bf16.mxu0 %v9281_v11  ;;  %v374_v4 = vld [vmem:[#allocation2 + $0x858] sm:$0xff] }
 0x1d8   :  { %6899 = vmatpush1.bf16.msra.mxu1 %v9552_v9  ;;  %v9201_v9 = vcombine.high %v110_v1, %v118_v2  ;;  %v9457_v11 = vcombine.high %v366_v3, %v374_v4  ;;  %v350_v12 = vld [vmem:[#allocation2 + $0x798] sm:$0xff]  ;;  %v9456_v18 = vcombine.low %v366_v3, %v374_v4 }
 0x1d9   :  { %v6607_v30 = vpop.f32.mrf.mxu1  ;;  %6900 = vmatprep.subr.bf16.mxu1 %v9537_v14  ;;  %v358_v13 = vld [vmem:[#allocation2 + $0x7d8] sm:$0xff] }
 0x1da   :  { %6860 = vmatpush1.bf16.msra.mxu0 %v9280_v26  ;;  %v606_v14 = vld [vmem:[#allocation2 + $0xf98] sm:$0xff]  ;;  %v9441_v21 = vcombine.high %v350_v12, %v358_v13 }
 0x1db   :  { %6861 = vmatprep.subr.bf16.mxu0 %v9265_v36  ;;  %v9697_v53 = vcombine.high %v606_v14, %v614_v15  ;;  %v334_v25 = vld [vmem:[#allocation2 + $0x718] sm:$0xff]  ;;  %v9440_v36 = vcombine.low %v350_v12, %v358_v13  ;;  %v9696_v30 = vcombine.low %v606_v14, %v614_v15 }
 0x1dc   :  { %6901 = vmatpush1.bf16.msra.mxu1 %v9536_v28  ;;  %v342_v26 = vld [vmem:[#allocation2 + $0x758] sm:$0xff] }
 0x1dd   :  { %6902 = vmatprep.subr.bf16.mxu1 %v9521_v31  ;;  %v590_v27 = vld [vmem:[#allocation2 + $0xf18] sm:$0xff]  ;;  %v9425_v31 = vcombine.high %v334_v25, %v342_v26 }
 0x1de   :  { %6862 = vmatpush1.bf16.msra.mxu0 %v9264_v37  ;;  %v598_v28 = vld [vmem:[#allocation2 + $0xf58] sm:$0xff] }
 0x1df   :  { %6863 = vmatprep.subr.bf16.mxu0 %v9249_v41  ;;  %v9681_v33 = vcombine.high %v590_v27, %v598_v28  ;;  %v326_v35 = vld [vmem:[#allocation2 + $0x6d8] sm:$0xff]  ;;  %v9680_v41 = vcombine.low %v590_v27, %v598_v28 }
 0x1e0   :  { %6903 = vmatpush1.bf16.msra.mxu1 %v9520_v40  ;;  %v574_v47 = vld [vmem:[#allocation2 + $0xe98] sm:$0xff]  ;;  %v9424_v40 = vcombine.low %v334_v25, %v342_v26 }
 0x1e1   :  { %6904 = vmatprep.subr.bf16.mxu1 %v9505_v42  ;;  %v582_v37 = vld [vmem:[#allocation2 + $0xed8] sm:$0xff]  ;;  %v9409_v42 = vcombine.high %v318_v34, %v326_v35 }
 0x1e2   :  { %6864 = vmatpush1.bf16.msra.mxu0 %v9248_v48  ;;  %v9665_v44 = vcombine.high %v574_v47, %v582_v37  ;;  %v302_v45 = vld [vmem:[#allocation2 + $0x618] sm:$0xff] }
 0x1e3   :  { %6865 = vmatprep.subr.bf16.mxu0 %v9233_v50  ;;  %v310_v46 = vld [vmem:[#allocation2 + $0x658] sm:$0xff]  ;;  %v9664_v50 = vcombine.low %v574_v47, %v582_v37 }
 0x1e4   :  { %6905 = vmatpush1.bf16.msra.mxu1 %v9504_v49  ;;  %v558_v22 = vld [vmem:[#allocation2 + $0xe18] sm:$0xff]  ;;  %v9408_v49 = vcombine.low %v318_v34, %v326_v35 }
 0x1e5   :  { %6906 = vmatprep.subr.bf16.mxu1 %v9489_v51  ;;  %v566_v48 = vld [vmem:[#allocation2 + $0xe58] sm:$0xff]  ;;  %v9393_v51 = vcombine.high %v302_v45, %v310_v46 }
 0x1e6   :  { %6866 = vmatpush1.bf16.msra.mxu0 %v9232_v61  ;;  %v9649_v52 = vcombine.high %v558_v22, %v566_v48  ;;  %v286_v55 = vld [vmem:[#allocation2 + $0x598] sm:$0xff] }
 0x1e7   :  { %6867 = vmatprep.subr.bf16.mxu0 %v9217_v63  ;;  %v294_v56 = vld [vmem:[#allocation2 + $0x5d8] sm:$0xff]  ;;  %v9648_v63 = vcombine.low %v558_v22, %v566_v48 }
 0x1e8   :  { %6907 = vmatpush1.bf16.msra.mxu1 %v9488_v62  ;;  %v542_v57 = vld [vmem:[#allocation2 + $0xd98] sm:$0xff]  ;;  %v9392_v62 = vcombine.low %v302_v45, %v310_v46 }
 0x1e9   :  { %6908 = vmatprep.subr.bf16.mxu1 %v9473_v0  ;;  %v550_v61 = vld [vmem:[#allocation2 + $0xdd8] sm:$0xff]  ;;  %v9377_v0 = vcombine.high %v286_v55, %v294_v56 }
 0x1ea   :  { %6868 = vmatpush1.bf16.msra.mxu0 %v9216_v6  ;;  %v9633_v1 = vcombine.high %v542_v57, %v550_v61  ;;  %v270_v2 = vld [vmem:[#allocation2 + $0x518] sm:$0xff] }
 0x1eb   :  { %6869 = vmatprep.subr.bf16.mxu0 %v9201_v9  ;;  %v278_v3 = vld [vmem:[#allocation2 + $0x558] sm:$0xff]  ;;  %v9632_v9 = vcombine.low %v542_v57, %v550_v61 }
 0x1ec   :  { %6909 = vmatpush1.bf16.msra.mxu1 %v9472_v8  ;;  %v526_v4 = vld [vmem:[#allocation2 + $0xd18] sm:$0xff]  ;;  %v9376_v8 = vcombine.low %v286_v55, %v294_v56 }
 0x1ed   :  { %6910 = vmatprep.subr.bf16.mxu1 %v9457_v11  ;;  %v534_v6 = vld [vmem:[#allocation2 + $0xd58] sm:$0xff]  ;;  %v9361_v11 = vcombine.high %v270_v2, %v278_v3 }
 0x1ee   :  { %6870 = vmatpush1.bf16.msra.mxu0 %v9200_v17  ;;  %v9617_v12 = vcombine.high %v526_v4, %v534_v6  ;;  %v254_v13 = vld [vmem:[#allocation2 + $0x498] sm:$0xff] }
 0x1ef   :  { %6871 = vmatprep.subr.bf16.mxu0 %v9441_v21  ;;  %v262_v14 = vld [vmem:[#allocation2 + $0x4d8] sm:$0xff]  ;;  %v9616_v21 = vcombine.low %v526_v4, %v534_v6 }
 0x1f0   :  { %6911 = vmatpush1.bf16.msra.mxu1 %v9456_v18  ;;  %v510_v15 = vld [vmem:[#allocation2 + $0xc98] sm:$0xff]  ;;  %v9360_v18 = vcombine.low %v270_v2, %v278_v3 }
 0x1f1   :  { %6912 = vmatprep.subr.bf16.mxu1 %v9697_v53  ;;  %v518_v17 = vld [vmem:[#allocation2 + $0xcd8] sm:$0xff]  ;;  %v9345_v53 = vcombine.high %v254_v13, %v262_v14 }
 0x1f2   :  { %6872 = vmatpush2.bf16.msra.mxu0 %v9440_v36  ;;  %v9601_v25 = vcombine.high %v510_v15, %v518_v17  ;;  %v238_v26 = vld [vmem:[#allocation2 + $0x418] sm:$0xff] }
 0x1f3   :  { %6873 = vmatprep.subr.bf16.mxu0 %v9425_v31  ;;  %v246_v27 = vld [vmem:[#allocation2 + $0x458] sm:$0xff]  ;;  %v9600_v31 = vcombine.low %v510_v15, %v518_v17 }
 0x1f4   :  { %6913 = vmatpush2.bf16.msra.mxu1 %v9696_v30  ;;  %v494_v28 = vld [vmem:[#allocation2 + $0xc18] sm:$0xff]  ;;  %v9344_v30 = vcombine.low %v254_v13, %v262_v14 }
 0x1f5   :  { %6914 = vmatprep.subr.bf16.mxu1 %v9681_v33  ;;  %v502_v36 = vld [vmem:[#allocation2 + $0xc58] sm:$0xff]  ;;  %v9329_v33 = vcombine.high %v238_v26, %v246_v27 }
 0x1f6   :  { %6874 = vmatpush2.bf16.msra.mxu0 %v9424_v40  ;;  %v9585_v34 = vcombine.high %v494_v28, %v502_v36  ;;  %v734_v35 = vld [vmem:[#allocation2 + $0x1398] sm:$0xff] }
 0x1f7   :  { %6875 = vmatprep.subr.bf16.mxu0 %v9409_v42  ;;  %v742_v47 = vld [vmem:[#allocation2 + $0x13d8] sm:$0xff]  ;;  %v9584_v42 = vcombine.low %v494_v28, %v502_v36 }
 0x1f8   :  { %6915 = vmatpush2.bf16.msra.mxu1 %v9680_v41  ;;  %v990_v37 = vld [vmem:[#allocation2 + $0x1b98] sm:$0xff]  ;;  %v9328_v41 = vcombine.low %v238_v26, %v246_v27 }
 0x1f9   :  { %6916 = vmatprep.subr.bf16.mxu1 %v9665_v44  ;;  %v998_v40 = vld [vmem:[#allocation2 + $0x1bd8] sm:$0xff]  ;;  %v9825_v44 = vcombine.high %v734_v35, %v742_v47 }
 0x1fa   :  { %6876 = vmatpush2.bf16.msra.mxu0 %v9408_v49  ;;  %v10081_v45 = vcombine.high %v990_v37, %v998_v40  ;;  %v718_v46 = vld [vmem:[#allocation2 + $0x1318] sm:$0xff] }
 0x1fb   :  { %6877 = vmatprep.subr.bf16.mxu0 %v9393_v51  ;;  %v726_v22 = vld [vmem:[#allocation2 + $0x1358] sm:$0xff]  ;;  %v10080_v51 = vcombine.low %v990_v37, %v998_v40 }
 0x1fc   :  { %6917 = vmatpush2.bf16.msra.mxu1 %v9664_v50  ;;  %v974_v48 = vld [vmem:[#allocation2 + $0x1b18] sm:$0xff]  ;;  %v9824_v50 = vcombine.low %v734_v35, %v742_v47  ;;  %v9808_v2 = vcombine.low %v718_v46, %v726_v22 }
 0x1fd   :  { %6918 = vmatprep.subr.bf16.mxu1 %v9649_v52  ;;  %v982_v49 = vld [vmem:[#allocation2 + $0x1b58] sm:$0xff]  ;;  %v9809_v52 = vcombine.high %v718_v46, %v726_v22 }
 0x1fe   :  { %6878 = vmatpush2.bf16.msra.mxu0 %v9392_v62  ;;  %v10065_v55 = vcombine.high %v974_v48, %v982_v49  ;;  %v702_v56 = vld [vmem:[#allocation2 + $0x1298] sm:$0xff]  ;;  %v10064_v4 = vcombine.low %v974_v48, %v982_v49 }
 0x1ff   :  { %6879 = vmatprep.subr.bf16.mxu0 %v9377_v0  ;;  %v710_v57 = vld [vmem:[#allocation2 + $0x12d8] sm:$0xff] }
 0x200   :  { %6919 = vmatpush2.bf16.msra.mxu1 %v9648_v63  ;;  %v958_v62 = vld [vmem:[#allocation2 + $0x1a98] sm:$0xff]  ;;  %v9793_v6 = vcombine.high %v702_v56, %v710_v57 }
 0x201   :  { %6920 = vmatprep.subr.bf16.mxu1 %v9633_v1  ;;  %v966_v63 = vld [vmem:[#allocation2 + $0x1ad8] sm:$0xff] }
 0x202   :  { %6880 = vmatpush2.bf16.msra.mxu0 %v9376_v8  ;;  %v686_v13 = vld [vmem:[#allocation2 + $0x1218] sm:$0xff] }
 0x203   :  { %6881 = vmatprep.subr.bf16.mxu0 %v9361_v11  ;;  %v694_v14 = vld [vmem:[#allocation2 + $0x1258] sm:$0xff] }
 0x204   :  { %6921 = vmatpush2.bf16.msra.mxu1 %v9632_v9  ;;  %v942_v15 = vld [vmem:[#allocation2 + $0x1a18] sm:$0xff]  ;;  %v9777_v26 = vcombine.high %v686_v13, %v694_v14 }
 0x205   :  { %6922 = vmatprep.subr.bf16.mxu1 %v9617_v12  ;;  %v10049_v12 = vcombine.high %v958_v62, %v966_v63  ;;  %v950_v17 = vld [vmem:[#allocation2 + $0x1a58] sm:$0xff] }
 0x206   :  { %6882 = vmatpush2.bf16.msra.mxu0 %v9360_v18  ;;  %v10033_v28 = vcombine.high %v942_v15, %v950_v17  ;;  %v670_v36 = vld [vmem:[#allocation2 + $0x1198] sm:$0xff]  ;;  %v10032_v35 = vcombine.low %v942_v15, %v950_v17 }
 0x207   :  { %6883 = vmatprep.subr.bf16.mxu0 %v9345_v53  ;;  %v9792_v53 = vcombine.low %v702_v56, %v710_v57  ;;  %v654_v40 = vld [vmem:[#allocation2 + $0x1118] sm:$0xff] }
 0x208   :  { %6923 = vmatpush2.bf16.msra.mxu1 %v9616_v21  ;;  %v638_v49 = vld [vmem:[#allocation2 + $0x1098] sm:$0xff] }
 0x209   :  { %6924 = vmatprep.subr.bf16.mxu1 %v9601_v25 }
 0x20a   :  { %6884 = vmatpush2.bf16.msra.mxu0 %v9344_v30  ;;  %v678_v30 = vld [vmem:[#allocation2 + $0x11d8] sm:$0xff] }
 0x20b   :  { %6885 = vmatprep.subr.bf16.mxu0 %v9329_v33  ;;  %v934_v33 = vld [vmem:[#allocation2 + $0x19d8] sm:$0xff]  ;;  %v9761_v47 = vcombine.high %v670_v36, %v678_v30 }
 0x20c   :  { %6925 = vmatpush2.bf16.msra.mxu1 %v9600_v31  ;;  %v926_v31 = vld [vmem:[#allocation2 + $0x1998] sm:$0xff] }
 0x20d   :  { %6926 = vmatprep.subr.bf16.mxu1 %v9585_v34  ;;  %v9776_v34 = vcombine.low %v686_v13, %v694_v14  ;;  %v10017_v37 = vcombine.high %v926_v31, %v934_v33  ;;  %v10016_v46 = vcombine.low %v926_v31, %v934_v33  ;;  %v1126_v13 = vld [vmem:[#allocation2 + $0x1fd8] sm:$0xff] }
 0x20e   :  { %6886 = vmatpush2.bf16.msra.mxu0 %v9328_v41  ;;  %v662_v41 = vld [vmem:[#allocation2 + $0x1158] sm:$0xff] }
 0x20f   :  { %6937 = vmatprep.subr.bf16.mxu0 %v9825_v44  ;;  %v918_v44 = vld [vmem:[#allocation2 + $0x1958] sm:$0xff]  ;;  %v9745_v22 = vcombine.high %v654_v40, %v662_v41 }
 0x210   :  { %6927 = vmatpush2.bf16.msra.mxu1 %v9584_v42  ;;  %v910_v42 = vld [vmem:[#allocation2 + $0x1918] sm:$0xff] }
 0x211   :  { %6978 = vmatprep.subr.bf16.mxu1 %v10081_v45  ;;  %v6643_v61 = vpop.f32.mrf.mxu0  ;;  %6888 = vmatmul.mubr.bf16.vlgmr.msra.gmra.mxu0 %v10942_v16  ;;  %v9760_v45 = vcombine.low %v670_v36, %v678_v30  ;;  %v10001_v48 = vcombine.high %v910_v42, %v918_v44  ;;  %v10000_v56 = vcombine.low %v910_v42, %v918_v44  ;;  %v830_v30 = vld [vmem:[#allocation2 + $0x1698] sm:$0xff] }
 0x212   :  { %v6644_v0 = vadd.f32 %v6643_v61, %v11026_v7  ;;  %6938 = vmatpush1.bf16.msra.mxu0 %v9824_v50  ;;  %6969 = vmatprep.mubr.bf16.mxu0 %v10960_v54  ;;  %v646_v50 = vld [vmem:[#allocation2 + $0x10d8] sm:$0xff] }
 0x213   :  { %v6684_v1 = vpop.f32.mrf.mxu1  ;;  %6929 = vmatmul.mubr.bf16.vlgmr.msra.gmra.mxu1 %v10951_v20  ;;  %v6645_v3 = vpop.f32.mrf.mxu0  ;;  %6939 = vmatprep.subr.bf16.mxu0 %v9809_v52  ;;  %v902_v52 = vld [vmem:[#allocation2 + $0x18d8] sm:$0xff]  ;;  %v9729_v57 = vcombine.high %v638_v49, %v646_v50 }
 0x214   :  { %6979 = vmatpush1.bf16.msra.mxu1 %v10080_v51  ;;  %v11035_v8 = vadd.f32 %v6684_v1, %v6644_v0  ;;  %v6646_v9 = vadd.f32 %v6645_v3, %v11030_v24  ;;  %7010 = vmatprep.mubr.bf16.mxu1 %v10965_v29  ;;  %v10048_v24 = vcombine.low %v958_v62, %v966_v63  ;;  %v894_v51 = vld [vmem:[#allocation2 + $0x1898] sm:$0xff] }
 0x215   :  { %v6686_v11 = vpop.f32.mrf.mxu1  ;;  %6980 = vmatprep.subr.bf16.mxu1 %v10065_v55  ;;  %v6647_v7 = vpop.f32.mrf.mxu0  ;;  %v9744_v55 = vcombine.low %v654_v40, %v662_v41  ;;  %v9985_v61 = vcombine.high %v894_v51, %v902_v52  ;;  %v622_v62 = vld [vmem:[#allocation2 + $0x1018] sm:$0xff]  ;;  %v9984_v3 = vcombine.low %v894_v51, %v902_v52 }
 0x216   :  { %v11040_v18 = vadd.f32 %v6686_v11, %v6646_v9  ;;  %6940 = vmatpush1.bf16.msra.mxu0 %v9808_v2  ;;  %v630_v63 = vld [vmem:[#allocation2 + $0x1058] sm:$0xff]  ;;  %v9728_v2 = vcombine.low %v638_v49, %v646_v50 }
 0x217   :  { %v6688_v21 = vpop.f32.mrf.mxu1  ;;  %v6648_v25 = vpop.f32.mrf.mxu0  ;;  %6941 = vmatprep.subr.bf16.mxu0 %v9793_v6  ;;  %v878_v0 = vld [vmem:[#allocation2 + $0x1818] sm:$0xff]  ;;  %v9712_v14 = vcombine.low %v622_v62, %v630_v63 }
 0x218   :  { %6981 = vmatpush1.bf16.msra.mxu1 %v10064_v4  ;;  %v886_v1 = vld [vmem:[#allocation2 + $0x1858] sm:$0xff]  ;;  %v9713_v4 = vcombine.high %v622_v62, %v630_v63 }
 0x219   :  { %v6689_v27 = vpop.f32.mrf.mxu1  ;;  %6982 = vmatprep.subr.bf16.mxu1 %v10049_v12  ;;  %v9969_v6 = vcombine.high %v878_v0, %v886_v1  ;;  %v862_v9 = vld [vmem:[#allocation2 + $0x1798] sm:$0xff]  ;;  %v9968_v7 = vcombine.low %v878_v0, %v886_v1 }
 0x21a   :  { %6942 = vmatpush1.bf16.msra.mxu0 %v9792_v53  ;;  %v870_v11 = vld [vmem:[#allocation2 + $0x17d8] sm:$0xff] }
 0x21b   :  { %6943 = vmatprep.subr.bf16.mxu0 %v9777_v26  ;;  %v1118_v12 = vld [vmem:[#allocation2 + $0x1f98] sm:$0xff]  ;;  %v9953_v15 = vcombine.high %v862_v9, %v870_v11  ;;  %v9952_v26 = vcombine.low %v862_v9, %v870_v11 }
 0x21c   :  { %6983 = vmatpush1.bf16.msra.mxu1 %v10048_v24  ;;  %v10209_v17 = vcombine.high %v1118_v12, %v1126_v13  ;;  %v846_v21 = vld [vmem:[#allocation2 + $0x1718] sm:$0xff]  ;;  %v10208_v27 = vcombine.low %v1118_v12, %v1126_v13 }
 0x21d   :  { %6984 = vmatprep.subr.bf16.mxu1 %v10033_v28  ;;  %v854_v53 = vld [vmem:[#allocation2 + $0x1758] sm:$0xff] }
 0x21e   :  { %6944 = vmatpush1.bf16.msra.mxu0 %v9776_v34  ;;  %v1102_v25 = vld [vmem:[#allocation2 + $0x1f18] sm:$0xff]  ;;  %v9937_v28 = vcombine.high %v846_v21, %v854_v53 }
 0x21f   :  { %6945 = vmatprep.subr.bf16.mxu0 %v9761_v47  ;;  %v1110_v24 = vld [vmem:[#allocation2 + $0x1f58] sm:$0xff] }
 0x220   :  { %6985 = vmatpush1.bf16.msra.mxu1 %v10032_v35  ;;  %v10193_v36 = vcombine.high %v1102_v25, %v1110_v24  ;;  %v838_v31 = vld [vmem:[#allocation2 + $0x16d8] sm:$0xff]  ;;  %v9936_v35 = vcombine.low %v846_v21, %v854_v53  ;;  %v10192_v47 = vcombine.low %v1102_v25, %v1110_v24 }
 0x221   :  { %6986 = vmatprep.subr.bf16.mxu1 %v10017_v37  ;;  %v1086_v33 = vld [vmem:[#allocation2 + $0x1e98] sm:$0xff]  ;;  %v9921_v37 = vcombine.high %v830_v30, %v838_v31 }
 0x222   :  { %6946 = vmatpush1.bf16.msra.mxu0 %v9760_v45  ;;  %v1094_v34 = vld [vmem:[#allocation2 + $0x1ed8] sm:$0xff] }
 0x223   :  { %6947 = vmatprep.subr.bf16.mxu0 %v9745_v22  ;;  %v10177_v40 = vcombine.high %v1086_v33, %v1094_v34  ;;  %v814_v41 = vld [vmem:[#allocation2 + $0x1618] sm:$0xff]  ;;  %v10176_v22 = vcombine.low %v1086_v33, %v1094_v34  ;;  %v231_v33 = vld [vmem:[#allocation2 + $0x3e0] sm:$0xff] }
 0x224   :  { %6987 = vmatpush1.bf16.msra.mxu1 %v10016_v46  ;;  %v822_v42 = vld [vmem:[#allocation2 + $0x1658] sm:$0xff]  ;;  %v9920_v46 = vcombine.low %v830_v30, %v838_v31  ;;  %v223_v31 = vld [vmem:[#allocation2 + $0x3a0] sm:$0xff] }
 0x225   :  { %6988 = vmatprep.subr.bf16.mxu1 %v10001_v48  ;;  %v1070_v44 = vld [vmem:[#allocation2 + $0x1e18] sm:$0xff]  ;;  %v9905_v48 = vcombine.high %v814_v41, %v822_v42  ;;  %v479_v34 = vld [vmem:[#allocation2 + $0xba0] sm:$0xff] }
 0x226   :  { %6948 = vmatpush1.bf16.msra.mxu0 %v9744_v55  ;;  %v1078_v45 = vld [vmem:[#allocation2 + $0x1e58] sm:$0xff] }
 0x227   :  { %6949 = vmatprep.subr.bf16.mxu0 %v9729_v57  ;;  %v10161_v49 = vcombine.high %v1070_v44, %v1078_v45  ;;  %v798_v50 = vld [vmem:[#allocation2 + $0x1598] sm:$0xff]  ;;  %v10160_v57 = vcombine.low %v1070_v44, %v1078_v45  ;;  %v1157_v44 = vsub.s32 5, %v10986_v60  ;;  %v207_v45 = vld [vmem:[#allocation2 + $0x320] sm:$0xff] }
 0x228   :  { %6989 = vmatpush1.bf16.msra.mxu1 %v10000_v56  ;;  %v806_v51 = vld [vmem:[#allocation2 + $0x15d8] sm:$0xff]  ;;  %v9904_v56 = vcombine.low %v814_v41, %v822_v42  ;;  %v9315_v41 = vcombine.high %v223_v31, %v231_v33 }
 0x229   :  { %6990 = vmatprep.subr.bf16.mxu1 %v9985_v61  ;;  %v1054_v52 = vld [vmem:[#allocation2 + $0x1d98] sm:$0xff]  ;;  %v9889_v61 = vcombine.high %v798_v50, %v806_v51 }
 0x22a   :  { %6950 = vmatpush1.bf16.msra.mxu0 %v9728_v2  ;;  %v1062_v55 = vld [vmem:[#allocation2 + $0x1dd8] sm:$0xff] }
 0x22b   :  { %6951 = vmatprep.subr.bf16.mxu0 %v9713_v4  ;;  %v10145_v62 = vcombine.high %v1054_v52, %v1062_v55  ;;  %v782_v63 = vld [vmem:[#allocation2 + $0x1518] sm:$0xff]  ;;  %v10144_v4 = vcombine.low %v1054_v52, %v1062_v55 }
 0x22c   :  { %6991 = vmatpush1.bf16.msra.mxu1 %v9984_v3  ;;  %v790_v0 = vld [vmem:[#allocation2 + $0x1558] sm:$0xff]  ;;  %v9888_v3 = vcombine.low %v798_v50, %v806_v51  ;;  %v9314_v51 = vcombine.low %v223_v31, %v231_v33 }
 0x22d   :  { %6992 = vmatprep.subr.bf16.mxu1 %v9969_v6  ;;  %v1038_v1 = vld [vmem:[#allocation2 + $0x1d18] sm:$0xff]  ;;  %v9873_v6 = vcombine.high %v782_v63, %v790_v0 }
 0x22e   :  { %6952 = vmatpush1.bf16.msra.mxu0 %v9712_v14  ;;  %v1046_v2 = vld [vmem:[#allocation2 + $0x1d58] sm:$0xff] }
 0x22f   :  { %6953 = vmatprep.subr.bf16.mxu0 %v9953_v15  ;;  %v10129_v9 = vcombine.high %v1038_v1, %v1046_v2  ;;  %v766_v11 = vld [vmem:[#allocation2 + $0x1498] sm:$0xff]  ;;  %v10128_v15 = vcombine.low %v1038_v1, %v1046_v2  ;;  %v455_v1 = vld [vmem:[#allocation2 + $0xae0] sm:$0xff] }
 0x230   :  { %6993 = vmatpush1.bf16.msra.mxu1 %v9968_v7  ;;  %v774_v12 = vld [vmem:[#allocation2 + $0x14d8] sm:$0xff]  ;;  %v9872_v7 = vcombine.low %v782_v63, %v790_v0  ;;  %v447_v0 = vld [vmem:[#allocation2 + $0xaa0] sm:$0xff] }
 0x231   :  { %6994 = vmatprep.subr.bf16.mxu1 %v10209_v17  ;;  %v1022_v13 = vld [vmem:[#allocation2 + $0x1c98] sm:$0xff]  ;;  %v9857_v17 = vcombine.high %v766_v11, %v774_v12 }
 0x232   :  { %6954 = vmatpush2.bf16.msra.mxu0 %v9952_v26  ;;  %v1030_v14 = vld [vmem:[#allocation2 + $0x1cd8] sm:$0xff] }
 0x233   :  { %6955 = vmatprep.subr.bf16.mxu0 %v9937_v28  ;;  %v10113_v21 = vcombine.high %v1022_v13, %v1030_v14  ;;  %v750_v53 = vld [vmem:[#allocation2 + $0x1418] sm:$0xff]  ;;  %v10112_v28 = vcombine.low %v1022_v13, %v1030_v14 }
 0x234   :  { %6995 = vmatpush2.bf16.msra.mxu1 %v10208_v27  ;;  %v758_v25 = vld [vmem:[#allocation2 + $0x1458] sm:$0xff]  ;;  %v9856_v27 = vcombine.low %v766_v11, %v774_v12 }
 0x235   :  { %6996 = vmatprep.subr.bf16.mxu1 %v10193_v36  ;;  %v1006_v24 = vld [vmem:[#allocation2 + $0x1c18] sm:$0xff]  ;;  %v9841_v36 = vcombine.high %v750_v53, %v758_v25 }
 0x236   :  { %6956 = vmatpush2.bf16.msra.mxu0 %v9936_v35  ;;  %v1014_v26 = vld [vmem:[#allocation2 + $0x1c58] sm:$0xff]  ;;  %v487_v35 = vld [vmem:[#allocation2 + $0xbe0] sm:$0xff] }
 0x237   :  { %6957 = vmatprep.subr.bf16.mxu0 %v9921_v37  ;;  %v10097_v30 = vcombine.high %v1006_v24, %v1014_v26  ;;  %v1153_v37 = vsub.s32 4, %v10986_v60  ;;  %v9571_v42 = vcombine.high %v479_v34, %v487_v35  ;;  %v9570_v52 = vcombine.low %v479_v34, %v487_v35  ;;  %v159_v34 = vld [vmem:[#allocation2 + $0x1a0] sm:$0xff] }
 0x238   :  { %6997 = vmatpush2.bf16.msra.mxu1 %v10192_v47  ;;  %v9840_v47 = vcombine.low %v750_v53, %v758_v25  ;;  %v431_v53 = vld [vmem:[#allocation2 + $0xa20] sm:$0xff] }
 0x239   :  { %6998 = vmatprep.subr.bf16.mxu1 %v10177_v40  ;;  %v10096_v40 = vcombine.low %v1006_v24, %v1014_v26  ;;  %v439_v25 = vld [vmem:[#allocation2 + $0xa60] sm:$0xff] }
 0x23a   :  { %6958 = vmatpush2.bf16.msra.mxu0 %v9920_v46  ;;  %v215_v46 = vld [vmem:[#allocation2 + $0x360] sm:$0xff]  ;;  %v9523_v33 = vcombine.high %v431_v53, %v439_v25 }
 0x23b   :  { %6959 = vmatprep.subr.bf16.mxu0 %v9905_v48  ;;  %v471_v48 = vld [vmem:[#allocation2 + $0xb60] sm:$0xff]  ;;  %v9299_v55 = vcombine.high %v207_v45, %v215_v46 }
 0x23c   :  { %6999 = vmatpush2.bf16.msra.mxu1 %v10176_v22  ;;  %v463_v22 = vld [vmem:[#allocation2 + $0xb20] sm:$0xff] }
 0x23d   :  { %7000 = vmatprep.subr.bf16.mxu1 %v10161_v49  ;;  %v11044_v49 = vld [vmem:[#allocation4] sm:$0xff] }
 0x23e   :  { %6960 = vmatpush2.bf16.msra.mxu0 %v9904_v56  ;;  %v1154_v50 = vrot.slane %v11044_v49, %v1153_v37  ;;  %v1158_v56 = vrot.slane %v11044_v49, %v1157_v44  ;;  %v167_v35 = vld [vmem:[#allocation2 + $0x1e0] sm:$0xff] }
 0x23f   :  { %6961 = vmatprep.subr.bf16.mxu0 %v9889_v61  ;;  %v191_v61 = vld [vmem:[#allocation2 + $0x2a0] sm:$0xff] }
 0x240   :  { %7001 = vmatpush2.bf16.msra.mxu1 %v10160_v57  ;;  %v9555_v57 = vcombine.high %v463_v22, %v471_v48 }
 0x241   :  { %7002 = vmatprep.subr.bf16.mxu1 %v10145_v62  ;;  %v199_v62 = vld [vmem:[#allocation2 + $0x2e0] sm:$0xff] }
 0x242   :  { %6962 = vmatpush2.bf16.msra.mxu0 %v9888_v3  ;;  %v9283_v11 = vcombine.high %v191_v61, %v199_v62 }
 0x243   :  { %6963 = vmatprep.subr.bf16.mxu0 %v9873_v6 }
 0x244   :  { %7003 = vmatpush2.bf16.msra.mxu1 %v10144_v4  ;;  %v9298_v4 = vcombine.low %v207_v45, %v215_v46  ;;  %v9251_v45 = vcombine.high %v159_v34, %v167_v35 }
 0x245   :  { %7004 = vmatprep.subr.bf16.mxu1 %v10129_v9  ;;  %v9554_v9 = vcombine.low %v463_v22, %v471_v48  ;;  %v143_v22 = vld [vmem:[#allocation2 + $0x120] sm:$0xff] }
 0x246   :  { %6964 = vmatpush2.bf16.msra.mxu0 %v9872_v7  ;;  %v9539_v7 = vcombine.high %v447_v0, %v455_v1  ;;  %v151_v48 = vld [vmem:[#allocation2 + $0x160] sm:$0xff] }
 0x247   :  { %6965 = vmatprep.subr.bf16.mxu0 %v9857_v17  ;;  %v183_v17 = vld [vmem:[#allocation2 + $0x260] sm:$0xff] }
 0x248   :  { %7005 = vmatpush2.bf16.msra.mxu1 %v10128_v15  ;;  %v175_v15 = vld [vmem:[#allocation2 + $0x220] sm:$0xff] }
 0x249   :  { %7006 = vmatprep.subr.bf16.mxu1 %v10113_v21 }
 0x24a   :  { %6966 = vmatpush2.bf16.msra.mxu0 %v9856_v27  ;;  %v9282_v27 = vcombine.low %v191_v61, %v199_v62  ;;  %v127_v61 = vld [vmem:[#allocation2 + $0xa0] sm:$0xff] }
 0x24b   :  { %6967 = vmatprep.subr.bf16.mxu0 %v9841_v36  ;;  %v9538_v36 = vcombine.low %v447_v0, %v455_v1  ;;  %v135_v62 = vld [vmem:[#allocation2 + $0xe0] sm:$0xff]  ;;  %v9234_v1 = vcombine.low %v143_v22, %v151_v48 }
 0x24c   :  { %7007 = vmatpush2.bf16.msra.mxu1 %v10112_v28  ;;  %v391_v0 = vld [vmem:[#allocation2 + $0x8e0] sm:$0xff] }
 0x24d   :  { %7008 = vmatprep.subr.bf16.mxu1 %v10097_v30  ;;  %v9267_v30 = vcombine.high %v175_v15, %v183_v17 }
 0x24e   :  { %6968 = vmatpush2.bf16.msra.mxu0 %v9840_v47  ;;  %v415_v47 = vld [vmem:[#allocation2 + $0x9a0] sm:$0xff] }
 0x24f   :  { %7019 = vmatprep.subr.bf16.mxu0 %v9315_v41  ;;  %v9266_v41 = vcombine.low %v175_v15, %v183_v17 }
 0x250   :  { %7009 = vmatpush2.bf16.msra.mxu1 %v10096_v40  ;;  %v423_v40 = vld [vmem:[#allocation2 + $0x9e0] sm:$0xff] }
 0x251   :  { %7060 = vmatprep.subr.bf16.mxu1 %v9571_v42  ;;  %v6725_v63 = vpop.f32.mrf.mxu0  ;;  %6970 = vmatmul.mubr.bf16.vlgmr.msra.gmra.mxu0 %v10972_v38  ;;  %v9522_v42 = vcombine.low %v431_v53, %v439_v25  ;;  %v9507_v46 = vcombine.high %v415_v47, %v423_v40  ;;  %v359_v53 = vld [vmem:[#allocation2 + $0x7e0] sm:$0xff] }
 0x252   :  { %v6726_v2 = vadd.f32 %v6725_v63, %v1154_v50  ;;  %7020 = vmatpush1.bf16.msra.mxu0 %v9314_v51  ;;  %7051 = vmatprep.mubr.bf16.mxu0 %v10932_v58  ;;  %v399_v50 = vld [vmem:[#allocation2 + $0x920] sm:$0xff] }
 0x253   :  { %v6766_v3 = vpop.f32.mrf.mxu1  ;;  %7011 = vmatmul.mubr.bf16.vlgmr.msra.gmra.mxu1 %v10976_v39  ;;  %v6727_v6 = vpop.f32.mrf.mxu0  ;;  %7021 = vmatprep.subr.bf16.mxu0 %v9299_v55  ;;  %v407_v51 = vld [vmem:[#allocation2 + $0x960] sm:$0xff]  ;;  %v9506_v55 = vcombine.low %v415_v47, %v423_v40 }
 0x254   :  { %7061 = vmatpush1.bf16.msra.mxu1 %v9570_v52  ;;  %v11054_v12 = vadd.f32 %v6766_v3, %v6726_v2  ;;  %v6728_v13 = vadd.f32 %v6727_v6, %v1158_v56  ;;  %7092 = vmatprep.mubr.bf16.mxu1 %v10936_v59  ;;  %v9250_v52 = vcombine.low %v159_v34, %v167_v35  ;;  %v383_v63 = vld [vmem:[#allocation2 + $0x8a0] sm:$0xff] }
 0x255   :  { %v6768_v14 = vpop.f32.mrf.mxu1  ;;  %7062 = vmatprep.subr.bf16.mxu1 %v9555_v57  ;;  %v6729_v21 = vpop.f32.mrf.mxu0  ;;  %v9235_v56 = vcombine.high %v143_v22, %v151_v48  ;;  %v9491_v57 = vcombine.high %v399_v50, %v407_v51  ;;  %v9490_v2 = vcombine.low %v399_v50, %v407_v51  ;;  %v9219_v3 = vcombine.high %v127_v61, %v135_v62  ;;  %v111_v6 = vld [vmem:[#allocation2 + $0x20] sm:$0xff] }
 0x256   :  { %v11058_v24 = vadd.f32 %v6768_v14, %v6728_v13  ;;  %7022 = vmatpush1.bf16.msra.mxu0 %v9298_v4  ;;  %v9475_v4 = vcombine.high %v383_v63, %v391_v0  ;;  %v375_v13 = vld [vmem:[#allocation2 + $0x860] sm:$0xff]  ;;  %v9218_v14 = vcombine.low %v127_v61, %v135_v62 }
 0x257   :  { %v6770_v26 = vpop.f32.mrf.mxu1  ;;  %v6730_v28 = vpop.f32.mrf.mxu0  ;;  %7023 = vmatprep.subr.bf16.mxu0 %v9283_v11  ;;  %v367_v11 = vld [vmem:[#allocation2 + $0x820] sm:$0xff] }
 0x258   :  { %7063 = vmatpush1.bf16.msra.mxu1 %v9554_v9  ;;  %v119_v9 = vld [vmem:[#allocation2 + $0x60] sm:$0xff]  ;;  %v9459_v17 = vcombine.high %v367_v11, %v375_v13  ;;  %v9458_v28 = vcombine.low %v367_v11, %v375_v13 }
 0x259   :  { %v6771_v31 = vpop.f32.mrf.mxu1  ;;  %7064 = vmatprep.subr.bf16.mxu1 %v9539_v7  ;;  %v9474_v7 = vcombine.low %v383_v63, %v391_v0  ;;  %v9203_v15 = vcombine.high %v111_v6, %v119_v9  ;;  %v351_v21 = vld [vmem:[#allocation2 + $0x7a0] sm:$0xff] }
 0x25a   :  { %7024 = vmatpush1.bf16.msra.mxu0 %v9282_v27  ;;  %v607_v25 = vld [vmem:[#allocation2 + $0xfa0] sm:$0xff]  ;;  %v9202_v27 = vcombine.low %v111_v6, %v119_v9  ;;  %v9442_v47 = vcombine.low %v351_v21, %v359_v53 }
 0x25b   :  { %7025 = vmatprep.subr.bf16.mxu0 %v9267_v30  ;;  %v615_v26 = vld [vmem:[#allocation2 + $0xfe0] sm:$0xff] }
 0x25c   :  { %7065 = vmatpush1.bf16.msra.mxu1 %v9538_v36  ;;  %v9443_v36 = vcombine.high %v351_v21, %v359_v53  ;;  %v9699_v30 = vcombine.high %v607_v25, %v615_v26  ;;  %v335_v31 = vld [vmem:[#allocation2 + $0x720] sm:$0xff]  ;;  %v9698_v40 = vcombine.low %v607_v25, %v615_v26 }
 0x25d   :  { %7066 = vmatprep.subr.bf16.mxu1 %v9523_v33  ;;  %v343_v33 = vld [vmem:[#allocation2 + $0x760] sm:$0xff] }
 0x25e   :  { %7026 = vmatpush1.bf16.msra.mxu0 %v9266_v41  ;;  %v591_v34 = vld [vmem:[#allocation2 + $0xf20] sm:$0xff]  ;;  %v9427_v41 = vcombine.high %v335_v31, %v343_v33  ;;  %v9426_v50 = vcombine.low %v335_v31, %v343_v33 }
 0x25f   :  { %7027 = vmatprep.subr.bf16.mxu0 %v9251_v45  ;;  %v599_v35 = vld [vmem:[#allocation2 + $0xf60] sm:$0xff] }
 0x260   :  { %7067 = vmatpush1.bf16.msra.mxu1 %v9522_v42  ;;  %v9683_v42 = vcombine.high %v591_v34, %v599_v35  ;;  %v319_v45 = vld [vmem:[#allocation2 + $0x6a0] sm:$0xff]  ;;  %v9682_v51 = vcombine.low %v591_v34, %v599_v35 }
 0x261   :  { %7068 = vmatprep.subr.bf16.mxu1 %v9507_v46  ;;  %v327_v46 = vld [vmem:[#allocation2 + $0x6e0] sm:$0xff] }
 0x262   :  { %7028 = vmatpush1.bf16.msra.mxu0 %v9250_v52  ;;  %v575_v22 = vld [vmem:[#allocation2 + $0xea0] sm:$0xff]  ;;  %v9411_v52 = vcombine.high %v319_v45, %v327_v46  ;;  %v9410_v63 = vcombine.low %v319_v45, %v327_v46 }
 0x263   :  { %7029 = vmatprep.subr.bf16.mxu0 %v9235_v56  ;;  %v583_v48 = vld [vmem:[#allocation2 + $0xee0] sm:$0xff] }
 0x264   :  { %7069 = vmatpush1.bf16.msra.mxu1 %v9506_v55  ;;  %v9667_v55 = vcombine.high %v575_v22, %v583_v48  ;;  %v303_v56 = vld [vmem:[#allocation2 + $0x620] sm:$0xff]  ;;  %v9666_v0 = vcombine.low %v575_v22, %v583_v48 }
 0x265   :  { %7070 = vmatprep.subr.bf16.mxu1 %v9491_v57  ;;  %v311_v57 = vld [vmem:[#allocation2 + $0x660] sm:$0xff] }
 0x266   :  { %7030 = vmatpush1.bf16.msra.mxu0 %v9234_v1  ;;  %v559_v61 = vld [vmem:[#allocation2 + $0xe20] sm:$0xff]  ;;  %v9395_v1 = vcombine.high %v303_v56, %v311_v57  ;;  %v9394_v11 = vcombine.low %v303_v56, %v311_v57 }
 0x267   :  { %7031 = vmatprep.subr.bf16.mxu0 %v9219_v3  ;;  %v567_v62 = vld [vmem:[#allocation2 + $0xe60] sm:$0xff] }
 0x268   :  { %7071 = vmatpush1.bf16.msra.mxu1 %v9490_v2  ;;  %v9651_v2 = vcombine.high %v559_v61, %v567_v62  ;;  %v287_v3 = vld [vmem:[#allocation2 + $0x5a0] sm:$0xff]  ;;  %v9650_v13 = vcombine.low %v559_v61, %v567_v62 }
 0x269   :  { %7072 = vmatprep.subr.bf16.mxu1 %v9475_v4  ;;  %v295_v4 = vld [vmem:[#allocation2 + $0x5e0] sm:$0xff] }
 0x26a   :  { %7032 = vmatpush1.bf16.msra.mxu0 %v9218_v14  ;;  %v543_v6 = vld [vmem:[#allocation2 + $0xda0] sm:$0xff]  ;;  %v9379_v14 = vcombine.high %v287_v3, %v295_v4  ;;  %v9378_v25 = vcombine.low %v287_v3, %v295_v4 }
 0x26b   :  { %7033 = vmatprep.subr.bf16.mxu0 %v9203_v15  ;;  %v551_v9 = vld [vmem:[#allocation2 + $0xde0] sm:$0xff] }
 0x26c   :  { %7073 = vmatpush1.bf16.msra.mxu1 %v9474_v7  ;;  %v9635_v7 = vcombine.high %v543_v6, %v551_v9  ;;  %v271_v15 = vld [vmem:[#allocation2 + $0x520] sm:$0xff]  ;;  %v9634_v26 = vcombine.low %v543_v6, %v551_v9 }
 0x26d   :  { %7074 = vmatprep.subr.bf16.mxu1 %v9459_v17  ;;  %v279_v17 = vld [vmem:[#allocation2 + $0x560] sm:$0xff] }
 0x26e   :  { %7034 = vmatpush1.bf16.msra.mxu0 %v9202_v27  ;;  %v527_v21 = vld [vmem:[#allocation2 + $0xd20] sm:$0xff]  ;;  %v9363_v27 = vcombine.high %v271_v15, %v279_v17  ;;  %v9362_v34 = vcombine.low %v271_v15, %v279_v17 }
 0x26f   :  { %7035 = vmatprep.subr.bf16.mxu0 %v9443_v36  ;;  %v535_v53 = vld [vmem:[#allocation2 + $0xd60] sm:$0xff] }
 0x270   :  { %7075 = vmatpush1.bf16.msra.mxu1 %v9458_v28  ;;  %v9619_v28 = vcombine.high %v527_v21, %v535_v53  ;;  %v255_v36 = vld [vmem:[#allocation2 + $0x4a0] sm:$0xff]  ;;  %v9618_v35 = vcombine.low %v527_v21, %v535_v53 }
 0x271   :  { %7076 = vmatprep.subr.bf16.mxu1 %v9699_v30  ;;  %v263_v30 = vld [vmem:[#allocation2 + $0x4e0] sm:$0xff] }
 0x272   :  { %7036 = vmatpush2.bf16.msra.mxu0 %v9442_v47  ;;  %v511_v31 = vld [vmem:[#allocation2 + $0xca0] sm:$0xff]  ;;  %v9347_v47 = vcombine.high %v255_v36, %v263_v30  ;;  %v9346_v22 = vcombine.low %v255_v36, %v263_v30 }
 0x273   :  { %7037 = vmatprep.subr.bf16.mxu0 %v9427_v41  ;;  %v519_v33 = vld [vmem:[#allocation2 + $0xce0] sm:$0xff] }
 0x274   :  { %7077 = vmatpush2.bf16.msra.mxu1 %v9698_v40  ;;  %v9603_v40 = vcombine.high %v511_v31, %v519_v33  ;;  %v239_v41 = vld [vmem:[#allocation2 + $0x420] sm:$0xff]  ;;  %v9602_v48 = vcombine.low %v511_v31, %v519_v33 }
 0x275   :  { %7078 = vmatprep.subr.bf16.mxu1 %v9683_v42  ;;  %v247_v42 = vld [vmem:[#allocation2 + $0x460] sm:$0xff] }
 0x276   :  { %7038 = vmatpush2.bf16.msra.mxu0 %v9426_v50  ;;  %v495_v45 = vld [vmem:[#allocation2 + $0xc20] sm:$0xff]  ;;  %v9331_v50 = vcombine.high %v239_v41, %v247_v42  ;;  %v9330_v61 = vcombine.low %v239_v41, %v247_v42 }
 0x277   :  { %7039 = vmatprep.subr.bf16.mxu0 %v9411_v52  ;;  %v503_v46 = vld [vmem:[#allocation2 + $0xc60] sm:$0xff] }
 0x278   :  { %7079 = vmatpush2.bf16.msra.mxu1 %v9682_v51  ;;  %v9587_v51 = vcombine.high %v495_v45, %v503_v46  ;;  %v735_v52 = vld [vmem:[#allocation2 + $0x13a0] sm:$0xff]  ;;  %v9586_v62 = vcombine.low %v495_v45, %v503_v46 }
 0x279   :  { %7080 = vmatprep.subr.bf16.mxu1 %v9667_v55  ;;  %v743_v55 = vld [vmem:[#allocation2 + $0x13e0] sm:$0xff] }
 0x27a   :  { %7040 = vmatpush2.bf16.msra.mxu0 %v9410_v63  ;;  %v991_v56 = vld [vmem:[#allocation2 + $0x1ba0] sm:$0xff]  ;;  %v9827_v63 = vcombine.high %v735_v52, %v743_v55  ;;  %v9826_v6 = vcombine.low %v735_v52, %v743_v55 }
 0x27b   :  { %7041 = vmatprep.subr.bf16.mxu0 %v9395_v1  ;;  %v999_v57 = vld [vmem:[#allocation2 + $0x1be0] sm:$0xff] }
 0x27c   :  { %7081 = vmatpush2.bf16.msra.mxu1 %v9666_v0  ;;  %v10083_v0 = vcombine.high %v991_v56, %v999_v57  ;;  %v719_v1 = vld [vmem:[#allocation2 + $0x1320] sm:$0xff]  ;;  %v10082_v9 = vcombine.low %v991_v56, %v999_v57 }
 0x27d   :  { %7082 = vmatprep.subr.bf16.mxu1 %v9651_v2  ;;  %v727_v2 = vld [vmem:[#allocation2 + $0x1360] sm:$0xff] }
 0x27e   :  { %7042 = vmatpush2.bf16.msra.mxu0 %v9394_v11  ;;  %v975_v3 = vld [vmem:[#allocation2 + $0x1b20] sm:$0xff]  ;;  %v9811_v11 = vcombine.high %v719_v1, %v727_v2 }
 0x27f   :  { %7043 = vmatprep.subr.bf16.mxu0 %v9379_v14  ;;  %v983_v4 = vld [vmem:[#allocation2 + $0x1b60] sm:$0xff] }
 0x280   :  { %7083 = vmatpush2.bf16.msra.mxu1 %v9650_v13  ;;  %v10067_v13 = vcombine.high %v975_v3, %v983_v4  ;;  %v703_v14 = vld [vmem:[#allocation2 + $0x12a0] sm:$0xff] }
 0x281   :  { %7084 = vmatprep.subr.bf16.mxu1 %v9635_v7  ;;  %v711_v7 = vld [vmem:[#allocation2 + $0x12e0] sm:$0xff] }
 0x282   :  { %7044 = vmatpush2.bf16.msra.mxu0 %v9378_v25  ;;  %v959_v17 = vld [vmem:[#allocation2 + $0x1aa0] sm:$0xff]  ;;  %v9795_v36 = vcombine.high %v703_v14, %v711_v7  ;;  %v9794_v46 = vcombine.low %v703_v14, %v711_v7 }
 0x283   :  { %7045 = vmatprep.subr.bf16.mxu0 %v9363_v27  ;;  %v967_v21 = vld [vmem:[#allocation2 + $0x1ae0] sm:$0xff] }
 0x284   :  { %7085 = vmatpush2.bf16.msra.mxu1 %v9634_v26  ;;  %v9810_v26 = vcombine.low %v719_v1, %v727_v2  ;;  %v951_v41 = vld [vmem:[#allocation2 + $0x1a60] sm:$0xff] }
 0x285   :  { %7086 = vmatprep.subr.bf16.mxu1 %v9619_v28  ;;  %v10066_v28 = vcombine.low %v975_v3, %v983_v4  ;;  %v671_v52 = vld [vmem:[#allocation2 + $0x11a0] sm:$0xff] }
 0x286   :  { %7046 = vmatpush2.bf16.msra.mxu0 %v9362_v34  ;;  %v10051_v34 = vcombine.high %v959_v17, %v967_v21  ;;  %v679_v55 = vld [vmem:[#allocation2 + $0x11e0] sm:$0xff] }
 0x287   :  { %7047 = vmatprep.subr.bf16.mxu0 %v9347_v47  ;;  %v695_v47 = vld [vmem:[#allocation2 + $0x1260] sm:$0xff] }
 0x288   :  { %7087 = vmatpush2.bf16.msra.mxu1 %v9618_v35  ;;  %v687_v35 = vld [vmem:[#allocation2 + $0x1220] sm:$0xff] }
 0x289   :  { %7088 = vmatprep.subr.bf16.mxu1 %v9603_v40  ;;  %v943_v40 = vld [vmem:[#allocation2 + $0x1a20] sm:$0xff] }
 0x28a   :  { %7048 = vmatpush2.bf16.msra.mxu0 %v9346_v22  ;;  %v927_v56 = vld [vmem:[#allocation2 + $0x19a0] sm:$0xff] }
 0x28b   :  { %7049 = vmatprep.subr.bf16.mxu0 %v9331_v50  ;;  %v935_v57 = vld [vmem:[#allocation2 + $0x19e0] sm:$0xff] }
 0x28c   :  { %7089 = vmatpush2.bf16.msra.mxu1 %v9602_v48  ;;  %v9779_v48 = vcombine.high %v687_v35, %v695_v47  ;;  %v655_v1 = vld [vmem:[#allocation2 + $0x1120] sm:$0xff] }
 0x28d   :  { %7090 = vmatprep.subr.bf16.mxu1 %v9587_v51  ;;  %v10035_v51 = vcombine.high %v943_v40, %v951_v41  ;;  %v663_v2 = vld [vmem:[#allocation2 + $0x1160] sm:$0xff] }
 0x28e   :  { %7050 = vmatpush2.bf16.msra.mxu0 %v9330_v61  ;;  %v9778_v61 = vcombine.low %v687_v35, %v695_v47  ;;  %v911_v3 = vld [vmem:[#allocation2 + $0x1920] sm:$0xff] }
 0x28f   :  { %7101 = vmatprep.subr.bf16.mxu0 %v9827_v63  ;;  %v9763_v63 = vcombine.high %v671_v52, %v679_v55  ;;  %v919_v4 = vld [vmem:[#allocation2 + $0x1960] sm:$0xff] }
 0x290   :  { %7091 = vmatpush2.bf16.msra.mxu1 %v9586_v62  ;;  %v10034_v62 = vcombine.low %v943_v40, %v951_v41  ;;  %v639_v14 = vld [vmem:[#allocation2 + $0x10a0] sm:$0xff] }
 0x291   :  { %7142 = vmatprep.subr.bf16.mxu1 %v10083_v0  ;;  %v6807_v15 = vpop.f32.mrf.mxu0  ;;  %7052 = vmatmul.mubr.bf16.vlgmr.msra.gmra.mxu0 %v10942_v16  ;;  %v10019_v0 = vcombine.high %v927_v56, %v935_v57  ;;  %v647_v7 = vld [vmem:[#allocation2 + $0x10e0] sm:$0xff] }
 0x292   :  { %v6808_v53 = vadd.f32 %v6807_v15, %v11054_v12  ;;  %7102 = vmatpush1.bf16.msra.mxu0 %v9826_v6  ;;  %7133 = vmatprep.mubr.bf16.mxu0 %v10960_v54  ;;  %v9762_v6 = vcombine.low %v671_v52, %v679_v55  ;;  %v895_v15 = vld [vmem:[#allocation2 + $0x18a0] sm:$0xff] }
 0x293   :  { %v6848_v25 = vpop.f32.mrf.mxu1  ;;  %7093 = vmatmul.mubr.bf16.vlgmr.msra.gmra.mxu1 %v10951_v20  ;;  %v6809_v27 = vpop.f32.mrf.mxu0  ;;  %7103 = vmatprep.subr.bf16.mxu0 %v9811_v11  ;;  %v9747_v11 = vcombine.high %v655_v1, %v663_v2  ;;  %v871_v40 = vld [vmem:[#allocation2 + $0x17e0] sm:$0xff] }
 0x294   :  { %7143 = vmatpush1.bf16.msra.mxu1 %v10082_v9  ;;  %v11063_v30 = vadd.f32 %v6848_v25, %v6808_v53  ;;  %v6810_v31 = vadd.f32 %v6809_v27, %v11058_v24  ;;  %7174 = vmatprep.mubr.bf16.mxu1 %v10965_v29  ;;  %v10050_v24 = vcombine.low %v959_v17, %v967_v21  ;;  %v903_v17 = vld [vmem:[#allocation2 + $0x18e0] sm:$0xff] }
 0x295   :  { %v6850_v33 = vpop.f32.mrf.mxu1  ;;  %7144 = vmatprep.subr.bf16.mxu1 %v10067_v13  ;;  %v6811_v12 = vpop.f32.mrf.mxu0  ;;  %v10018_v9 = vcombine.low %v927_v56, %v935_v57  ;;  %v10003_v13 = vcombine.high %v911_v3, %v919_v4  ;;  %v9746_v21 = vcombine.low %v655_v1, %v663_v2  ;;  %v10002_v53 = vcombine.low %v911_v3, %v919_v4  ;;  %v623_v27 = vld [vmem:[#allocation2 + $0x1020] sm:$0xff] }
 0x296   :  { %v11068_v42 = vadd.f32 %v6850_v33, %v6810_v31  ;;  %7104 = vmatpush1.bf16.msra.mxu0 %v9810_v26  ;;  %v9731_v25 = vcombine.high %v639_v14, %v647_v7  ;;  %v9987_v26 = vcombine.high %v895_v15, %v903_v17  ;;  %v887_v31 = vld [vmem:[#allocation2 + $0x1860] sm:$0xff]  ;;  %v9730_v33 = vcombine.low %v639_v14, %v647_v7 }
 0x297   :  { %v6852_v45 = vpop.f32.mrf.mxu1  ;;  %v6812_v22 = vpop.f32.mrf.mxu0  ;;  %7105 = vmatprep.subr.bf16.mxu0 %v9795_v36  ;;  %v879_v36 = vld [vmem:[#allocation2 + $0x1820] sm:$0xff] }
 0x298   :  { %7145 = vmatpush1.bf16.msra.mxu1 %v10066_v28  ;;  %v631_v28 = vld [vmem:[#allocation2 + $0x1060] sm:$0xff]  ;;  %v9971_v47 = vcombine.high %v879_v36, %v887_v31  ;;  %v9970_v22 = vcombine.low %v879_v36, %v887_v31 }
 0x299   :  { %v6853_v50 = vpop.f32.mrf.mxu1  ;;  %7146 = vmatprep.subr.bf16.mxu1 %v10051_v34  ;;  %v9986_v34 = vcombine.low %v895_v15, %v903_v17  ;;  %v9715_v35 = vcombine.high %v623_v27, %v631_v28  ;;  %v863_v12 = vld [vmem:[#allocation2 + $0x17a0] sm:$0xff] }
 0x29a   :  { %7106 = vmatpush1.bf16.msra.mxu0 %v9794_v46  ;;  %v1119_v41 = vld [vmem:[#allocation2 + $0x1fa0] sm:$0xff]  ;;  %v9714_v46 = vcombine.low %v623_v27, %v631_v28  ;;  %v9954_v56 = vcombine.low %v863_v12, %v871_v40 }
 0x29b   :  { %7107 = vmatprep.subr.bf16.mxu0 %v9779_v48  ;;  %v1127_v45 = vld [vmem:[#allocation2 + $0x1fe0] sm:$0xff] }
 0x29c   :  { %7147 = vmatpush1.bf16.msra.mxu1 %v10050_v24  ;;  %v9955_v24 = vcombine.high %v863_v12, %v871_v40  ;;  %v10211_v48 = vcombine.high %v1119_v41, %v1127_v45  ;;  %v847_v50 = vld [vmem:[#allocation2 + $0x1720] sm:$0xff]  ;;  %v10210_v57 = vcombine.low %v1119_v41, %v1127_v45 }
 0x29d   :  { %7148 = vmatprep.subr.bf16.mxu1 %v10035_v51  ;;  %v855_v51 = vld [vmem:[#allocation2 + $0x1760] sm:$0xff] }
 0x29e   :  { %7108 = vmatpush1.bf16.msra.mxu0 %v9778_v61  ;;  %v1103_v52 = vld [vmem:[#allocation2 + $0x1f20] sm:$0xff]  ;;  %v9939_v61 = vcombine.high %v847_v50, %v855_v51  ;;  %v9938_v3 = vcombine.low %v847_v50, %v855_v51 }
 0x29f   :  { %7109 = vmatprep.subr.bf16.mxu0 %v9763_v63  ;;  %v1111_v55 = vld [vmem:[#allocation2 + $0x1f60] sm:$0xff] }
 0x2a0   :  { %7149 = vmatpush1.bf16.msra.mxu1 %v10034_v62  ;;  %v10195_v62 = vcombine.high %v1103_v52, %v1111_v55  ;;  %v831_v63 = vld [vmem:[#allocation2 + $0x16a0] sm:$0xff]  ;;  %v10194_v4 = vcombine.low %v1103_v52, %v1111_v55 }
 0x2a1   :  { %7150 = vmatprep.subr.bf16.mxu1 %v10019_v0  ;;  %v839_v0 = vld [vmem:[#allocation2 + $0x16e0] sm:$0xff] }
 0x2a2   :  { %7110 = vmatpush1.bf16.msra.mxu0 %v9762_v6  ;;  %v1087_v1 = vld [vmem:[#allocation2 + $0x1ea0] sm:$0xff]  ;;  %v9923_v6 = vcombine.high %v831_v63, %v839_v0  ;;  %v9922_v15 = vcombine.low %v831_v63, %v839_v0 }
 0x2a3   :  { %7111 = vmatprep.subr.bf16.mxu0 %v9747_v11  ;;  %v1095_v2 = vld [vmem:[#allocation2 + $0x1ee0] sm:$0xff] }
 0x2a4   :  { %7151 = vmatpush1.bf16.msra.mxu1 %v10018_v9  ;;  %v10179_v9 = vcombine.high %v1087_v1, %v1095_v2  ;;  %v815_v11 = vld [vmem:[#allocation2 + $0x1620] sm:$0xff]  ;;  %v10178_v17 = vcombine.low %v1087_v1, %v1095_v2 }
 0x2a5   :  { %7152 = vmatprep.subr.bf16.mxu1 %v10003_v13  ;;  %v823_v13 = vld [vmem:[#allocation2 + $0x1660] sm:$0xff] }
 0x2a6   :  { %7112 = vmatpush1.bf16.msra.mxu0 %v9746_v21  ;;  %v1071_v14 = vld [vmem:[#allocation2 + $0x1e20] sm:$0xff]  ;;  %v9907_v21 = vcombine.high %v815_v11, %v823_v13  ;;  %v9906_v36 = vcombine.low %v815_v11, %v823_v13  ;;  %v480_v11 = vld [vmem:[#allocation2 + $0xba8] sm:$0xff] }
 0x2a7   :  { %7113 = vmatprep.subr.bf16.mxu0 %v9731_v25  ;;  %v1079_v7 = vld [vmem:[#allocation2 + $0x1e60] sm:$0xff]  ;;  %v488_v13 = vld [vmem:[#allocation2 + $0xbe8] sm:$0xff] }
 0x2a8   :  { %7153 = vmatpush1.bf16.msra.mxu1 %v10002_v53  ;;  %v10163_v53 = vcombine.high %v1071_v14, %v1079_v7  ;;  %v799_v25 = vld [vmem:[#allocation2 + $0x15a0] sm:$0xff]  ;;  %v10162_v31 = vcombine.low %v1071_v14, %v1079_v7  ;;  %v1161_v7 = vsub.s32 6, %v10986_v60 }
 0x2a9   :  { %7154 = vmatprep.subr.bf16.mxu1 %v9987_v26  ;;  %v807_v26 = vld [vmem:[#allocation2 + $0x15e0] sm:$0xff] }
 0x2aa   :  { %7114 = vmatpush1.bf16.msra.mxu0 %v9730_v33  ;;  %v1055_v27 = vld [vmem:[#allocation2 + $0x1da0] sm:$0xff]  ;;  %v9891_v33 = vcombine.high %v799_v25, %v807_v26  ;;  %v9890_v41 = vcombine.low %v799_v25, %v807_v26  ;;  %v208_v25 = vld [vmem:[#allocation2 + $0x328] sm:$0xff] }
 0x2ab   :  { %7115 = vmatprep.subr.bf16.mxu0 %v9715_v35  ;;  %v1063_v28 = vld [vmem:[#allocation2 + $0x1de0] sm:$0xff]  ;;  %v216_v26 = vld [vmem:[#allocation2 + $0x368] sm:$0xff] }
 0x2ac   :  { %7155 = vmatpush1.bf16.msra.mxu1 %v9986_v34  ;;  %v10147_v34 = vcombine.high %v1055_v27, %v1063_v28  ;;  %v783_v35 = vld [vmem:[#allocation2 + $0x1520] sm:$0xff]  ;;  %v10146_v45 = vcombine.low %v1055_v27, %v1063_v28  ;;  %v464_v27 = vld [vmem:[#allocation2 + $0xb28] sm:$0xff] }
 0x2ad   :  { %7156 = vmatprep.subr.bf16.mxu1 %v9971_v47  ;;  %v791_v47 = vld [vmem:[#allocation2 + $0x1560] sm:$0xff]  ;;  %v472_v28 = vld [vmem:[#allocation2 + $0xb68] sm:$0xff] }
 0x2ae   :  { %7116 = vmatpush1.bf16.msra.mxu0 %v9714_v46  ;;  %v1039_v12 = vld [vmem:[#allocation2 + $0x1d20] sm:$0xff]  ;;  %v9875_v46 = vcombine.high %v783_v35, %v791_v47  ;;  %v9874_v52 = vcombine.low %v783_v35, %v791_v47  ;;  %v9557_v47 = vcombine.high %v464_v27, %v472_v28 }
 0x2af   :  { %7117 = vmatprep.subr.bf16.mxu0 %v9955_v24  ;;  %v1047_v40 = vld [vmem:[#allocation2 + $0x1d60] sm:$0xff] }
 0x2b0   :  { %7157 = vmatpush1.bf16.msra.mxu1 %v9970_v22  ;;  %v10131_v22 = vcombine.high %v1039_v12, %v1047_v40  ;;  %v767_v24 = vld [vmem:[#allocation2 + $0x14a0] sm:$0xff]  ;;  %v10130_v55 = vcombine.low %v1039_v12, %v1047_v40  ;;  %v192_v12 = vld [vmem:[#allocation2 + $0x2a8] sm:$0xff] }
 0x2b1   :  { %7158 = vmatprep.subr.bf16.mxu1 %v10211_v48  ;;  %v775_v48 = vld [vmem:[#allocation2 + $0x14e0] sm:$0xff]  ;;  %v200_v40 = vld [vmem:[#allocation2 + $0x2e8] sm:$0xff] }
 0x2b2   :  { %7118 = vmatpush2.bf16.msra.mxu0 %v9954_v56  ;;  %v1023_v50 = vld [vmem:[#allocation2 + $0x1ca0] sm:$0xff]  ;;  %v9859_v56 = vcombine.high %v767_v24, %v775_v48  ;;  %v9858_v1 = vcombine.low %v767_v24, %v775_v48  ;;  %v9300_v48 = vcombine.low %v208_v25, %v216_v26 }
 0x2b3   :  { %7119 = vmatprep.subr.bf16.mxu0 %v9939_v61  ;;  %v1031_v51 = vld [vmem:[#allocation2 + $0x1ce0] sm:$0xff] }
 0x2b4   :  { %7159 = vmatpush2.bf16.msra.mxu1 %v10210_v57  ;;  %v10115_v57 = vcombine.high %v1023_v50, %v1031_v51  ;;  %v751_v61 = vld [vmem:[#allocation2 + $0x1420] sm:$0xff]  ;;  %v10114_v2 = vcombine.low %v1023_v50, %v1031_v51  ;;  %v9556_v51 = vcombine.low %v464_v27, %v472_v28 }
 0x2b5   :  { %7160 = vmatprep.subr.bf16.mxu1 %v10195_v62  ;;  %v759_v62 = vld [vmem:[#allocation2 + $0x1460] sm:$0xff] }
 0x2b6   :  { %7120 = vmatpush2.bf16.msra.mxu0 %v9938_v3  ;;  %v1007_v63 = vld [vmem:[#allocation2 + $0x1c20] sm:$0xff]  ;;  %v9843_v3 = vcombine.high %v751_v61, %v759_v62  ;;  %v9842_v14 = vcombine.low %v751_v61, %v759_v62  ;;  %v176_v61 = vld [vmem:[#allocation2 + $0x228] sm:$0xff] }
 0x2b7   :  { %7121 = vmatprep.subr.bf16.mxu0 %v9923_v6  ;;  %v1015_v0 = vld [vmem:[#allocation2 + $0x1c60] sm:$0xff]  ;;  %v224_v6 = vld [vmem:[#allocation2 + $0x3a8] sm:$0xff] }
 0x2b8   :  { %7161 = vmatpush2.bf16.msra.mxu1 %v10194_v4  ;;  %v10099_v4 = vcombine.high %v1007_v63, %v1015_v0  ;;  %v184_v62 = vld [vmem:[#allocation2 + $0x268] sm:$0xff] }
 0x2b9   :  { %7162 = vmatprep.subr.bf16.mxu1 %v10179_v9  ;;  %v232_v9 = vld [vmem:[#allocation2 + $0x3e8] sm:$0xff] }
 0x2ba   :  { %7122 = vmatpush2.bf16.msra.mxu0 %v9922_v15  ;;  %v10098_v15 = vcombine.low %v1007_v63, %v1015_v0  ;;  %v432_v0 = vld [vmem:[#allocation2 + $0xa28] sm:$0xff] }
 0x2bb   :  { %7123 = vmatprep.subr.bf16.mxu0 %v9907_v21  ;;  %v9573_v21 = vcombine.high %v480_v11, %v488_v13 }
 0x2bc   :  { %7163 = vmatpush2.bf16.msra.mxu1 %v10178_v17  ;;  %v9317_v17 = vcombine.high %v224_v6, %v232_v9 }
 0x2bd   :  { %7164 = vmatprep.subr.bf16.mxu1 %v10163_v53  ;;  %v1165_v53 = vsub.s32 7, %v10986_v60 }
 0x2be   :  { %7124 = vmatpush2.bf16.msra.mxu0 %v9906_v36  ;;  %v1162_v36 = vrot.slane %v11044_v49, %v1161_v7 }
 0x2bf   :  { %7125 = vmatprep.subr.bf16.mxu0 %v9891_v33  ;;  %v9572_v33 = vcombine.low %v480_v11, %v488_v13  ;;  %v1166_v35 = vrot.slane %v11044_v49, %v1165_v53  ;;  %v9269_v11 = vcombine.high %v176_v61, %v184_v62 }
 0x2c0   :  { %7165 = vmatpush2.bf16.msra.mxu1 %v10162_v31  ;;  %v9316_v31 = vcombine.low %v224_v6, %v232_v9 }
 0x2c1   :  { %7166 = vmatprep.subr.bf16.mxu1 %v10147_v34  ;;  %v9301_v34 = vcombine.high %v208_v25, %v216_v26  ;;  %v424_v25 = vld [vmem:[#allocation2 + $0x9e8] sm:$0xff]  ;;  %v9268_v26 = vcombine.low %v176_v61, %v184_v62 }
 0x2c2   :  { %7126 = vmatpush2.bf16.msra.mxu0 %v9890_v41  ;;  %v376_v61 = vld [vmem:[#allocation2 + $0x868] sm:$0xff] }
 0x2c3   :  { %7127 = vmatprep.subr.bf16.mxu0 %v9875_v46  ;;  %v456_v46 = vld [vmem:[#allocation2 + $0xae8] sm:$0xff] }
 0x2c4   :  { %7167 = vmatpush2.bf16.msra.mxu1 %v10146_v45  ;;  %v448_v45 = vld [vmem:[#allocation2 + $0xaa8] sm:$0xff] }
 0x2c5   :  { %7168 = vmatprep.subr.bf16.mxu1 %v10131_v22  ;;  %v9540_v9 = vcombine.low %v448_v45, %v456_v46 }
 0x2c6   :  { %7128 = vmatpush2.bf16.msra.mxu0 %v9874_v52  ;;  %v9285_v52 = vcombine.high %v192_v12, %v200_v40 }
 0x2c7   :  { %7129 = vmatprep.subr.bf16.mxu0 %v9859_v56 }
 0x2c8   :  { %7169 = vmatpush2.bf16.msra.mxu1 %v10130_v55 }
 0x2c9   :  { %7170 = vmatprep.subr.bf16.mxu1 %v10115_v57  ;;  %v9541_v57 = vcombine.high %v448_v45, %v456_v46  ;;  %v128_v45 = vld [vmem:[#allocation2 + $0xa8] sm:$0xff] }
 0x2ca   :  { %7130 = vmatpush2.bf16.msra.mxu0 %v9858_v1  ;;  %v440_v1 = vld [vmem:[#allocation2 + $0xa68] sm:$0xff] }
 0x2cb   :  { %7131 = vmatprep.subr.bf16.mxu0 %v9843_v3  ;;  %v9524_v27 = vcombine.low %v432_v0, %v440_v1  ;;  %v136_v46 = vld [vmem:[#allocation2 + $0xe8] sm:$0xff] }
 0x2cc   :  { %7171 = vmatpush2.bf16.msra.mxu1 %v10114_v2  ;;  %v9220_v62 = vcombine.low %v128_v45, %v136_v46 }
 0x2cd   :  { %7172 = vmatprep.subr.bf16.mxu1 %v10099_v4  ;;  %v9284_v4 = vcombine.low %v192_v12, %v200_v40 }
 0x2ce   :  { %7132 = vmatpush2.bf16.msra.mxu0 %v9842_v14  ;;  %v9525_v14 = vcombine.high %v432_v0, %v440_v1 }
 0x2cf   :  { %7183 = vmatprep.subr.bf16.mxu0 %v9317_v17  ;;  %v168_v17 = vld [vmem:[#allocation2 + $0x1e8] sm:$0xff] }
 0x2d0   :  { %7173 = vmatpush2.bf16.msra.mxu1 %v10098_v15  ;;  %v160_v15 = vld [vmem:[#allocation2 + $0x1a8] sm:$0xff] }
 0x2d1   :  { %7224 = vmatprep.subr.bf16.mxu1 %v9573_v21  ;;  %v6889_v41 = vpop.f32.mrf.mxu0  ;;  %7134 = vmatmul.mubr.bf16.vlgmr.msra.gmra.mxu0 %v10972_v38  ;;  %v416_v21 = vld [vmem:[#allocation2 + $0x9a8] sm:$0xff]  ;;  %v9253_v28 = vcombine.high %v160_v15, %v168_v17 }
 0x2d2   :  { %v6890_v22 = vadd.f32 %v6889_v41, %v1162_v36  ;;  %7184 = vmatpush1.bf16.msra.mxu0 %v9316_v31  ;;  %7215 = vmatprep.mubr.bf16.mxu0 %v10932_v58  ;;  %v9509_v36 = vcombine.high %v416_v21, %v424_v25  ;;  %v144_v31 = vld [vmem:[#allocation2 + $0x128] sm:$0xff]  ;;  %v9508_v12 = vcombine.low %v416_v21, %v424_v25 }
 0x2d3   :  { %v6930_v24 = vpop.f32.mrf.mxu1  ;;  %7175 = vmatmul.mubr.bf16.vlgmr.msra.gmra.mxu1 %v10976_v39  ;;  %v6891_v50 = vpop.f32.mrf.mxu0  ;;  %7185 = vmatprep.subr.bf16.mxu0 %v9301_v34  ;;  %v400_v34 = vld [vmem:[#allocation2 + $0x928] sm:$0xff] }
 0x2d4   :  { %7225 = vmatpush1.bf16.msra.mxu1 %v9572_v33  ;;  %v11080_v49 = vadd.f32 %v6930_v24, %v6890_v22  ;;  %v6892_v55 = vadd.f32 %v6891_v50, %v1166_v35  ;;  %7256 = vmatprep.mubr.bf16.mxu1 %v10936_v59  ;;  %v152_v33 = vld [vmem:[#allocation2 + $0x168] sm:$0xff] }
 0x2d5   :  { %v6932_v56 = vpop.f32.mrf.mxu1  ;;  %7226 = vmatprep.subr.bf16.mxu1 %v9557_v47  ;;  %v6893_v63 = vpop.f32.mrf.mxu0  ;;  %v408_v35 = vld [vmem:[#allocation2 + $0x968] sm:$0xff]  ;;  %v9252_v47 = vcombine.low %v160_v15, %v168_v17  ;;  %v9237_v40 = vcombine.high %v144_v31, %v152_v33 }
 0x2d6   :  { %v11084_v2 = vadd.f32 %v6932_v56, %v6892_v55  ;;  %7186 = vmatpush1.bf16.msra.mxu0 %v9300_v48  ;;  %v9493_v41 = vcombine.high %v400_v34, %v408_v35  ;;  %v384_v22 = vld [vmem:[#allocation2 + $0x8a8] sm:$0xff]  ;;  %v9236_v48 = vcombine.low %v144_v31, %v152_v33  ;;  %v9492_v50 = vcombine.low %v400_v34, %v408_v35 }
 0x2d7   :  { %v6934_v3 = vpop.f32.mrf.mxu1  ;;  %v6894_v6 = vpop.f32.mrf.mxu0  ;;  %7187 = vmatprep.subr.bf16.mxu0 %v9285_v52  ;;  %v392_v24 = vld [vmem:[#allocation2 + $0x8e8] sm:$0xff] }
 0x2d8   :  { %7227 = vmatpush1.bf16.msra.mxu1 %v9556_v51  ;;  %v9221_v51 = vcombine.high %v128_v45, %v136_v46  ;;  %v9477_v52 = vcombine.high %v384_v22, %v392_v24  ;;  %v112_v55 = vld [vmem:[#allocation2 + $0x28] sm:$0xff]  ;;  %v9476_v63 = vcombine.low %v384_v22, %v392_v24 }
 0x2d9   :  { %v6935_v13 = vpop.f32.mrf.mxu1  ;;  %7228 = vmatprep.subr.bf16.mxu1 %v9541_v57  ;;  %v120_v56 = vld [vmem:[#allocation2 + $0x68] sm:$0xff] }
 0x2da   :  { %7188 = vmatpush1.bf16.msra.mxu0 %v9284_v4  ;;  %v368_v57 = vld [vmem:[#allocation2 + $0x828] sm:$0xff]  ;;  %v9205_v0 = vcombine.high %v112_v55, %v120_v56 }
 0x2db   :  { %7189 = vmatprep.subr.bf16.mxu0 %v9269_v11  ;;  %v9461_v1 = vcombine.high %v368_v57, %v376_v61  ;;  %v352_v3 = vld [vmem:[#allocation2 + $0x7a8] sm:$0xff]  ;;  %v9204_v11 = vcombine.low %v112_v55, %v120_v56  ;;  %v9460_v13 = vcombine.low %v368_v57, %v376_v61 }
 0x2dc   :  { %7229 = vmatpush1.bf16.msra.mxu1 %v9540_v9  ;;  %v360_v4 = vld [vmem:[#allocation2 + $0x7e8] sm:$0xff] }
 0x2dd   :  { %7230 = vmatprep.subr.bf16.mxu1 %v9525_v14  ;;  %v608_v6 = vld [vmem:[#allocation2 + $0xfa8] sm:$0xff]  ;;  %v9445_v14 = vcombine.high %v352_v3, %v360_v4 }
 0x2de   :  { %7190 = vmatpush1.bf16.msra.mxu0 %v9268_v26  ;;  %v616_v9 = vld [vmem:[#allocation2 + $0xfe8] sm:$0xff] }
 0x2df   :  { %7191 = vmatprep.subr.bf16.mxu0 %v9253_v28  ;;  %v9701_v15 = vcombine.high %v608_v6, %v616_v9  ;;  %v336_v17 = vld [vmem:[#allocation2 + $0x728] sm:$0xff]  ;;  %v9700_v28 = vcombine.low %v608_v6, %v616_v9 }
 0x2e0   :  { %7231 = vmatpush1.bf16.msra.mxu1 %v9524_v27  ;;  %v344_v21 = vld [vmem:[#allocation2 + $0x768] sm:$0xff]  ;;  %v9444_v27 = vcombine.low %v352_v3, %v360_v4 }
 0x2e1   :  { %7232 = vmatprep.subr.bf16.mxu1 %v9509_v36  ;;  %v592_v25 = vld [vmem:[#allocation2 + $0xf28] sm:$0xff]  ;;  %v9429_v36 = vcombine.high %v336_v17, %v344_v21 }
 0x2e2   :  { %7192 = vmatpush1.bf16.msra.mxu0 %v9252_v47  ;;  %v600_v26 = vld [vmem:[#allocation2 + $0xf68] sm:$0xff] }
 0x2e3   :  { %7193 = vmatprep.subr.bf16.mxu0 %v9237_v40  ;;  %v9685_v31 = vcombine.high %v592_v25, %v600_v26  ;;  %v320_v33 = vld [vmem:[#allocation2 + $0x6a8] sm:$0xff]  ;;  %v9684_v40 = vcombine.low %v592_v25, %v600_v26 }
 0x2e4   :  { %7233 = vmatpush1.bf16.msra.mxu1 %v9508_v12  ;;  %v328_v34 = vld [vmem:[#allocation2 + $0x6e8] sm:$0xff]  ;;  %v9428_v12 = vcombine.low %v336_v17, %v344_v21 }
 0x2e5   :  { %7234 = vmatprep.subr.bf16.mxu1 %v9493_v41  ;;  %v576_v35 = vld [vmem:[#allocation2 + $0xea8] sm:$0xff]  ;;  %v9413_v41 = vcombine.high %v320_v33, %v328_v34 }
 0x2e6   :  { %7194 = vmatpush1.bf16.msra.mxu0 %v9236_v48  ;;  %v584_v47 = vld [vmem:[#allocation2 + $0xee8] sm:$0xff] }
 0x2e7   :  { %7195 = vmatprep.subr.bf16.mxu0 %v9221_v51  ;;  %v9669_v45 = vcombine.high %v576_v35, %v584_v47  ;;  %v304_v46 = vld [vmem:[#allocation2 + $0x628] sm:$0xff]  ;;  %v9668_v51 = vcombine.low %v576_v35, %v584_v47 }
 0x2e8   :  { %7235 = vmatpush1.bf16.msra.mxu1 %v9492_v50  ;;  %v312_v22 = vld [vmem:[#allocation2 + $0x668] sm:$0xff]  ;;  %v9412_v50 = vcombine.low %v320_v33, %v328_v34 }
 0x2e9   :  { %7236 = vmatprep.subr.bf16.mxu1 %v9477_v52  ;;  %v560_v24 = vld [vmem:[#allocation2 + $0xe28] sm:$0xff]  ;;  %v9397_v52 = vcombine.high %v304_v46, %v312_v22 }
 0x2ea   :  { %7196 = vmatpush1.bf16.msra.mxu0 %v9220_v62  ;;  %v568_v48 = vld [vmem:[#allocation2 + $0xe68] sm:$0xff] }
 0x2eb   :  { %7197 = vmatprep.subr.bf16.mxu0 %v9205_v0  ;;  %v9653_v55 = vcombine.high %v560_v24, %v568_v48  ;;  %v288_v56 = vld [vmem:[#allocation2 + $0x5a8] sm:$0xff]  ;;  %v9652_v0 = vcombine.low %v560_v24, %v568_v48 }
 0x2ec   :  { %7237 = vmatpush1.bf16.msra.mxu1 %v9476_v63  ;;  %v296_v57 = vld [vmem:[#allocation2 + $0x5e8] sm:$0xff]  ;;  %v9396_v63 = vcombine.low %v304_v46, %v312_v22 }
 0x2ed   :  { %7238 = vmatprep.subr.bf16.mxu1 %v9461_v1  ;;  %v544_v61 = vld [vmem:[#allocation2 + $0xda8] sm:$0xff]  ;;  %v9381_v1 = vcombine.high %v288_v56, %v296_v57 }
 0x2ee   :  { %7198 = vmatpush1.bf16.msra.mxu0 %v9204_v11  ;;  %v552_v62 = vld [vmem:[#allocation2 + $0xde8] sm:$0xff] }
 0x2ef   :  { %7199 = vmatprep.subr.bf16.mxu0 %v9445_v14  ;;  %v9637_v3 = vcombine.high %v544_v61, %v552_v62  ;;  %v272_v4 = vld [vmem:[#allocation2 + $0x528] sm:$0xff]  ;;  %v9636_v14 = vcombine.low %v544_v61, %v552_v62 }
 0x2f0   :  { %7239 = vmatpush1.bf16.msra.mxu1 %v9460_v13  ;;  %v280_v6 = vld [vmem:[#allocation2 + $0x568] sm:$0xff]  ;;  %v9380_v13 = vcombine.low %v288_v56, %v296_v57 }
 0x2f1   :  { %7240 = vmatprep.subr.bf16.mxu1 %v9701_v15  ;;  %v528_v9 = vld [vmem:[#allocation2 + $0xd28] sm:$0xff]  ;;  %v9365_v15 = vcombine.high %v272_v4, %v280_v6 }
 0x2f2   :  { %7200 = vmatpush2.bf16.msra.mxu0 %v9444_v27  ;;  %v536_v11 = vld [vmem:[#allocation2 + $0xd68] sm:$0xff] }
 0x2f3   :  { %7201 = vmatprep.subr.bf16.mxu0 %v9429_v36  ;;  %v9621_v17 = vcombine.high %v528_v9, %v536_v11  ;;  %v256_v21 = vld [vmem:[#allocation2 + $0x4a8] sm:$0xff]  ;;  %v9620_v36 = vcombine.low %v528_v9, %v536_v11 }
 0x2f4   :  { %7241 = vmatpush2.bf16.msra.mxu1 %v9700_v28  ;;  %v264_v25 = vld [vmem:[#allocation2 + $0x4e8] sm:$0xff]  ;;  %v9364_v28 = vcombine.low %v272_v4, %v280_v6 }
 0x2f5   :  { %7242 = vmatprep.subr.bf16.mxu1 %v9685_v31  ;;  %v512_v26 = vld [vmem:[#allocation2 + $0xca8] sm:$0xff]  ;;  %v9349_v31 = vcombine.high %v256_v21, %v264_v25 }
 0x2f6   :  { %7202 = vmatpush2.bf16.msra.mxu0 %v9428_v12  ;;  %v520_v27 = vld [vmem:[#allocation2 + $0xce8] sm:$0xff] }
 0x2f7   :  { %7203 = vmatprep.subr.bf16.mxu0 %v9413_v41  ;;  %v9605_v33 = vcombine.high %v512_v26, %v520_v27  ;;  %v240_v34 = vld [vmem:[#allocation2 + $0x428] sm:$0xff]  ;;  %v9604_v41 = vcombine.low %v512_v26, %v520_v27 }
 0x2f8   :  { %7243 = vmatpush2.bf16.msra.mxu1 %v9684_v40  ;;  %v248_v35 = vld [vmem:[#allocation2 + $0x468] sm:$0xff]  ;;  %v9348_v40 = vcombine.low %v256_v21, %v264_v25 }
 0x2f9   :  { %7244 = vmatprep.subr.bf16.mxu1 %v9669_v45  ;;  %v496_v47 = vld [vmem:[#allocation2 + $0xc28] sm:$0xff]  ;;  %v9333_v45 = vcombine.high %v240_v34, %v248_v35 }
 0x2fa   :  { %7204 = vmatpush2.bf16.msra.mxu0 %v9412_v50  ;;  %v504_v12 = vld [vmem:[#allocation2 + $0xc68] sm:$0xff] }
 0x2fb   :  { %7205 = vmatprep.subr.bf16.mxu0 %v9397_v52  ;;  %v9589_v46 = vcombine.high %v496_v47, %v504_v12  ;;  %v736_v22 = vld [vmem:[#allocation2 + $0x13a8] sm:$0xff]  ;;  %v9588_v52 = vcombine.low %v496_v47, %v504_v12 }
 0x2fc   :  { %7245 = vmatpush2.bf16.msra.mxu1 %v9668_v51  ;;  %v744_v24 = vld [vmem:[#allocation2 + $0x13e8] sm:$0xff]  ;;  %v9332_v51 = vcombine.low %v240_v34, %v248_v35 }
 0x2fd   :  { %7246 = vmatprep.subr.bf16.mxu1 %v9653_v55  ;;  %v992_v48 = vld [vmem:[#allocation2 + $0x1ba8] sm:$0xff]  ;;  %v9829_v55 = vcombine.high %v736_v22, %v744_v24 }
 0x2fe   :  { %7206 = vmatpush2.bf16.msra.mxu0 %v9396_v63  ;;  %v1000_v50 = vld [vmem:[#allocation2 + $0x1be8] sm:$0xff] }
 0x2ff   :  { %7207 = vmatprep.subr.bf16.mxu0 %v9381_v1  ;;  %v10085_v56 = vcombine.high %v992_v48, %v1000_v50  ;;  %v720_v57 = vld [vmem:[#allocation2 + $0x1328] sm:$0xff]  ;;  %v10084_v1 = vcombine.low %v992_v48, %v1000_v50 }
 0x300   :  { %7247 = vmatpush2.bf16.msra.mxu1 %v9652_v0  ;;  %v728_v61 = vld [vmem:[#allocation2 + $0x1368] sm:$0xff]  ;;  %v9828_v0 = vcombine.low %v736_v22, %v744_v24 }
 0x301   :  { %7248 = vmatprep.subr.bf16.mxu1 %v9637_v3  ;;  %v976_v62 = vld [vmem:[#allocation2 + $0x1b28] sm:$0xff]  ;;  %v9813_v3 = vcombine.high %v720_v57, %v728_v61  ;;  %v9812_v21 = vcombine.low %v720_v57, %v728_v61 }
 0x302   :  { %7208 = vmatpush2.bf16.msra.mxu0 %v9380_v13  ;;  %v984_v63 = vld [vmem:[#allocation2 + $0x1b68] sm:$0xff] }
 0x303   :  { %7209 = vmatprep.subr.bf16.mxu0 %v9365_v15  ;;  %v10069_v4 = vcombine.high %v976_v62, %v984_v63  ;;  %v704_v6 = vld [vmem:[#allocation2 + $0x12a8] sm:$0xff]  ;;  %v10068_v26 = vcombine.low %v976_v62, %v984_v63 }
 0x304   :  { %7249 = vmatpush2.bf16.msra.mxu1 %v9636_v14  ;;  %v712_v9 = vld [vmem:[#allocation2 + $0x12e8] sm:$0xff] }
 0x305   :  { %7250 = vmatprep.subr.bf16.mxu1 %v9621_v17  ;;  %v960_v13 = vld [vmem:[#allocation2 + $0x1aa8] sm:$0xff]  ;;  %v9797_v27 = vcombine.high %v704_v6, %v712_v9 }
 0x306   :  { %7210 = vmatpush2.bf16.msra.mxu0 %v9364_v28  ;;  %v968_v14 = vld [vmem:[#allocation2 + $0x1ae8] sm:$0xff] }
 0x307   :  { %7211 = vmatprep.subr.bf16.mxu0 %v9349_v31  ;;  %v688_v34 = vld [vmem:[#allocation2 + $0x1228] sm:$0xff] }
 0x308   :  { %7251 = vmatpush2.bf16.msra.mxu1 %v9620_v36  ;;  %v696_v35 = vld [vmem:[#allocation2 + $0x1268] sm:$0xff] }
 0x309   :  { %7252 = vmatprep.subr.bf16.mxu1 %v9605_v33  ;;  %v10053_v33 = vcombine.high %v960_v13, %v968_v14  ;;  %v944_v47 = vld [vmem:[#allocation2 + $0x1a28] sm:$0xff]  ;;  %v9781_v22 = vcombine.high %v688_v34, %v696_v35 }
 0x30a   :  { %7212 = vmatpush2.bf16.msra.mxu0 %v9348_v40  ;;  %v952_v12 = vld [vmem:[#allocation2 + $0x1a68] sm:$0xff] }
 0x30b   :  { %7213 = vmatprep.subr.bf16.mxu0 %v9333_v45  ;;  %v9796_v45 = vcombine.low %v704_v6, %v712_v9  ;;  %v10037_v48 = vcombine.high %v944_v47, %v952_v12  ;;  %v672_v50 = vld [vmem:[#allocation2 + $0x11a8] sm:$0xff]  ;;  %v10036_v57 = vcombine.low %v944_v47, %v952_v12 }
 0x30c   :  { %7253 = vmatpush2.bf16.msra.mxu1 %v9604_v41  ;;  %v656_v63 = vld [vmem:[#allocation2 + $0x1128] sm:$0xff] }
 0x30d   :  { %7254 = vmatprep.subr.bf16.mxu1 %v9589_v46 }
 0x30e   :  { %7214 = vmatpush2.bf16.msra.mxu0 %v9332_v51  ;;  %v680_v51 = vld [vmem:[#allocation2 + $0x11e8] sm:$0xff] }
 0x30f   :  { %7265 = vmatprep.subr.bf16.mxu0 %v9829_v55  ;;  %v936_v55 = vld [vmem:[#allocation2 + $0x19e8] sm:$0xff]  ;;  %v9765_v61 = vcombine.high %v672_v50, %v680_v51 }
 0x310   :  { %7255 = vmatpush2.bf16.msra.mxu1 %v9588_v52  ;;  %v928_v52 = vld [vmem:[#allocation2 + $0x19a8] sm:$0xff] }
 0x311   :  { %7306 = vmatprep.subr.bf16.mxu1 %v10085_v56  ;;  %v6971_v11 = vpop.f32.mrf.mxu0  ;;  %7216 = vmatmul.mubr.bf16.vlgmr.msra.gmra.mxu0 %v10942_v16  ;;  %v9780_v56 = vcombine.low %v688_v34, %v696_v35  ;;  %v10021_v62 = vcombine.high %v928_v52, %v936_v55  ;;  %v10020_v6 = vcombine.low %v928_v52, %v936_v55  ;;  %v888_v34 = vld [vmem:[#allocation2 + $0x1868] sm:$0xff] }
 0x312   :  { %v6972_v15 = vadd.f32 %v6971_v11, %v11080_v49  ;;  %7266 = vmatpush1.bf16.msra.mxu0 %v9828_v0  ;;  %7297 = vmatprep.mubr.bf16.mxu0 %v10960_v54  ;;  %v664_v0 = vld [vmem:[#allocation2 + $0x1168] sm:$0xff] }
 0x313   :  { %v7012_v17 = vpop.f32.mrf.mxu1  ;;  %7257 = vmatmul.mubr.bf16.vlgmr.msra.gmra.mxu1 %v10951_v20  ;;  %v6973_v25 = vpop.f32.mrf.mxu0  ;;  %7267 = vmatprep.subr.bf16.mxu0 %v9813_v3  ;;  %v920_v3 = vld [vmem:[#allocation2 + $0x1968] sm:$0xff]  ;;  %v9749_v9 = vcombine.high %v656_v63, %v664_v0 }
 0x314   :  { %7307 = vmatpush1.bf16.msra.mxu1 %v10084_v1  ;;  %v11089_v28 = vadd.f32 %v7012_v17, %v6972_v15  ;;  %v6974_v36 = vadd.f32 %v6973_v25, %v11084_v2  ;;  %7338 = vmatprep.mubr.bf16.mxu1 %v10965_v29  ;;  %v10052_v2 = vcombine.low %v960_v13, %v968_v14  ;;  %v912_v1 = vld [vmem:[#allocation2 + $0x1928] sm:$0xff] }
 0x315   :  { %v7014_v31 = vpop.f32.mrf.mxu1  ;;  %7308 = vmatprep.subr.bf16.mxu1 %v10069_v4  ;;  %v6975_v49 = vpop.f32.mrf.mxu0  ;;  %v9764_v4 = vcombine.low %v672_v50, %v680_v51  ;;  %v10005_v11 = vcombine.high %v912_v1, %v920_v3  ;;  %v640_v13 = vld [vmem:[#allocation2 + $0x10a8] sm:$0xff]  ;;  %v10004_v25 = vcombine.low %v912_v1, %v920_v3 }
 0x316   :  { %v11094_v40 = vadd.f32 %v7014_v31, %v6974_v36  ;;  %7268 = vmatpush1.bf16.msra.mxu0 %v9812_v21  ;;  %v648_v14 = vld [vmem:[#allocation2 + $0x10e8] sm:$0xff]  ;;  %v9748_v21 = vcombine.low %v656_v63, %v664_v0 }
 0x317   :  { %v7016_v41 = vpop.f32.mrf.mxu1  ;;  %v6976_v46 = vpop.f32.mrf.mxu0  ;;  %7269 = vmatprep.subr.bf16.mxu0 %v9797_v27  ;;  %v896_v15 = vld [vmem:[#allocation2 + $0x18a8] sm:$0xff]  ;;  %v9732_v35 = vcombine.low %v640_v13, %v648_v14 }
 0x318   :  { %7309 = vmatpush1.bf16.msra.mxu1 %v10068_v26  ;;  %v904_v17 = vld [vmem:[#allocation2 + $0x18e8] sm:$0xff]  ;;  %v9733_v26 = vcombine.high %v640_v13, %v648_v14 }
 0x319   :  { %v7017_v24 = vpop.f32.mrf.mxu1  ;;  %7310 = vmatprep.subr.bf16.mxu1 %v10053_v33  ;;  %v9989_v27 = vcombine.high %v896_v15, %v904_v17  ;;  %v624_v36 = vld [vmem:[#allocation2 + $0x1028] sm:$0xff]  ;;  %v9988_v49 = vcombine.low %v896_v15, %v904_v17 }
 0x31a   :  { %7270 = vmatpush1.bf16.msra.mxu0 %v9796_v45  ;;  %v632_v31 = vld [vmem:[#allocation2 + $0x1068] sm:$0xff] }
 0x31b   :  { %7271 = vmatprep.subr.bf16.mxu0 %v9781_v22  ;;  %v880_v33 = vld [vmem:[#allocation2 + $0x1828] sm:$0xff]  ;;  %v9717_v47 = vcombine.high %v624_v36, %v632_v31  ;;  %v9716_v22 = vcombine.low %v624_v36, %v632_v31 }
 0x31c   :  { %7311 = vmatpush1.bf16.msra.mxu1 %v10052_v2  ;;  %v9973_v12 = vcombine.high %v880_v33, %v888_v34  ;;  %v864_v41 = vld [vmem:[#allocation2 + $0x17a8] sm:$0xff]  ;;  %v9972_v24 = vcombine.low %v880_v33, %v888_v34 }
 0x31d   :  { %7312 = vmatprep.subr.bf16.mxu1 %v10037_v48  ;;  %v872_v45 = vld [vmem:[#allocation2 + $0x17e8] sm:$0xff] }
 0x31e   :  { %7272 = vmatpush1.bf16.msra.mxu0 %v9780_v56  ;;  %v1120_v46 = vld [vmem:[#allocation2 + $0x1fa8] sm:$0xff]  ;;  %v9957_v48 = vcombine.high %v864_v41, %v872_v45 }
 0x31f   :  { %7273 = vmatprep.subr.bf16.mxu0 %v9765_v61  ;;  %v1128_v2 = vld [vmem:[#allocation2 + $0x1fe8] sm:$0xff] }
 0x320   :  { %7313 = vmatpush1.bf16.msra.mxu1 %v10036_v57  ;;  %v10213_v50 = vcombine.high %v1120_v46, %v1128_v2  ;;  %v848_v51 = vld [vmem:[#allocation2 + $0x1728] sm:$0xff]  ;;  %v9956_v57 = vcombine.low %v864_v41, %v872_v45  ;;  %v10212_v61 = vcombine.low %v1120_v46, %v1128_v2 }
 0x321   :  { %7314 = vmatprep.subr.bf16.mxu1 %v10021_v62  ;;  %v856_v52 = vld [vmem:[#allocation2 + $0x1768] sm:$0xff] }
 0x322   :  { %7274 = vmatpush1.bf16.msra.mxu0 %v9764_v4  ;;  %v1104_v55 = vld [vmem:[#allocation2 + $0x1f28] sm:$0xff]  ;;  %v9941_v62 = vcombine.high %v848_v51, %v856_v52 }
 0x323   :  { %7275 = vmatprep.subr.bf16.mxu0 %v9749_v9  ;;  %v1112_v56 = vld [vmem:[#allocation2 + $0x1f68] sm:$0xff] }
 0x324   :  { %7315 = vmatpush1.bf16.msra.mxu1 %v10020_v6  ;;  %v10197_v63 = vcombine.high %v1104_v55, %v1112_v56  ;;  %v832_v0 = vld [vmem:[#allocation2 + $0x16a8] sm:$0xff]  ;;  %v9940_v6 = vcombine.low %v848_v51, %v856_v52  ;;  %v10196_v9 = vcombine.low %v1104_v55, %v1112_v56 }
 0x325   :  { %7316 = vmatprep.subr.bf16.mxu1 %v10005_v11  ;;  %v840_v1 = vld [vmem:[#allocation2 + $0x16e8] sm:$0xff] }
 0x326   :  { %7276 = vmatpush1.bf16.msra.mxu0 %v9748_v21  ;;  %v1088_v3 = vld [vmem:[#allocation2 + $0x1ea8] sm:$0xff]  ;;  %v9925_v11 = vcombine.high %v832_v0, %v840_v1 }
 0x327   :  { %7277 = vmatprep.subr.bf16.mxu0 %v9733_v26  ;;  %v1096_v4 = vld [vmem:[#allocation2 + $0x1ee8] sm:$0xff] }
 0x328   :  { %7317 = vmatpush1.bf16.msra.mxu1 %v10004_v25  ;;  %v10181_v13 = vcombine.high %v1088_v3, %v1096_v4  ;;  %v816_v14 = vld [vmem:[#allocation2 + $0x1628] sm:$0xff]  ;;  %v9924_v25 = vcombine.low %v832_v0, %v840_v1  ;;  %v10180_v26 = vcombine.low %v1088_v3, %v1096_v4 }
 0x329   :  { %7318 = vmatprep.subr.bf16.mxu1 %v9989_v27  ;;  %v824_v15 = vld [vmem:[#allocation2 + $0x1668] sm:$0xff] }
 0x32a   :  { %7278 = vmatpush1.bf16.msra.mxu0 %v9732_v35  ;;  %v1072_v17 = vld [vmem:[#allocation2 + $0x1e28] sm:$0xff]  ;;  %v9909_v27 = vcombine.high %v816_v14, %v824_v15 }
 0x32b   :  { %7279 = vmatprep.subr.bf16.mxu0 %v9717_v47  ;;  %v1080_v21 = vld [vmem:[#allocation2 + $0x1e68] sm:$0xff] }
 0x32c   :  { %7319 = vmatpush1.bf16.msra.mxu1 %v9988_v49  ;;  %v10165_v36 = vcombine.high %v1072_v17, %v1080_v21  ;;  %v800_v31 = vld [vmem:[#allocation2 + $0x15a8] sm:$0xff]  ;;  %v9908_v49 = vcombine.low %v816_v14, %v824_v15  ;;  %v10164_v47 = vcombine.low %v1072_v17, %v1080_v21  ;;  %v225_v15 = vld [vmem:[#allocation2 + $0x3b0] sm:$0xff] }
 0x32d   :  { %7320 = vmatprep.subr.bf16.mxu1 %v9973_v12  ;;  %v808_v33 = vld [vmem:[#allocation2 + $0x15e8] sm:$0xff]  ;;  %v233_v17 = vld [vmem:[#allocation2 + $0x3f0] sm:$0xff] }
 0x32e   :  { %7280 = vmatpush1.bf16.msra.mxu0 %v9716_v22  ;;  %v1056_v34 = vld [vmem:[#allocation2 + $0x1da8] sm:$0xff]  ;;  %v9893_v12 = vcombine.high %v800_v31, %v808_v33  ;;  %v481_v21 = vld [vmem:[#allocation2 + $0xbb0] sm:$0xff] }
 0x32f   :  { %7281 = vmatprep.subr.bf16.mxu0 %v9957_v48  ;;  %v1064_v35 = vld [vmem:[#allocation2 + $0x1de8] sm:$0xff] }
 0x330   :  { %7321 = vmatpush1.bf16.msra.mxu1 %v9972_v24  ;;  %v10149_v41 = vcombine.high %v1056_v34, %v1064_v35  ;;  %v784_v45 = vld [vmem:[#allocation2 + $0x1528] sm:$0xff]  ;;  %v9892_v24 = vcombine.low %v800_v31, %v808_v33  ;;  %v10148_v48 = vcombine.low %v1056_v34, %v1064_v35  ;;  %v9319_v31 = vcombine.high %v225_v15, %v233_v17  ;;  %v209_v34 = vld [vmem:[#allocation2 + $0x330] sm:$0xff] }
 0x331   :  { %7322 = vmatprep.subr.bf16.mxu1 %v10213_v50  ;;  %v792_v46 = vld [vmem:[#allocation2 + $0x1568] sm:$0xff]  ;;  %v217_v35 = vld [vmem:[#allocation2 + $0x370] sm:$0xff] }
 0x332   :  { %7282 = vmatpush2.bf16.msra.mxu0 %v9956_v57  ;;  %v1040_v2 = vld [vmem:[#allocation2 + $0x1d28] sm:$0xff]  ;;  %v9877_v50 = vcombine.high %v784_v45, %v792_v46 }
 0x333   :  { %7283 = vmatprep.subr.bf16.mxu0 %v9941_v62  ;;  %v1048_v22 = vld [vmem:[#allocation2 + $0x1d68] sm:$0xff] }
 0x334   :  { %7323 = vmatpush2.bf16.msra.mxu1 %v10212_v61  ;;  %v10133_v51 = vcombine.high %v1040_v2, %v1048_v22  ;;  %v768_v52 = vld [vmem:[#allocation2 + $0x14a8] sm:$0xff]  ;;  %v9876_v61 = vcombine.low %v784_v45, %v792_v46  ;;  %v10132_v62 = vcombine.low %v1040_v2, %v1048_v22  ;;  %v9303_v46 = vcombine.high %v209_v34, %v217_v35 }
 0x335   :  { %7324 = vmatprep.subr.bf16.mxu1 %v10197_v63  ;;  %v776_v55 = vld [vmem:[#allocation2 + $0x14e8] sm:$0xff] }
 0x336   :  { %7284 = vmatpush2.bf16.msra.mxu0 %v9940_v6  ;;  %v1024_v56 = vld [vmem:[#allocation2 + $0x1ca8] sm:$0xff]  ;;  %v9861_v63 = vcombine.high %v768_v52, %v776_v55 }
 0x337   :  { %7285 = vmatprep.subr.bf16.mxu0 %v9925_v11  ;;  %v1032_v57 = vld [vmem:[#allocation2 + $0x1ce8] sm:$0xff] }
 0x338   :  { %7325 = vmatpush2.bf16.msra.mxu1 %v10196_v9  ;;  %v10117_v0 = vcombine.high %v1024_v56, %v1032_v57  ;;  %v752_v1 = vld [vmem:[#allocation2 + $0x1428] sm:$0xff]  ;;  %v9860_v9 = vcombine.low %v768_v52, %v776_v55  ;;  %v10116_v11 = vcombine.low %v1024_v56, %v1032_v57  ;;  %v457_v52 = vld [vmem:[#allocation2 + $0xaf0] sm:$0xff]  ;;  %v9302_v56 = vcombine.low %v209_v34, %v217_v35 }
 0x339   :  { %7326 = vmatprep.subr.bf16.mxu1 %v10181_v13  ;;  %v760_v3 = vld [vmem:[#allocation2 + $0x1468] sm:$0xff]  ;;  %v417_v34 = vld [vmem:[#allocation2 + $0x9b0] sm:$0xff] }
 0x33a   :  { %7286 = vmatpush2.bf16.msra.mxu0 %v9924_v25  ;;  %v1008_v4 = vld [vmem:[#allocation2 + $0x1c28] sm:$0xff]  ;;  %v9845_v13 = vcombine.high %v752_v1, %v760_v3  ;;  %v489_v25 = vld [vmem:[#allocation2 + $0xbf0] sm:$0xff] }
 0x33b   :  { %7287 = vmatprep.subr.bf16.mxu0 %v9909_v27  ;;  %v1016_v6 = vld [vmem:[#allocation2 + $0x1c68] sm:$0xff]  ;;  %v9575_v33 = vcombine.high %v481_v21, %v489_v25  ;;  %v9574_v45 = vcombine.low %v481_v21, %v489_v25  ;;  %v425_v35 = vld [vmem:[#allocation2 + $0x9f0] sm:$0xff] }
 0x33c   :  { %7327 = vmatpush2.bf16.msra.mxu1 %v10180_v26  ;;  %v10101_v14 = vcombine.high %v1008_v4, %v1016_v6  ;;  %v9844_v26 = vcombine.low %v752_v1, %v760_v3  ;;  %v10100_v27 = vcombine.low %v1008_v4, %v1016_v6  ;;  %v177_v3 = vld [vmem:[#allocation2 + $0x230] sm:$0xff] }
 0x33d   :  { %7328 = vmatprep.subr.bf16.mxu1 %v10165_v36  ;;  %v11096_v36 = vld [vmem:[#allocation4 + $0x8] sm:$0xff]  ;;  %v185_v4 = vld [vmem:[#allocation2 + $0x270] sm:$0xff] }
 0x33e   :  { %7288 = vmatpush2.bf16.msra.mxu0 %v9908_v49  ;;  %v465_v49 = vld [vmem:[#allocation2 + $0xb30] sm:$0xff]  ;;  %v1174_v2 = vrot.slane %v11096_v36, %v1141_v10  ;;  %v9271_v25 = vcombine.high %v177_v3, %v185_v4 }
 0x33f   :  { %7289 = vmatprep.subr.bf16.mxu0 %v9893_v12  ;;  %v1170_v12 = vrot.slane %v11096_v36, %v1137_v5 }
 0x340   :  { %7329 = vmatpush2.bf16.msra.mxu1 %v10164_v47  ;;  %v473_v47 = vld [vmem:[#allocation2 + $0xb70] sm:$0xff] }
 0x341   :  { %7330 = vmatprep.subr.bf16.mxu1 %v10149_v41  ;;  %v9318_v41 = vcombine.low %v225_v15, %v233_v17  ;;  %v9559_v22 = vcombine.high %v465_v49, %v473_v47 }
 0x342   :  { %7290 = vmatpush2.bf16.msra.mxu0 %v9892_v24  ;;  %v193_v24 = vld [vmem:[#allocation2 + $0x2b0] sm:$0xff] }
 0x343   :  { %7291 = vmatprep.subr.bf16.mxu0 %v9877_v50 }
 0x344   :  { %7331 = vmatpush2.bf16.msra.mxu1 %v10148_v48  ;;  %v201_v48 = vld [vmem:[#allocation2 + $0x2f0] sm:$0xff] }
 0x345   :  { %7332 = vmatprep.subr.bf16.mxu1 %v10133_v51  ;;  %v449_v51 = vld [vmem:[#allocation2 + $0xab0] sm:$0xff]  ;;  %v9286_v15 = vcombine.low %v193_v24, %v201_v48 }
 0x346   :  { %7292 = vmatpush2.bf16.msra.mxu0 %v9876_v61  ;;  %v9558_v61 = vcombine.low %v465_v49, %v473_v47  ;;  %v9543_v1 = vcombine.high %v449_v51, %v457_v52  ;;  %v9542_v21 = vcombine.low %v449_v51, %v457_v52  ;;  %v9270_v49 = vcombine.low %v177_v3, %v185_v4  ;;  %v129_v52 = vld [vmem:[#allocation2 + $0xb0] sm:$0xff] }
 0x347   :  { %7293 = vmatprep.subr.bf16.mxu0 %v9861_v63  ;;  %v369_v3 = vld [vmem:[#allocation2 + $0x830] sm:$0xff] }
 0x348   :  { %7333 = vmatpush2.bf16.msra.mxu1 %v10132_v62  ;;  %v9287_v62 = vcombine.high %v193_v24, %v201_v48  ;;  %v9510_v48 = vcombine.low %v417_v34, %v425_v35  ;;  %v377_v4 = vld [vmem:[#allocation2 + $0x870] sm:$0xff] }
 0x349   :  { %7334 = vmatprep.subr.bf16.mxu1 %v10117_v0 }
 0x34a   :  { %7294 = vmatpush2.bf16.msra.mxu0 %v9860_v9  ;;  %v433_v9 = vld [vmem:[#allocation2 + $0xa30] sm:$0xff] }
 0x34b   :  { %7295 = vmatprep.subr.bf16.mxu0 %v9845_v13 }
 0x34c   :  { %7335 = vmatpush2.bf16.msra.mxu1 %v10116_v11  ;;  %v441_v11 = vld [vmem:[#allocation2 + $0xa70] sm:$0xff] }
 0x34d   :  { %7336 = vmatprep.subr.bf16.mxu1 %v10101_v14  ;;  %v9526_v47 = vcombine.low %v433_v9, %v441_v11 }
 0x34e   :  { %7296 = vmatpush2.bf16.msra.mxu0 %v9844_v26 }
 0x34f   :  { %7347 = vmatprep.subr.bf16.mxu0 %v9319_v31  ;;  %v161_v31 = vld [vmem:[#allocation2 + $0x1b0] sm:$0xff] }
 0x350   :  { %7337 = vmatpush2.bf16.msra.mxu1 %v10100_v27  ;;  %v9527_v27 = vcombine.high %v433_v9, %v441_v11 }
 0x351   :  { %7388 = vmatprep.subr.bf16.mxu1 %v9575_v33  ;;  %v7053_v50 = vpop.f32.mrf.mxu0  ;;  %7298 = vmatmul.mubr.bf16.vlgmr.msra.gmra.mxu0 %v10972_v38  ;;  %v169_v33 = vld [vmem:[#allocation2 + $0x1f0] sm:$0xff] }
 0x352   :  { %v7054_v55 = vadd.f32 %v7053_v50, %v1170_v12  ;;  %7348 = vmatpush1.bf16.msra.mxu0 %v9318_v41  ;;  %7379 = vmatprep.mubr.bf16.mxu0 %v10932_v58  ;;  %v9255_v12 = vcombine.high %v161_v31, %v169_v33  ;;  %v9511_v41 = vcombine.high %v417_v34, %v425_v35  ;;  %v337_v34 = vld [vmem:[#allocation2 + $0x730] sm:$0xff] }
 0x353   :  { %v7094_v5 = vpop.f32.mrf.mxu1  ;;  %7339 = vmatmul.mubr.bf16.vlgmr.msra.gmra.mxu1 %v10976_v39  ;;  %v7055_v57 = vpop.f32.mrf.mxu0  ;;  %7349 = vmatprep.subr.bf16.mxu0 %v9303_v46  ;;  %v153_v46 = vld [vmem:[#allocation2 + $0x170] sm:$0xff]  ;;  %v9254_v24 = vcombine.low %v161_v31, %v169_v33 }
 0x354   :  { %7389 = vmatpush1.bf16.msra.mxu1 %v9574_v45  ;;  %v11106_v10 = vadd.f32 %v7094_v5, %v7054_v55  ;;  %v7056_v63 = vadd.f32 %v7055_v57, %v1174_v2  ;;  %7420 = vmatprep.mubr.bf16.mxu1 %v10936_v59  ;;  %v145_v45 = vld [vmem:[#allocation2 + $0x130] sm:$0xff] }
 0x355   :  { %v7096_v0 = vpop.f32.mrf.mxu1  ;;  %7390 = vmatprep.subr.bf16.mxu1 %v9559_v22  ;;  %v7057_v6 = vpop.f32.mrf.mxu0  ;;  %v401_v2 = vld [vmem:[#allocation2 + $0x930] sm:$0xff]  ;;  %v9239_v50 = vcombine.high %v145_v45, %v153_v46  ;;  %v9238_v57 = vcombine.low %v145_v45, %v153_v46 }
 0x356   :  { %v11110_v13 = vadd.f32 %v7096_v0, %v7056_v63  ;;  %7350 = vmatpush1.bf16.msra.mxu0 %v9302_v56  ;;  %v409_v22 = vld [vmem:[#allocation2 + $0x970] sm:$0xff] }
 0x357   :  { %v7098_v14 = vpop.f32.mrf.mxu1  ;;  %v7058_v17 = vpop.f32.mrf.mxu0  ;;  %7351 = vmatprep.subr.bf16.mxu0 %v9287_v62  ;;  %v9495_v51 = vcombine.high %v401_v2, %v409_v22  ;;  %v137_v55 = vld [vmem:[#allocation2 + $0xf0] sm:$0xff] }
 0x358   :  { %7391 = vmatpush1.bf16.msra.mxu1 %v9558_v61  ;;  %v385_v5 = vld [vmem:[#allocation2 + $0x8b0] sm:$0xff]  ;;  %v9494_v61 = vcombine.low %v401_v2, %v409_v22  ;;  %v9223_v62 = vcombine.high %v129_v52, %v137_v55  ;;  %v9222_v6 = vcombine.low %v129_v52, %v137_v55  ;;  %v9463_v14 = vcombine.high %v369_v3, %v377_v4 }
 0x359   :  { %v7099_v26 = vpop.f32.mrf.mxu1  ;;  %7392 = vmatprep.subr.bf16.mxu1 %v9543_v1  ;;  %v393_v56 = vld [vmem:[#allocation2 + $0x8f0] sm:$0xff] }
 0x35a   :  { %7352 = vmatpush1.bf16.msra.mxu0 %v9286_v15  ;;  %v9479_v63 = vcombine.high %v385_v5, %v393_v56  ;;  %v113_v0 = vld [vmem:[#allocation2 + $0x30] sm:$0xff]  ;;  %v9478_v9 = vcombine.low %v385_v5, %v393_v56 }
 0x35b   :  { %7353 = vmatprep.subr.bf16.mxu0 %v9271_v25  ;;  %v121_v1 = vld [vmem:[#allocation2 + $0x70] sm:$0xff] }
 0x35c   :  { %7393 = vmatpush1.bf16.msra.mxu1 %v9542_v21  ;;  %v9207_v11 = vcombine.high %v113_v0, %v121_v1  ;;  %v353_v15 = vld [vmem:[#allocation2 + $0x7b0] sm:$0xff]  ;;  %v9206_v26 = vcombine.low %v113_v0, %v121_v1 }
 0x35d   :  { %7394 = vmatprep.subr.bf16.mxu1 %v9527_v27  ;;  %v361_v17 = vld [vmem:[#allocation2 + $0x7f0] sm:$0xff]  ;;  %v9462_v27 = vcombine.low %v369_v3, %v377_v4 }
 0x35e   :  { %7354 = vmatpush1.bf16.msra.mxu0 %v9270_v49  ;;  %v609_v21 = vld [vmem:[#allocation2 + $0xfb0] sm:$0xff]  ;;  %v9447_v31 = vcombine.high %v353_v15, %v361_v17 }
 0x35f   :  { %7355 = vmatprep.subr.bf16.mxu0 %v9255_v12  ;;  %v617_v25 = vld [vmem:[#allocation2 + $0xff0] sm:$0xff]  ;;  %v9446_v12 = vcombine.low %v353_v15, %v361_v17 }
 0x360   :  { %7395 = vmatpush1.bf16.msra.mxu1 %v9526_v47  ;;  %v9703_v33 = vcombine.high %v609_v21, %v617_v25  ;;  %v345_v35 = vld [vmem:[#allocation2 + $0x770] sm:$0xff] }
 0x361   :  { %7396 = vmatprep.subr.bf16.mxu1 %v9511_v41  ;;  %v593_v49 = vld [vmem:[#allocation2 + $0xf30] sm:$0xff]  ;;  %v9702_v41 = vcombine.low %v609_v21, %v617_v25  ;;  %v9431_v45 = vcombine.high %v337_v34, %v345_v35 }
 0x362   :  { %7356 = vmatpush1.bf16.msra.mxu0 %v9254_v24  ;;  %v601_v47 = vld [vmem:[#allocation2 + $0xf70] sm:$0xff] }
 0x363   :  { %7357 = vmatprep.subr.bf16.mxu0 %v9239_v50  ;;  %v9687_v46 = vcombine.high %v593_v49, %v601_v47  ;;  %v321_v2 = vld [vmem:[#allocation2 + $0x6b0] sm:$0xff]  ;;  %v9430_v50 = vcombine.low %v337_v34, %v345_v35 }
 0x364   :  { %7397 = vmatpush1.bf16.msra.mxu1 %v9510_v48  ;;  %v329_v22 = vld [vmem:[#allocation2 + $0x6f0] sm:$0xff] }
 0x365   :  { %7398 = vmatprep.subr.bf16.mxu1 %v9495_v51  ;;  %v577_v24 = vld [vmem:[#allocation2 + $0xeb0] sm:$0xff]  ;;  %v9686_v51 = vcombine.low %v593_v49, %v601_v47  ;;  %v9415_v52 = vcombine.high %v321_v2, %v329_v22 }
 0x366   :  { %7358 = vmatpush1.bf16.msra.mxu0 %v9238_v57  ;;  %v585_v48 = vld [vmem:[#allocation2 + $0xef0] sm:$0xff] }
 0x367   :  { %7359 = vmatprep.subr.bf16.mxu0 %v9223_v62  ;;  %v9671_v55 = vcombine.high %v577_v24, %v585_v48  ;;  %v305_v5 = vld [vmem:[#allocation2 + $0x630] sm:$0xff]  ;;  %v9414_v62 = vcombine.low %v321_v2, %v329_v22 }
 0x368   :  { %7399 = vmatpush1.bf16.msra.mxu1 %v9494_v61  ;;  %v313_v56 = vld [vmem:[#allocation2 + $0x670] sm:$0xff] }
 0x369   :  { %7400 = vmatprep.subr.bf16.mxu1 %v9479_v63  ;;  %v561_v57 = vld [vmem:[#allocation2 + $0xe30] sm:$0xff]  ;;  %v9670_v63 = vcombine.low %v577_v24, %v585_v48  ;;  %v9399_v0 = vcombine.high %v305_v5, %v313_v56 }
 0x36a   :  { %7360 = vmatpush1.bf16.msra.mxu0 %v9222_v6  ;;  %v569_v61 = vld [vmem:[#allocation2 + $0xe70] sm:$0xff] }
 0x36b   :  { %7361 = vmatprep.subr.bf16.mxu0 %v9207_v11  ;;  %v9655_v1 = vcombine.high %v561_v57, %v569_v61  ;;  %v289_v3 = vld [vmem:[#allocation2 + $0x5b0] sm:$0xff]  ;;  %v9398_v11 = vcombine.low %v305_v5, %v313_v56 }
 0x36c   :  { %7401 = vmatpush1.bf16.msra.mxu1 %v9478_v9  ;;  %v297_v4 = vld [vmem:[#allocation2 + $0x5f0] sm:$0xff] }
 0x36d   :  { %7402 = vmatprep.subr.bf16.mxu1 %v9463_v14  ;;  %v545_v6 = vld [vmem:[#allocation2 + $0xdb0] sm:$0xff]  ;;  %v9654_v14 = vcombine.low %v561_v57, %v569_v61  ;;  %v9383_v15 = vcombine.high %v289_v3, %v297_v4 }
 0x36e   :  { %7362 = vmatpush1.bf16.msra.mxu0 %v9206_v26  ;;  %v553_v9 = vld [vmem:[#allocation2 + $0xdf0] sm:$0xff] }
 0x36f   :  { %7363 = vmatprep.subr.bf16.mxu0 %v9447_v31  ;;  %v9639_v17 = vcombine.high %v545_v6, %v553_v9  ;;  %v273_v21 = vld [vmem:[#allocation2 + $0x530] sm:$0xff]  ;;  %v9382_v31 = vcombine.low %v289_v3, %v297_v4 }
 0x370   :  { %7403 = vmatpush1.bf16.msra.mxu1 %v9462_v27  ;;  %v281_v25 = vld [vmem:[#allocation2 + $0x570] sm:$0xff] }
 0x371   :  { %7404 = vmatprep.subr.bf16.mxu1 %v9703_v33  ;;  %v529_v26 = vld [vmem:[#allocation2 + $0xd30] sm:$0xff]  ;;  %v9638_v33 = vcombine.low %v545_v6, %v553_v9  ;;  %v9367_v34 = vcombine.high %v273_v21, %v281_v25 }
 0x372   :  { %7364 = vmatpush2.bf16.msra.mxu0 %v9446_v12  ;;  %v537_v27 = vld [vmem:[#allocation2 + $0xd70] sm:$0xff] }
 0x373   :  { %7365 = vmatprep.subr.bf16.mxu0 %v9431_v45  ;;  %v9623_v35 = vcombine.high %v529_v26, %v537_v27  ;;  %v257_v49 = vld [vmem:[#allocation2 + $0x4b0] sm:$0xff]  ;;  %v9366_v45 = vcombine.low %v273_v21, %v281_v25 }
 0x374   :  { %7405 = vmatpush2.bf16.msra.mxu1 %v9702_v41  ;;  %v265_v47 = vld [vmem:[#allocation2 + $0x4f0] sm:$0xff] }
 0x375   :  { %7406 = vmatprep.subr.bf16.mxu1 %v9687_v46  ;;  %v513_v12 = vld [vmem:[#allocation2 + $0xcb0] sm:$0xff]  ;;  %v9622_v46 = vcombine.low %v529_v26, %v537_v27  ;;  %v9351_v2 = vcombine.high %v257_v49, %v265_v47 }
 0x376   :  { %7366 = vmatpush2.bf16.msra.mxu0 %v9430_v50  ;;  %v521_v41 = vld [vmem:[#allocation2 + $0xcf0] sm:$0xff] }
 0x377   :  { %7367 = vmatprep.subr.bf16.mxu0 %v9415_v52  ;;  %v9607_v22 = vcombine.high %v513_v12, %v521_v41  ;;  %v241_v24 = vld [vmem:[#allocation2 + $0x430] sm:$0xff]  ;;  %v9350_v52 = vcombine.low %v257_v49, %v265_v47 }
 0x378   :  { %7407 = vmatpush2.bf16.msra.mxu1 %v9686_v51  ;;  %v249_v48 = vld [vmem:[#allocation2 + $0x470] sm:$0xff] }
 0x379   :  { %7408 = vmatprep.subr.bf16.mxu1 %v9671_v55  ;;  %v497_v50 = vld [vmem:[#allocation2 + $0xc30] sm:$0xff]  ;;  %v9606_v55 = vcombine.low %v513_v12, %v521_v41  ;;  %v9335_v5 = vcombine.high %v241_v24, %v249_v48 }
 0x37a   :  { %7368 = vmatpush2.bf16.msra.mxu0 %v9414_v62  ;;  %v505_v51 = vld [vmem:[#allocation2 + $0xc70] sm:$0xff] }
 0x37b   :  { %7369 = vmatprep.subr.bf16.mxu0 %v9399_v0  ;;  %v9591_v56 = vcombine.high %v497_v50, %v505_v51  ;;  %v737_v57 = vld [vmem:[#allocation2 + $0x13b0] sm:$0xff]  ;;  %v9334_v0 = vcombine.low %v241_v24, %v249_v48 }
 0x37c   :  { %7409 = vmatpush2.bf16.msra.mxu1 %v9670_v63  ;;  %v745_v61 = vld [vmem:[#allocation2 + $0x13f0] sm:$0xff] }
 0x37d   :  { %7410 = vmatprep.subr.bf16.mxu1 %v9655_v1  ;;  %v993_v62 = vld [vmem:[#allocation2 + $0x1bb0] sm:$0xff]  ;;  %v9590_v1 = vcombine.low %v497_v50, %v505_v51  ;;  %v9831_v3 = vcombine.high %v737_v57, %v745_v61 }
 0x37e   :  { %7370 = vmatpush2.bf16.msra.mxu0 %v9398_v11  ;;  %v1001_v63 = vld [vmem:[#allocation2 + $0x1bf0] sm:$0xff] }
 0x37f   :  { %7371 = vmatprep.subr.bf16.mxu0 %v9383_v15  ;;  %v10087_v4 = vcombine.high %v993_v62, %v1001_v63  ;;  %v721_v6 = vld [vmem:[#allocation2 + $0x1330] sm:$0xff]  ;;  %v9830_v15 = vcombine.low %v737_v57, %v745_v61 }
 0x380   :  { %7411 = vmatpush2.bf16.msra.mxu1 %v9654_v14  ;;  %v729_v9 = vld [vmem:[#allocation2 + $0x1370] sm:$0xff] }
 0x381   :  { %7412 = vmatprep.subr.bf16.mxu1 %v9639_v17  ;;  %v977_v11 = vld [vmem:[#allocation2 + $0x1b30] sm:$0xff]  ;;  %v10086_v17 = vcombine.low %v993_v62, %v1001_v63  ;;  %v9815_v21 = vcombine.high %v721_v6, %v729_v9  ;;  %v9814_v47 = vcombine.low %v721_v6, %v729_v9 }
 0x382   :  { %7372 = vmatpush2.bf16.msra.mxu0 %v9382_v31  ;;  %v985_v14 = vld [vmem:[#allocation2 + $0x1b70] sm:$0xff] }
 0x383   :  { %7373 = vmatprep.subr.bf16.mxu0 %v9367_v34  ;;  %v10071_v25 = vcombine.high %v977_v11, %v985_v14  ;;  %v705_v26 = vld [vmem:[#allocation2 + $0x12b0] sm:$0xff]  ;;  %v10070_v41 = vcombine.low %v977_v11, %v985_v14 }
 0x384   :  { %7413 = vmatpush2.bf16.msra.mxu1 %v9638_v33  ;;  %v713_v27 = vld [vmem:[#allocation2 + $0x12f0] sm:$0xff] }
 0x385   :  { %7414 = vmatprep.subr.bf16.mxu1 %v9623_v35  ;;  %v961_v33 = vld [vmem:[#allocation2 + $0x1ab0] sm:$0xff] }
 0x386   :  { %7374 = vmatpush2.bf16.msra.mxu0 %v9366_v45  ;;  %v969_v34 = vld [vmem:[#allocation2 + $0x1af0] sm:$0xff]  ;;  %v9799_v45 = vcombine.high %v705_v26, %v713_v27 }
 0x387   :  { %7375 = vmatprep.subr.bf16.mxu0 %v9351_v2  ;;  %v10055_v24 = vcombine.high %v961_v33, %v969_v34  ;;  %v689_v48 = vld [vmem:[#allocation2 + $0x1230] sm:$0xff] }
 0x388   :  { %7415 = vmatpush2.bf16.msra.mxu1 %v9622_v46  ;;  %v697_v50 = vld [vmem:[#allocation2 + $0x1270] sm:$0xff] }
 0x389   :  { %7416 = vmatprep.subr.bf16.mxu1 %v9607_v22  ;;  %v945_v51 = vld [vmem:[#allocation2 + $0x1a30] sm:$0xff]  ;;  %v9783_v61 = vcombine.high %v689_v48, %v697_v50  ;;  %v9782_v6 = vcombine.low %v689_v48, %v697_v50 }
 0x38a   :  { %7376 = vmatpush2.bf16.msra.mxu0 %v9350_v52  ;;  %v953_v52 = vld [vmem:[#allocation2 + $0x1a70] sm:$0xff] }
 0x38b   :  { %7377 = vmatprep.subr.bf16.mxu0 %v9335_v5  ;;  %v10039_v63 = vcombine.high %v945_v51, %v953_v52  ;;  %v10038_v9 = vcombine.low %v945_v51, %v953_v52  ;;  %v881_v48 = vld [vmem:[#allocation2 + $0x1830] sm:$0xff] }
 0x38c   :  { %7417 = vmatpush2.bf16.msra.mxu1 %v9606_v55  ;;  %v889_v50 = vld [vmem:[#allocation2 + $0x1870] sm:$0xff] }
 0x38d   :  { %7418 = vmatprep.subr.bf16.mxu1 %v9591_v56  ;;  %v9798_v56 = vcombine.low %v705_v26, %v713_v27 }
 0x38e   :  { %7378 = vmatpush2.bf16.msra.mxu0 %v9334_v0  ;;  %v673_v0 = vld [vmem:[#allocation2 + $0x11b0] sm:$0xff] }
 0x38f   :  { %7429 = vmatprep.subr.bf16.mxu0 %v9831_v3  ;;  %v929_v3 = vld [vmem:[#allocation2 + $0x19b0] sm:$0xff] }
 0x390   :  { %7419 = vmatpush2.bf16.msra.mxu1 %v9590_v1  ;;  %v681_v1 = vld [vmem:[#allocation2 + $0x11f0] sm:$0xff] }
 0x391   :  { %7470 = vmatprep.subr.bf16.mxu1 %v10087_v4  ;;  %v7135_v31 = vpop.f32.mrf.mxu0  ;;  %7380 = vmatmul.mubr.bf16.vlgmr.msra.gmra.mxu0 %v10942_v16  ;;  %v937_v4 = vld [vmem:[#allocation2 + $0x19f0] sm:$0xff]  ;;  %v9767_v11 = vcombine.high %v673_v0, %v681_v1  ;;  %v9766_v26 = vcombine.low %v673_v0, %v681_v1 }
 0x392   :  { %v7136_v35 = vadd.f32 %v7135_v31, %v11106_v10  ;;  %7430 = vmatpush1.bf16.msra.mxu0 %v9830_v15  ;;  %7461 = vmatprep.mubr.bf16.mxu0 %v10960_v54  ;;  %v10023_v14 = vcombine.high %v929_v3, %v937_v4  ;;  %v657_v15 = vld [vmem:[#allocation2 + $0x1130] sm:$0xff]  ;;  %v10022_v27 = vcombine.low %v929_v3, %v937_v4 }
 0x393   :  { %v7176_v49 = vpop.f32.mrf.mxu1  ;;  %7421 = vmatmul.mubr.bf16.vlgmr.msra.gmra.mxu1 %v10951_v20  ;;  %v7137_v12 = vpop.f32.mrf.mxu0  ;;  %7431 = vmatprep.subr.bf16.mxu0 %v9815_v21  ;;  %v913_v21 = vld [vmem:[#allocation2 + $0x1930] sm:$0xff] }
 0x394   :  { %7471 = vmatpush1.bf16.msra.mxu1 %v10086_v17  ;;  %v11115_v46 = vadd.f32 %v7176_v49, %v7136_v35  ;;  %v7138_v2 = vadd.f32 %v7137_v12, %v11110_v13  ;;  %7502 = vmatprep.mubr.bf16.mxu1 %v10965_v29  ;;  %v10054_v13 = vcombine.low %v961_v33, %v969_v34  ;;  %v665_v17 = vld [vmem:[#allocation2 + $0x1170] sm:$0xff] }
 0x395   :  { %v7178_v22 = vpop.f32.mrf.mxu1  ;;  %7472 = vmatprep.subr.bf16.mxu1 %v10071_v25  ;;  %v7139_v10 = vpop.f32.mrf.mxu0  ;;  %v921_v25 = vld [vmem:[#allocation2 + $0x1970] sm:$0xff]  ;;  %v9751_v31 = vcombine.high %v657_v15, %v665_v17  ;;  %v9750_v12 = vcombine.low %v657_v15, %v665_v17 }
 0x396   :  { %v11120_v55 = vadd.f32 %v7178_v22, %v7138_v2  ;;  %7432 = vmatpush1.bf16.msra.mxu0 %v9814_v47  ;;  %v10007_v33 = vcombine.high %v913_v21, %v921_v25  ;;  %v641_v34 = vld [vmem:[#allocation2 + $0x10b0] sm:$0xff] }
 0x397   :  { %v7180_v5 = vpop.f32.mrf.mxu1  ;;  %v7140_v57 = vpop.f32.mrf.mxu0  ;;  %7433 = vmatprep.subr.bf16.mxu0 %v9799_v45  ;;  %v649_v35 = vld [vmem:[#allocation2 + $0x10f0] sm:$0xff] }
 0x398   :  { %7473 = vmatpush1.bf16.msra.mxu1 %v10070_v41  ;;  %v897_v49 = vld [vmem:[#allocation2 + $0x18b0] sm:$0xff]  ;;  %v10006_v41 = vcombine.low %v913_v21, %v921_v25  ;;  %v9735_v45 = vcombine.high %v641_v34, %v649_v35  ;;  %v9734_v10 = vcombine.low %v641_v34, %v649_v35  ;;  %v9975_v5 = vcombine.high %v881_v48, %v889_v50 }
 0x399   :  { %v7181_v62 = vpop.f32.mrf.mxu1  ;;  %7474 = vmatprep.subr.bf16.mxu1 %v10055_v24  ;;  %v905_v47 = vld [vmem:[#allocation2 + $0x18f0] sm:$0xff] }
 0x39a   :  { %7434 = vmatpush1.bf16.msra.mxu0 %v9798_v56  ;;  %v9991_v2 = vcombine.high %v897_v49, %v905_v47  ;;  %v625_v22 = vld [vmem:[#allocation2 + $0x1030] sm:$0xff]  ;;  %v9990_v51 = vcombine.low %v897_v49, %v905_v47 }
 0x39b   :  { %7435 = vmatprep.subr.bf16.mxu0 %v9783_v61  ;;  %v633_v24 = vld [vmem:[#allocation2 + $0x1070] sm:$0xff] }
 0x39c   :  { %7475 = vmatpush1.bf16.msra.mxu1 %v10054_v13  ;;  %v9719_v52 = vcombine.high %v625_v22, %v633_v24  ;;  %v865_v56 = vld [vmem:[#allocation2 + $0x17b0] sm:$0xff]  ;;  %v9718_v62 = vcombine.low %v625_v22, %v633_v24 }
 0x39d   :  { %7476 = vmatprep.subr.bf16.mxu1 %v10039_v63  ;;  %v873_v57 = vld [vmem:[#allocation2 + $0x17f0] sm:$0xff]  ;;  %v9974_v63 = vcombine.low %v881_v48, %v889_v50 }
 0x39e   :  { %7436 = vmatpush1.bf16.msra.mxu0 %v9782_v6  ;;  %v1121_v13 = vld [vmem:[#allocation2 + $0x1fb0] sm:$0xff]  ;;  %v9959_v0 = vcombine.high %v865_v56, %v873_v57 }
 0x39f   :  { %7437 = vmatprep.subr.bf16.mxu0 %v9767_v11  ;;  %v1129_v61 = vld [vmem:[#allocation2 + $0x1ff0] sm:$0xff]  ;;  %v9958_v11 = vcombine.low %v865_v56, %v873_v57 }
 0x3a0   :  { %7477 = vmatpush1.bf16.msra.mxu1 %v10038_v9  ;;  %v10215_v1 = vcombine.high %v1121_v13, %v1129_v61  ;;  %v849_v3 = vld [vmem:[#allocation2 + $0x1730] sm:$0xff] }
 0x3a1   :  { %7478 = vmatprep.subr.bf16.mxu1 %v10023_v14  ;;  %v857_v4 = vld [vmem:[#allocation2 + $0x1770] sm:$0xff]  ;;  %v10214_v14 = vcombine.low %v1121_v13, %v1129_v61 }
 0x3a2   :  { %7438 = vmatpush1.bf16.msra.mxu0 %v9766_v26  ;;  %v1105_v6 = vld [vmem:[#allocation2 + $0x1f30] sm:$0xff]  ;;  %v9943_v15 = vcombine.high %v849_v3, %v857_v4 }
 0x3a3   :  { %7439 = vmatprep.subr.bf16.mxu0 %v9751_v31  ;;  %v1113_v9 = vld [vmem:[#allocation2 + $0x1f70] sm:$0xff]  ;;  %v9942_v31 = vcombine.low %v849_v3, %v857_v4 }
 0x3a4   :  { %7479 = vmatpush1.bf16.msra.mxu1 %v10022_v27  ;;  %v10199_v17 = vcombine.high %v1105_v6, %v1113_v9  ;;  %v833_v21 = vld [vmem:[#allocation2 + $0x16b0] sm:$0xff] }
 0x3a5   :  { %7480 = vmatprep.subr.bf16.mxu1 %v10007_v33  ;;  %v841_v25 = vld [vmem:[#allocation2 + $0x16f0] sm:$0xff]  ;;  %v10198_v33 = vcombine.low %v1105_v6, %v1113_v9 }
 0x3a6   :  { %7440 = vmatpush1.bf16.msra.mxu0 %v9750_v12  ;;  %v1089_v26 = vld [vmem:[#allocation2 + $0x1eb0] sm:$0xff]  ;;  %v9927_v34 = vcombine.high %v833_v21, %v841_v25 }
 0x3a7   :  { %7441 = vmatprep.subr.bf16.mxu0 %v9735_v45  ;;  %v1097_v27 = vld [vmem:[#allocation2 + $0x1ef0] sm:$0xff]  ;;  %v9926_v45 = vcombine.low %v833_v21, %v841_v25 }
 0x3a8   :  { %7481 = vmatpush1.bf16.msra.mxu1 %v10006_v41  ;;  %v10183_v35 = vcombine.high %v1089_v26, %v1097_v27  ;;  %v817_v49 = vld [vmem:[#allocation2 + $0x1630] sm:$0xff] }
 0x3a9   :  { %7482 = vmatprep.subr.bf16.mxu1 %v9991_v2  ;;  %v825_v47 = vld [vmem:[#allocation2 + $0x1670] sm:$0xff]  ;;  %v10182_v2 = vcombine.low %v1089_v26, %v1097_v27 }
 0x3aa   :  { %7442 = vmatpush1.bf16.msra.mxu0 %v9734_v10  ;;  %v1073_v12 = vld [vmem:[#allocation2 + $0x1e30] sm:$0xff]  ;;  %v9911_v22 = vcombine.high %v817_v49, %v825_v47 }
 0x3ab   :  { %7443 = vmatprep.subr.bf16.mxu0 %v9719_v52  ;;  %v1081_v41 = vld [vmem:[#allocation2 + $0x1e70] sm:$0xff]  ;;  %v9910_v52 = vcombine.low %v817_v49, %v825_v47 }
 0x3ac   :  { %7483 = vmatpush1.bf16.msra.mxu1 %v9990_v51  ;;  %v10167_v24 = vcombine.high %v1073_v12, %v1081_v41  ;;  %v801_v48 = vld [vmem:[#allocation2 + $0x15b0] sm:$0xff] }
 0x3ad   :  { %7484 = vmatprep.subr.bf16.mxu1 %v9975_v5  ;;  %v809_v50 = vld [vmem:[#allocation2 + $0x15f0] sm:$0xff]  ;;  %v10166_v5 = vcombine.low %v1073_v12, %v1081_v41  ;;  %v226_v12 = vld [vmem:[#allocation2 + $0x3b8] sm:$0xff] }
 0x3ae   :  { %7444 = vmatpush1.bf16.msra.mxu0 %v9718_v62  ;;  %v1057_v10 = vld [vmem:[#allocation2 + $0x1db0] sm:$0xff]  ;;  %v9895_v56 = vcombine.high %v801_v48, %v809_v50  ;;  %v234_v41 = vld [vmem:[#allocation2 + $0x3f8] sm:$0xff] }
 0x3af   :  { %7445 = vmatprep.subr.bf16.mxu0 %v9959_v0  ;;  %v1065_v51 = vld [vmem:[#allocation2 + $0x1df0] sm:$0xff]  ;;  %v9894_v0 = vcombine.low %v801_v48, %v809_v50  ;;  %v9321_v48 = vcombine.high %v226_v12, %v234_v41 }
 0x3b0   :  { %7485 = vmatpush1.bf16.msra.mxu1 %v9974_v63  ;;  %v10151_v57 = vcombine.high %v1057_v10, %v1065_v51  ;;  %v785_v13 = vld [vmem:[#allocation2 + $0x1530] sm:$0xff] }
 0x3b1   :  { %7486 = vmatprep.subr.bf16.mxu1 %v10215_v1  ;;  %v793_v61 = vld [vmem:[#allocation2 + $0x1570] sm:$0xff]  ;;  %v10150_v1 = vcombine.low %v1057_v10, %v1065_v51  ;;  %v210_v10 = vld [vmem:[#allocation2 + $0x338] sm:$0xff] }
 0x3b2   :  { %7446 = vmatpush2.bf16.msra.mxu0 %v9958_v11  ;;  %v1041_v62 = vld [vmem:[#allocation2 + $0x1d30] sm:$0xff]  ;;  %v9879_v3 = vcombine.high %v785_v13, %v793_v61  ;;  %v218_v51 = vld [vmem:[#allocation2 + $0x378] sm:$0xff] }
 0x3b3   :  { %7447 = vmatprep.subr.bf16.mxu0 %v9943_v15  ;;  %v1049_v63 = vld [vmem:[#allocation2 + $0x1d70] sm:$0xff]  ;;  %v9878_v15 = vcombine.low %v785_v13, %v793_v61  ;;  %v9305_v61 = vcombine.high %v210_v10, %v218_v51 }
 0x3b4   :  { %7487 = vmatpush2.bf16.msra.mxu1 %v10214_v14  ;;  %v10135_v4 = vcombine.high %v1041_v62, %v1049_v63  ;;  %v769_v6 = vld [vmem:[#allocation2 + $0x14b0] sm:$0xff] }
 0x3b5   :  { %7488 = vmatprep.subr.bf16.mxu1 %v10199_v17  ;;  %v777_v9 = vld [vmem:[#allocation2 + $0x14f0] sm:$0xff]  ;;  %v10134_v17 = vcombine.low %v1041_v62, %v1049_v63  ;;  %v1182_v62 = vrot.slane %v11096_v36, %v1149_v19 }
 0x3b6   :  { %7448 = vmatpush2.bf16.msra.mxu0 %v9942_v31  ;;  %v1025_v11 = vld [vmem:[#allocation2 + $0x1cb0] sm:$0xff]  ;;  %v9863_v21 = vcombine.high %v769_v6, %v777_v9 }
 0x3b7   :  { %7449 = vmatprep.subr.bf16.mxu0 %v9927_v34  ;;  %v1033_v14 = vld [vmem:[#allocation2 + $0x1cf0] sm:$0xff]  ;;  %v9862_v34 = vcombine.low %v769_v6, %v777_v9  ;;  %v458_v6 = vld [vmem:[#allocation2 + $0xaf8] sm:$0xff] }
 0x3b8   :  { %7489 = vmatpush2.bf16.msra.mxu1 %v10198_v33  ;;  %v10119_v25 = vcombine.high %v1025_v11, %v1033_v14  ;;  %v753_v26 = vld [vmem:[#allocation2 + $0x1430] sm:$0xff] }
 0x3b9   :  { %7490 = vmatprep.subr.bf16.mxu1 %v10183_v35  ;;  %v761_v27 = vld [vmem:[#allocation2 + $0x1470] sm:$0xff]  ;;  %v10118_v35 = vcombine.low %v1025_v11, %v1033_v14  ;;  %v9304_v11 = vcombine.low %v210_v10, %v218_v51 }
 0x3ba   :  { %7450 = vmatpush2.bf16.msra.mxu0 %v9926_v45  ;;  %v1009_v31 = vld [vmem:[#allocation2 + $0x1c30] sm:$0xff]  ;;  %v9847_v49 = vcombine.high %v753_v26, %v761_v27  ;;  %v482_v45 = vld [vmem:[#allocation2 + $0xbb8] sm:$0xff] }
 0x3bb   :  { %7451 = vmatprep.subr.bf16.mxu0 %v9911_v22  ;;  %v1017_v33 = vld [vmem:[#allocation2 + $0x1c70] sm:$0xff]  ;;  %v9846_v22 = vcombine.low %v753_v26, %v761_v27  ;;  %v178_v26 = vld [vmem:[#allocation2 + $0x238] sm:$0xff] }
 0x3bc   :  { %7491 = vmatpush2.bf16.msra.mxu1 %v10182_v2  ;;  %v10103_v47 = vcombine.high %v1009_v31, %v1017_v33  ;;  %v490_v2 = vld [vmem:[#allocation2 + $0xbf8] sm:$0xff] }
 0x3bd   :  { %7492 = vmatprep.subr.bf16.mxu1 %v10167_v24  ;;  %v10102_v24 = vcombine.low %v1009_v31, %v1017_v33  ;;  %v9577_v50 = vcombine.high %v482_v45, %v490_v2  ;;  %v9576_v13 = vcombine.low %v482_v45, %v490_v2  ;;  %v186_v27 = vld [vmem:[#allocation2 + $0x278] sm:$0xff] }
 0x3be   :  { %7452 = vmatpush2.bf16.msra.mxu0 %v9910_v52  ;;  %v466_v52 = vld [vmem:[#allocation2 + $0xb38] sm:$0xff]  ;;  %v9273_v45 = vcombine.high %v178_v26, %v186_v27  ;;  %v9272_v10 = vcombine.low %v178_v26, %v186_v27 }
 0x3bf   :  { %7453 = vmatprep.subr.bf16.mxu0 %v9895_v56  ;;  %v1178_v56 = vrot.slane %v11096_v36, %v1145_v43  ;;  %v434_v33 = vld [vmem:[#allocation2 + $0xa38] sm:$0xff] }
 0x3c0   :  { %7493 = vmatpush2.bf16.msra.mxu1 %v10166_v5  ;;  %v474_v5 = vld [vmem:[#allocation2 + $0xb78] sm:$0xff] }
 0x3c1   :  { %7494 = vmatprep.subr.bf16.mxu1 %v10151_v57  ;;  %v9320_v57 = vcombine.low %v226_v12, %v234_v41  ;;  %v9561_v63 = vcombine.high %v466_v52, %v474_v5 }
 0x3c2   :  { %7454 = vmatpush2.bf16.msra.mxu0 %v9894_v0  ;;  %v194_v0 = vld [vmem:[#allocation2 + $0x2b8] sm:$0xff] }
 0x3c3   :  { %7455 = vmatprep.subr.bf16.mxu0 %v9879_v3 }
 0x3c4   :  { %7495 = vmatpush2.bf16.msra.mxu1 %v10150_v1  ;;  %v202_v1 = vld [vmem:[#allocation2 + $0x2f8] sm:$0xff] }
 0x3c5   :  { %7496 = vmatprep.subr.bf16.mxu1 %v10135_v4  ;;  %v450_v4 = vld [vmem:[#allocation2 + $0xab8] sm:$0xff] }
 0x3c6   :  { %7456 = vmatpush2.bf16.msra.mxu0 %v9878_v15  ;;  %v9560_v15 = vcombine.low %v466_v52, %v474_v5  ;;  %v9544_v41 = vcombine.low %v450_v4, %v458_v6  ;;  %v146_v5 = vld [vmem:[#allocation2 + $0x138] sm:$0xff] }
 0x3c7   :  { %7457 = vmatprep.subr.bf16.mxu0 %v9863_v21 }
 0x3c8   :  { %7497 = vmatpush2.bf16.msra.mxu1 %v10134_v17  ;;  %v9289_v17 = vcombine.high %v194_v0, %v202_v1 }
 0x3c9   :  { %7498 = vmatprep.subr.bf16.mxu1 %v10119_v25  ;;  %v9545_v25 = vcombine.high %v450_v4, %v458_v6  ;;  %v386_v4 = vld [vmem:[#allocation2 + $0x8b8] sm:$0xff] }
 0x3ca   :  { %7458 = vmatpush2.bf16.msra.mxu0 %v9862_v34  ;;  %v442_v34 = vld [vmem:[#allocation2 + $0xa78] sm:$0xff] }
 0x3cb   :  { %7459 = vmatprep.subr.bf16.mxu0 %v9847_v49  ;;  %v394_v6 = vld [vmem:[#allocation2 + $0x8f8] sm:$0xff] }
 0x3cc   :  { %7499 = vmatpush2.bf16.msra.mxu1 %v10118_v35  ;;  %v9480_v26 = vcombine.low %v386_v4, %v394_v6 }
 0x3cd   :  { %7500 = vmatprep.subr.bf16.mxu1 %v10103_v47  ;;  %v9288_v47 = vcombine.low %v194_v0, %v202_v1  ;;  %v130_v1 = vld [vmem:[#allocation2 + $0xb8] sm:$0xff] }
 0x3ce   :  { %7460 = vmatpush2.bf16.msra.mxu0 %v9846_v22  ;;  %v9529_v22 = vcombine.high %v434_v33, %v442_v34 }
 0x3cf   :  { %7511 = vmatprep.subr.bf16.mxu0 %v9321_v48  ;;  %v418_v48 = vld [vmem:[#allocation2 + $0x9b8] sm:$0xff] }
 0x3d0   :  { %7501 = vmatpush2.bf16.msra.mxu1 %v10102_v24  ;;  %v162_v24 = vld [vmem:[#allocation2 + $0x1b8] sm:$0xff] }
 0x3d1   :  { %7552 = vmatprep.subr.bf16.mxu1 %v9577_v50  ;;  %v7217_v3 = vpop.f32.mrf.mxu0  ;;  %7462 = vmatmul.mubr.bf16.vlgmr.msra.gmra.mxu0 %v10972_v38  ;;  %v426_v50 = vld [vmem:[#allocation2 + $0x9f8] sm:$0xff] }
 0x3d2   :  { %v7218_v9 = vadd.f32 %v7217_v3, %v1178_v56  ;;  %7512 = vmatpush1.bf16.msra.mxu0 %v9320_v57  ;;  %7543 = vmatprep.mubr.bf16.mxu0 %v10932_v58  ;;  %v170_v58 = vld [vmem:[#allocation2 + $0x1f8] sm:$0xff]  ;;  %v9513_v52 = vcombine.high %v418_v48, %v426_v50 }
 0x3d3   :  { %v7258_v43 = vpop.f32.mrf.mxu1  ;;  %7503 = vmatmul.mubr.bf16.vlgmr.msra.gmra.mxu1 %v10976_v39  ;;  %v7219_v14 = vpop.f32.mrf.mxu0  ;;  %7513 = vmatprep.subr.bf16.mxu0 %v9305_v61  ;;  %v9257_v51 = vcombine.high %v162_v24, %v170_v58  ;;  %v154_v56 = vld [vmem:[#allocation2 + $0x178] sm:$0xff]  ;;  %v9256_v61 = vcombine.low %v162_v24, %v170_v58 }
 0x3d4   :  { %7553 = vmatpush1.bf16.msra.mxu1 %v9576_v13  ;;  %v11130_v19 = vadd.f32 %v7258_v43, %v7218_v9  ;;  %v7220_v36 = vadd.f32 %v7219_v14, %v1182_v62  ;;  %7584 = vmatprep.mubr.bf16.mxu1 %v10936_v59  ;;  %v9528_v59 = vcombine.low %v434_v33, %v442_v34  ;;  %v402_v57 = vld [vmem:[#allocation2 + $0x938] sm:$0xff] }
 0x3d5   :  { %v7260_v21 = vpop.f32.mrf.mxu1  ;;  %7554 = vmatprep.subr.bf16.mxu1 %v9561_v63  ;;  %v7221_v31 = vpop.f32.mrf.mxu0  ;;  %v410_v13 = vld [vmem:[#allocation2 + $0x978] sm:$0xff]  ;;  %v9512_v62 = vcombine.low %v418_v48, %v426_v50  ;;  %v9241_v63 = vcombine.high %v146_v5, %v154_v56  ;;  %v9240_v9 = vcombine.low %v146_v5, %v154_v56  ;;  %v9481_v14 = vcombine.high %v386_v4, %v394_v6 }
 0x3d6   :  { %v11134_v35 = vadd.f32 %v7260_v21, %v7220_v36  ;;  %7514 = vmatpush1.bf16.msra.mxu0 %v9304_v11  ;;  %v9497_v0 = vcombine.high %v402_v57, %v410_v13  ;;  %v138_v3 = vld [vmem:[#allocation2 + $0xf8] sm:$0xff]  ;;  %v9496_v43 = vcombine.low %v402_v57, %v410_v13 }
 0x3d7   :  { %v7262_v49 = vpop.f32.mrf.mxu1  ;;  %v7222_v12 = vpop.f32.mrf.mxu0  ;;  %7515 = vmatprep.subr.bf16.mxu0 %v9289_v17  ;;  %v9225_v11 = vcombine.high %v130_v1, %v138_v3  ;;  %v122_v17 = vld [vmem:[#allocation2 + $0x78] sm:$0xff] }
 0x3d8   :  { %7555 = vmatpush1.bf16.msra.mxu1 %v9560_v15  ;;  %v114_v15 = vld [vmem:[#allocation2 + $0x38] sm:$0xff] }
 0x3d9   :  { %v7263_v2 = vpop.f32.mrf.mxu1  ;;  %7556 = vmatprep.subr.bf16.mxu1 %v9545_v25  ;;  %v370_v36 = vld [vmem:[#allocation2 + $0x838] sm:$0xff]  ;;  %v9224_v25 = vcombine.low %v130_v1, %v138_v3  ;;  %v9209_v27 = vcombine.high %v114_v15, %v122_v17  ;;  %v9208_v12 = vcombine.low %v114_v15, %v122_v17 }
 0x3da   :  { %7516 = vmatpush1.bf16.msra.mxu0 %v9288_v47  ;;  %v378_v21 = vld [vmem:[#allocation2 + $0x878] sm:$0xff] }
 0x3db   :  { %7517 = vmatprep.subr.bf16.mxu0 %v9273_v45  ;;  %v9465_v31 = vcombine.high %v370_v36, %v378_v21  ;;  %v354_v33 = vld [vmem:[#allocation2 + $0x7b8] sm:$0xff] }
 0x3dc   :  { %7557 = vmatpush1.bf16.msra.mxu1 %v9544_v41  ;;  %v362_v34 = vld [vmem:[#allocation2 + $0x7f8] sm:$0xff]  ;;  %v9464_v41 = vcombine.low %v370_v36, %v378_v21 }
 0x3dd   :  { %7558 = vmatprep.subr.bf16.mxu1 %v9529_v22  ;;  %v610_v49 = vld [vmem:[#allocation2 + $0xfb8] sm:$0xff]  ;;  %v9449_v45 = vcombine.high %v354_v33, %v362_v34  ;;  %v9448_v50 = vcombine.low %v354_v33, %v362_v34 }
 0x3de   :  { %7518 = vmatpush1.bf16.msra.mxu0 %v9272_v10  ;;  %v618_v47 = vld [vmem:[#allocation2 + $0xff8] sm:$0xff] }
 0x3df   :  { %7519 = vmatprep.subr.bf16.mxu0 %v9257_v51  ;;  %v9705_v2 = vcombine.high %v610_v49, %v618_v47  ;;  %v338_v22 = vld [vmem:[#allocation2 + $0x738] sm:$0xff]  ;;  %v9704_v10 = vcombine.low %v610_v49, %v618_v47 }
 0x3e0   :  { %7559 = vmatpush1.bf16.msra.mxu1 %v9528_v59  ;;  %v346_v24 = vld [vmem:[#allocation2 + $0x778] sm:$0xff] }
 0x3e1   :  { %7560 = vmatprep.subr.bf16.mxu1 %v9513_v52  ;;  %v594_v58 = vld [vmem:[#allocation2 + $0xf38] sm:$0xff]  ;;  %v9433_v59 = vcombine.high %v338_v22, %v346_v24  ;;  %v9432_v13 = vcombine.low %v338_v22, %v346_v24 }
 0x3e2   :  { %7520 = vmatpush1.bf16.msra.mxu0 %v9256_v61  ;;  %v602_v48 = vld [vmem:[#allocation2 + $0xf78] sm:$0xff] }
 0x3e3   :  { %7521 = vmatprep.subr.bf16.mxu0 %v9241_v63  ;;  %v9689_v51 = vcombine.high %v594_v58, %v602_v48  ;;  %v322_v52 = vld [vmem:[#allocation2 + $0x6b8] sm:$0xff]  ;;  %v9688_v61 = vcombine.low %v594_v58, %v602_v48 }
 0x3e4   :  { %7561 = vmatpush1.bf16.msra.mxu1 %v9512_v62  ;;  %v330_v5 = vld [vmem:[#allocation2 + $0x6f8] sm:$0xff] }
 0x3e5   :  { %7562 = vmatprep.subr.bf16.mxu1 %v9497_v0  ;;  %v578_v56 = vld [vmem:[#allocation2 + $0xeb8] sm:$0xff]  ;;  %v9417_v62 = vcombine.high %v322_v52, %v330_v5  ;;  %v9416_v6 = vcombine.low %v322_v52, %v330_v5 }
 0x3e6   :  { %7522 = vmatpush1.bf16.msra.mxu0 %v9240_v9  ;;  %v586_v57 = vld [vmem:[#allocation2 + $0xef8] sm:$0xff] }
 0x3e7   :  { %7523 = vmatprep.subr.bf16.mxu0 %v9225_v11  ;;  %v9673_v63 = vcombine.high %v578_v56, %v586_v57  ;;  %v306_v0 = vld [vmem:[#allocation2 + $0x638] sm:$0xff]  ;;  %v9672_v9 = vcombine.low %v578_v56, %v586_v57 }
 0x3e8   :  { %7563 = vmatpush1.bf16.msra.mxu1 %v9496_v43  ;;  %v314_v1 = vld [vmem:[#allocation2 + $0x678] sm:$0xff] }
 0x3e9   :  { %7564 = vmatprep.subr.bf16.mxu1 %v9481_v14  ;;  %v562_v3 = vld [vmem:[#allocation2 + $0xe38] sm:$0xff]  ;;  %v9401_v43 = vcombine.high %v306_v0, %v314_v1  ;;  %v9400_v21 = vcombine.low %v306_v0, %v314_v1 }
 0x3ea   :  { %7524 = vmatpush1.bf16.msra.mxu0 %v9224_v25  ;;  %v570_v4 = vld [vmem:[#allocation2 + $0xe78] sm:$0xff] }
 0x3eb   :  { %7525 = vmatprep.subr.bf16.mxu0 %v9209_v27  ;;  %v9657_v11 = vcombine.high %v562_v3, %v570_v4  ;;  %v290_v14 = vld [vmem:[#allocation2 + $0x5b8] sm:$0xff]  ;;  %v9656_v25 = vcombine.low %v562_v3, %v570_v4 }
 0x3ec   :  { %7565 = vmatpush1.bf16.msra.mxu1 %v9480_v26  ;;  %v298_v15 = vld [vmem:[#allocation2 + $0x5f8] sm:$0xff] }
 0x3ed   :  { %7566 = vmatprep.subr.bf16.mxu1 %v9465_v31  ;;  %v546_v17 = vld [vmem:[#allocation2 + $0xdb8] sm:$0xff]  ;;  %v9385_v26 = vcombine.high %v290_v14, %v298_v15  ;;  %v9384_v47 = vcombine.low %v290_v14, %v298_v15 }
 0x3ee   :  { %7526 = vmatpush1.bf16.msra.mxu0 %v9208_v12  ;;  %v554_v36 = vld [vmem:[#allocation2 + $0xdf8] sm:$0xff] }
 0x3ef   :  { %7527 = vmatprep.subr.bf16.mxu0 %v9449_v45  ;;  %v9641_v27 = vcombine.high %v546_v17, %v554_v36  ;;  %v274_v31 = vld [vmem:[#allocation2 + $0x538] sm:$0xff]  ;;  %v9640_v12 = vcombine.low %v546_v17, %v554_v36 }
 0x3f0   :  { %7567 = vmatpush1.bf16.msra.mxu1 %v9464_v41  ;;  %v282_v33 = vld [vmem:[#allocation2 + $0x578] sm:$0xff] }
 0x3f1   :  { %7568 = vmatprep.subr.bf16.mxu1 %v9705_v2  ;;  %v530_v34 = vld [vmem:[#allocation2 + $0xd38] sm:$0xff]  ;;  %v9369_v41 = vcombine.high %v274_v31, %v282_v33  ;;  %v9368_v48 = vcombine.low %v274_v31, %v282_v33 }
 0x3f2   :  { %7528 = vmatpush2.bf16.msra.mxu0 %v9448_v50  ;;  %v538_v49 = vld [vmem:[#allocation2 + $0xd78] sm:$0xff] }
 0x3f3   :  { %7529 = vmatprep.subr.bf16.mxu0 %v9433_v59  ;;  %v9625_v45 = vcombine.high %v530_v34, %v538_v49  ;;  %v258_v2 = vld [vmem:[#allocation2 + $0x4b8] sm:$0xff]  ;;  %v9624_v50 = vcombine.low %v530_v34, %v538_v49 }
 0x3f4   :  { %7569 = vmatpush2.bf16.msra.mxu1 %v9704_v10  ;;  %v266_v22 = vld [vmem:[#allocation2 + $0x4f8] sm:$0xff] }
 0x3f5   :  { %7570 = vmatprep.subr.bf16.mxu1 %v9689_v51  ;;  %v514_v24 = vld [vmem:[#allocation2 + $0xcb8] sm:$0xff]  ;;  %v9353_v10 = vcombine.high %v258_v2, %v266_v22  ;;  %v9352_v57 = vcombine.low %v258_v2, %v266_v22 }
 0x3f6   :  { %7530 = vmatpush2.bf16.msra.mxu0 %v9432_v13  ;;  %v522_v58 = vld [vmem:[#allocation2 + $0xcf8] sm:$0xff] }
 0x3f7   :  { %7531 = vmatprep.subr.bf16.mxu0 %v9417_v62  ;;  %v9609_v59 = vcombine.high %v514_v24, %v522_v58  ;;  %v242_v51 = vld [vmem:[#allocation2 + $0x438] sm:$0xff]  ;;  %v9608_v13 = vcombine.low %v514_v24, %v522_v58 }
 0x3f8   :  { %7571 = vmatpush2.bf16.msra.mxu1 %v9688_v61  ;;  %v250_v52 = vld [vmem:[#allocation2 + $0x478] sm:$0xff] }
 0x3f9   :  { %7572 = vmatprep.subr.bf16.mxu1 %v9673_v63  ;;  %v498_v5 = vld [vmem:[#allocation2 + $0xc38] sm:$0xff]  ;;  %v9337_v61 = vcombine.high %v242_v51, %v250_v52  ;;  %v9336_v4 = vcombine.low %v242_v51, %v250_v52 }
 0x3fa   :  { %7532 = vmatpush2.bf16.msra.mxu0 %v9416_v6  ;;  %v506_v56 = vld [vmem:[#allocation2 + $0xc78] sm:$0xff] }
 0x3fb   :  { %7533 = vmatprep.subr.bf16.mxu0 %v9401_v43  ;;  %v9593_v62 = vcombine.high %v498_v5, %v506_v56  ;;  %v738_v63 = vld [vmem:[#allocation2 + $0x13b8] sm:$0xff]  ;;  %v9592_v6 = vcombine.low %v498_v5, %v506_v56 }
 0x3fc   :  { %7573 = vmatpush2.bf16.msra.mxu1 %v9672_v9  ;;  %v746_v0 = vld [vmem:[#allocation2 + $0x13f8] sm:$0xff] }
 0x3fd   :  { %7574 = vmatprep.subr.bf16.mxu1 %v9657_v11  ;;  %v994_v1 = vld [vmem:[#allocation2 + $0x1bb8] sm:$0xff]  ;;  %v9833_v9 = vcombine.high %v738_v63, %v746_v0  ;;  %v9832_v36 = vcombine.low %v738_v63, %v746_v0 }
 0x3fe   :  { %7534 = vmatpush2.bf16.msra.mxu0 %v9400_v21  ;;  %v1002_v3 = vld [vmem:[#allocation2 + $0x1bf8] sm:$0xff] }
 0x3ff   :  { %7535 = vmatprep.subr.bf16.mxu0 %v9385_v26  ;;  %v10089_v43 = vcombine.high %v994_v1, %v1002_v3  ;;  %v722_v11 = vld [vmem:[#allocation2 + $0x1338] sm:$0xff]  ;;  %v10088_v21 = vcombine.low %v994_v1, %v1002_v3 }
 0x400   :  { %7575 = vmatpush2.bf16.msra.mxu1 %v9656_v25  ;;  %v730_v14 = vld [vmem:[#allocation2 + $0x1378] sm:$0xff] }
 0x401   :  { %7576 = vmatprep.subr.bf16.mxu1 %v9641_v27  ;;  %v978_v15 = vld [vmem:[#allocation2 + $0x1b38] sm:$0xff]  ;;  %v9817_v25 = vcombine.high %v722_v11, %v730_v14 }
 0x402   :  { %7536 = vmatpush2.bf16.msra.mxu0 %v9384_v47  ;;  %v986_v17 = vld [vmem:[#allocation2 + $0x1b78] sm:$0xff] }
 0x403   :  { %7537 = vmatprep.subr.bf16.mxu0 %v9369_v41  ;;  %v10073_v26 = vcombine.high %v978_v15, %v986_v17  ;;  %v706_v27 = vld [vmem:[#allocation2 + $0x12b8] sm:$0xff]  ;;  %v9816_v41 = vcombine.low %v722_v11, %v730_v14  ;;  %v10072_v2 = vcombine.low %v978_v15, %v986_v17 }
 0x404   :  { %7577 = vmatpush2.bf16.msra.mxu1 %v9640_v12  ;;  %v714_v31 = vld [vmem:[#allocation2 + $0x12f8] sm:$0xff] }
 0x405   :  { %7578 = vmatprep.subr.bf16.mxu1 %v9625_v45  ;;  %v962_v34 = vld [vmem:[#allocation2 + $0x1ab8] sm:$0xff]  ;;  %v9801_v22 = vcombine.high %v706_v27, %v714_v31  ;;  %v9800_v5 = vcombine.low %v706_v27, %v714_v31 }
 0x406   :  { %7538 = vmatpush2.bf16.msra.mxu0 %v9368_v48  ;;  %v970_v49 = vld [vmem:[#allocation2 + $0x1af8] sm:$0xff] }
 0x407   :  { %7539 = vmatprep.subr.bf16.mxu0 %v9353_v10  ;;  %v698_v10 = vld [vmem:[#allocation2 + $0x1278] sm:$0xff] }
 0x408   :  { %7579 = vmatpush2.bf16.msra.mxu1 %v9624_v50  ;;  %v690_v50 = vld [vmem:[#allocation2 + $0x1238] sm:$0xff] }
 0x409   :  { %7580 = vmatprep.subr.bf16.mxu1 %v9609_v59  ;;  %v954_v59 = vld [vmem:[#allocation2 + $0x1a78] sm:$0xff]  ;;  %v9784_v1 = vcombine.low %v690_v50, %v698_v10 }
 0x40a   :  { %7540 = vmatpush2.bf16.msra.mxu0 %v9352_v57  ;;  %v9785_v57 = vcombine.high %v690_v50, %v698_v10  ;;  %v930_v63 = vld [vmem:[#allocation2 + $0x19b8] sm:$0xff] }
 0x40b   :  { %7541 = vmatprep.subr.bf16.mxu0 %v9337_v61  ;;  %v938_v0 = vld [vmem:[#allocation2 + $0x19f8] sm:$0xff] }
 0x40c   :  { %7581 = vmatpush2.bf16.msra.mxu1 %v9608_v13  ;;  %v922_v11 = vld [vmem:[#allocation2 + $0x1978] sm:$0xff]  ;;  %v10024_v15 = vcombine.low %v930_v63, %v938_v0 }
 0x40d   :  { %7582 = vmatprep.subr.bf16.mxu1 %v9593_v62  ;;  %v674_v62 = vld [vmem:[#allocation2 + $0x11b8] sm:$0xff] }
 0x40e   :  { %7542 = vmatpush2.bf16.msra.mxu0 %v9336_v4  ;;  %v10025_v4 = vcombine.high %v930_v63, %v938_v0  ;;  %v906_v27 = vld [vmem:[#allocation2 + $0x18f8] sm:$0xff] }
 0x40f   :  { %7593 = vmatprep.subr.bf16.mxu0 %v9833_v9  ;;  %v666_v9 = vld [vmem:[#allocation2 + $0x1178] sm:$0xff] }
 0x410   :  { %7583 = vmatpush2.bf16.msra.mxu1 %v9592_v6  ;;  %v658_v6 = vld [vmem:[#allocation2 + $0x1138] sm:$0xff] }
 0x411   :  { %7634 = vmatprep.subr.bf16.mxu1 %v10089_v43  ;;  %v7299_v33 = vpop.f32.mrf.mxu0  ;;  %7544 = vmatmul.mubr.bf16.vlgmr.msra.gmra.mxu0 %v10942_v16  ;;  %v10057_v16 = vcombine.high %v962_v34, %v970_v49  ;;  %v914_v43 = vld [vmem:[#allocation2 + $0x1938] sm:$0xff]  ;;  %v9753_v17 = vcombine.high %v658_v6, %v666_v9  ;;  %v9752_v31 = vcombine.low %v658_v6, %v666_v9 }
 0x412   :  { %v7300_v47 = vadd.f32 %v7299_v33, %v11130_v19  ;;  %7594 = vmatpush1.bf16.msra.mxu0 %v9832_v36  ;;  %7625 = vmatprep.mubr.bf16.mxu0 %v10960_v54  ;;  %v682_v54 = vld [vmem:[#allocation2 + $0x11f8] sm:$0xff]  ;;  %v10009_v36 = vcombine.high %v914_v43, %v922_v11  ;;  %v10008_v33 = vcombine.low %v914_v43, %v922_v11 }
 0x413   :  { %v7340_v12 = vpop.f32.mrf.mxu1  ;;  %7585 = vmatmul.mubr.bf16.vlgmr.msra.gmra.mxu1 %v10951_v20  ;;  %v7301_v45 = vpop.f32.mrf.mxu0  ;;  %7595 = vmatprep.subr.bf16.mxu0 %v9817_v25  ;;  %v946_v20 = vld [vmem:[#allocation2 + $0x1a38] sm:$0xff]  ;;  %v9769_v3 = vcombine.high %v674_v62, %v682_v54  ;;  %v9768_v14 = vcombine.low %v674_v62, %v682_v54 }
 0x414   :  { %7635 = vmatpush1.bf16.msra.mxu1 %v10088_v21  ;;  %v11139_v24 = vadd.f32 %v7340_v12, %v7300_v47  ;;  %v7302_v58 = vadd.f32 %v7301_v45, %v11134_v35  ;;  %7666 = vmatprep.mubr.bf16.mxu1 %v10965_v29  ;;  %v10056_v35 = vcombine.low %v962_v34, %v970_v49  ;;  %v642_v21 = vld [vmem:[#allocation2 + $0x10b8] sm:$0xff] }
 0x415   :  { %v7342_v48 = vpop.f32.mrf.mxu1  ;;  %7636 = vmatprep.subr.bf16.mxu1 %v10073_v26  ;;  %v7303_v19 = vpop.f32.mrf.mxu0  ;;  %v10041_v61 = vcombine.high %v946_v20, %v954_v59  ;;  %v10040_v29 = vcombine.low %v946_v20, %v954_v59  ;;  %v650_v25 = vld [vmem:[#allocation2 + $0x10f8] sm:$0xff] }
 0x416   :  { %v11144_v51 = vadd.f32 %v7342_v48, %v7302_v58  ;;  %7596 = vmatpush1.bf16.msra.mxu0 %v9816_v41  ;;  %v898_v26 = vld [vmem:[#allocation2 + $0x18b8] sm:$0xff]  ;;  %v9737_v34 = vcombine.high %v642_v21, %v650_v25 }
 0x417   :  { %v7344_v52 = vpop.f32.mrf.mxu1  ;;  %v7304_v56 = vpop.f32.mrf.mxu0  ;;  %7597 = vmatprep.subr.bf16.mxu0 %v9801_v22  ;;  %v9993_v49 = vcombine.high %v898_v26, %v906_v27  ;;  %v626_v47 = vld [vmem:[#allocation2 + $0x1038] sm:$0xff]  ;;  %v9992_v22 = vcombine.low %v898_v26, %v906_v27 }
 0x418   :  { %7637 = vmatpush1.bf16.msra.mxu1 %v10072_v2  ;;  %v634_v12 = vld [vmem:[#allocation2 + $0x1078] sm:$0xff]  ;;  %v9736_v2 = vcombine.low %v642_v21, %v650_v25 }
 0x419   :  { %v7345_v13 = vpop.f32.mrf.mxu1  ;;  %7638 = vmatprep.subr.bf16.mxu1 %v10057_v16  ;;  %v882_v41 = vld [vmem:[#allocation2 + $0x1838] sm:$0xff]  ;;  %v9721_v58 = vcombine.high %v626_v47, %v634_v12  ;;  %v9720_v20 = vcombine.low %v626_v47, %v634_v12 }
 0x41a   :  { %7598 = vmatpush1.bf16.msra.mxu0 %v9800_v5  ;;  %v890_v45 = vld [vmem:[#allocation2 + $0x1878] sm:$0xff] }
 0x41b   :  { %7599 = vmatprep.subr.bf16.mxu0 %v9785_v57  ;;  %v9977_v48 = vcombine.high %v882_v41, %v890_v45  ;;  %v866_v16 = vld [vmem:[#allocation2 + $0x17b8] sm:$0xff]  ;;  %v9976_v59 = vcombine.low %v882_v41, %v890_v45 }
 0x41c   :  { %7639 = vmatpush1.bf16.msra.mxu1 %v10056_v35  ;;  %v874_v50 = vld [vmem:[#allocation2 + $0x17f8] sm:$0xff] }
 0x41d   :  { %7640 = vmatprep.subr.bf16.mxu1 %v10041_v61  ;;  %v1122_v10 = vld [vmem:[#allocation2 + $0x1fb8] sm:$0xff]  ;;  %v9961_v52 = vcombine.high %v866_v16, %v874_v50  ;;  %v9960_v61 = vcombine.low %v866_v16, %v874_v50 }
 0x41e   :  { %7600 = vmatpush1.bf16.msra.mxu0 %v9784_v1  ;;  %v1130_v19 = vld [vmem:[#allocation2 + $0x1ff8] sm:$0xff] }
 0x41f   :  { %7601 = vmatprep.subr.bf16.mxu0 %v9769_v3  ;;  %v10217_v5 = vcombine.high %v1122_v10, %v1130_v19  ;;  %v850_v56 = vld [vmem:[#allocation2 + $0x1738] sm:$0xff]  ;;  %v10216_v62 = vcombine.low %v1122_v10, %v1130_v19 }
 0x420   :  { %7641 = vmatpush1.bf16.msra.mxu1 %v10040_v29  ;;  %v858_v35 = vld [vmem:[#allocation2 + $0x1778] sm:$0xff] }
 0x421   :  { %7642 = vmatprep.subr.bf16.mxu1 %v10025_v4  ;;  %v1106_v57 = vld [vmem:[#allocation2 + $0x1f38] sm:$0xff]  ;;  %v9945_v54 = vcombine.high %v850_v56, %v858_v35  ;;  %v9944_v4 = vcombine.low %v850_v56, %v858_v35 }
 0x422   :  { %7602 = vmatpush1.bf16.msra.mxu0 %v9768_v14  ;;  %v1114_v13 = vld [vmem:[#allocation2 + $0x1f78] sm:$0xff] }
 0x423   :  { %7603 = vmatprep.subr.bf16.mxu0 %v9753_v17  ;;  %v10201_v63 = vcombine.high %v1106_v57, %v1114_v13  ;;  %v834_v0 = vld [vmem:[#allocation2 + $0x16b8] sm:$0xff]  ;;  %v10200_v6 = vcombine.low %v1106_v57, %v1114_v13 }
 0x424   :  { %7643 = vmatpush1.bf16.msra.mxu1 %v10024_v15  ;;  %v842_v1 = vld [vmem:[#allocation2 + $0x16f8] sm:$0xff] }
 0x425   :  { %7644 = vmatprep.subr.bf16.mxu1 %v10009_v36  ;;  %v1090_v29 = vld [vmem:[#allocation2 + $0x1eb8] sm:$0xff]  ;;  %v9929_v9 = vcombine.high %v834_v0, %v842_v1  ;;  %v9928_v36 = vcombine.low %v834_v0, %v842_v1 }
 0x426   :  { %7604 = vmatpush1.bf16.msra.mxu0 %v9752_v31  ;;  %v1098_v3 = vld [vmem:[#allocation2 + $0x1ef8] sm:$0xff] }
 0x427   :  { %7605 = vmatprep.subr.bf16.mxu0 %v9737_v34  ;;  %v10185_v43 = vcombine.high %v1090_v29, %v1098_v3  ;;  %v818_v11 = vld [vmem:[#allocation2 + $0x1638] sm:$0xff]  ;;  %v10184_v21 = vcombine.low %v1090_v29, %v1098_v3 }
 0x428   :  { %7645 = vmatpush1.bf16.msra.mxu1 %v10008_v33  ;;  %v826_v14 = vld [vmem:[#allocation2 + $0x1678] sm:$0xff] }
 0x429   :  { %7646 = vmatprep.subr.bf16.mxu1 %v9993_v49  ;;  %v1074_v15 = vld [vmem:[#allocation2 + $0x1e38] sm:$0xff]  ;;  %v9913_v25 = vcombine.high %v818_v11, %v826_v14  ;;  %v9912_v49 = vcombine.low %v818_v11, %v826_v14  ;;  %v7678_v11 = vmax.f32 %v11040_v18, 0.0  ;;  %v11148_v14 = vld [vmem:[#allocation4 + $0x8] sm:$0xff]  ;;  %v10586_v18 = vld [vmem:[#allocation6 + $0xf0] sm:$0xff]  }
 0x42a   :  { %7606 = vmatpush1.bf16.msra.mxu0 %v9736_v2  ;;  %v1082_v17 = vld [vmem:[#allocation2 + $0x1e78] sm:$0xff] }
 0x42b   :  { %7607 = vmatprep.subr.bf16.mxu0 %v9721_v58  ;;  %v10169_v26 = vcombine.high %v1074_v15, %v1082_v17  ;;  %v802_v27 = vld [vmem:[#allocation2 + $0x15b8] sm:$0xff]  ;;  %v10168_v47 = vcombine.low %v1074_v15, %v1082_v17  ;;  %v1186_v15 = vrot.slane %v11148_v14, %v1153_v37  ;;  %v10583_v17 = vld [vmem:[#allocation6 + $0x38] sm:$0xff]   ;;  %v10587_v37 = vld [vmem:[#allocation6 + $0x30] sm:$0xff]  }
 0x42c   :  { %7647 = vmatpush1.bf16.msra.mxu1 %v9992_v22  ;;  %v810_v31 = vld [vmem:[#allocation2 + $0x15f8] sm:$0xff] }
 0x42d   :  { %7648 = vmatprep.subr.bf16.mxu1 %v9977_v48  ;;  %v1058_v33 = vld [vmem:[#allocation2 + $0x1db8] sm:$0xff]  ;;  %v9897_v12 = vcombine.high %v802_v27, %v810_v31  ;;  %v9896_v48 = vcombine.low %v802_v27, %v810_v31  ;;  %v7694_v27 = vpack.c.bf16 %v7678_v11, %v7678_v11  ;;  %v10614_v11 = vld [vmem:[#allocation6 + $0x1f8] sm:$0xff]  }
 0x42e   :  { %7608 = vmatpush1.bf16.msra.mxu0 %v9720_v20  ;;  %v1066_v34 = vld [vmem:[#allocation2 + $0x1df8] sm:$0xff] }
 0x42f   :  { %7609 = vmatprep.subr.bf16.mxu0 %v9961_v52  ;;  %v10153_v41 = vcombine.high %v1058_v33, %v1066_v34  ;;  %v786_v45 = vld [vmem:[#allocation2 + $0x1538] sm:$0xff]  ;;  %v10152_v16 = vcombine.low %v1058_v33, %v1066_v34 }
 0x430   :  { %7649 = vmatpush1.bf16.msra.mxu1 %v9976_v59  ;;  %v794_v2 = vld [vmem:[#allocation2 + $0x1578] sm:$0xff] }
 0x431   :  { %7650 = vmatprep.subr.bf16.mxu1 %v10217_v5  ;;  %v1042_v22 = vld [vmem:[#allocation2 + $0x1d38] sm:$0xff]  ;;  %v9881_v50 = vcombine.high %v786_v45, %v794_v2  ;;  %v9880_v5 = vcombine.low %v786_v45, %v794_v2 }
 0x432   :  { %7610 = vmatpush2.bf16.msra.mxu0 %v9960_v61  ;;  %v1050_v58 = vld [vmem:[#allocation2 + $0x1d78] sm:$0xff] }
 0x433   :  { %7611 = vmatprep.subr.bf16.mxu0 %v9945_v54  ;;  %v10137_v10 = vcombine.high %v1042_v22, %v1050_v58  ;;  %v770_v19 = vld [vmem:[#allocation2 + $0x14b8] sm:$0xff]  ;;  %v10136_v56 = vcombine.low %v1042_v22, %v1050_v58 }
 0x434   :  { %7651 = vmatpush2.bf16.msra.mxu1 %v10216_v62  ;;  %v778_v20 = vld [vmem:[#allocation2 + $0x14f8] sm:$0xff] }
 0x435   :  { %7652 = vmatprep.subr.bf16.mxu1 %v10201_v63  ;;  %v1026_v59 = vld [vmem:[#allocation2 + $0x1cb8] sm:$0xff]  ;;  %v9865_v35 = vcombine.high %v770_v19, %v778_v20  ;;  %v9864_v63 = vcombine.low %v770_v19, %v778_v20  ;;  %v10595_v19 = vld [vmem:[#allocation6 + $0x20] sm:$0xff]  }
 0x436   :  { %7612 = vmatpush2.bf16.msra.mxu0 %v9944_v4  ;;  %v1034_v52 = vld [vmem:[#allocation2 + $0x1cf8] sm:$0xff]  ;;  %v10596_v20 = vld [vmem:[#allocation6 + $0xa0] sm:$0xff]  }
 0x437   :  { %7613 = vmatprep.subr.bf16.mxu0 %v9929_v9  ;;  %v10121_v57 = vcombine.high %v1026_v59, %v1034_v52  ;;  %v754_v13 = vld [vmem:[#allocation2 + $0x1438] sm:$0xff]  ;;  %v10120_v0 = vcombine.low %v1026_v59, %v1034_v52  ;;  %v10582_v9 = vld [vmem:[#allocation6 + $0xf8] sm:$0xff]  }
 0x438   :  { %7653 = vmatpush2.bf16.msra.mxu1 %v10200_v6  ;;  %v762_v61 = vld [vmem:[#allocation2 + $0x1478] sm:$0xff]  ;;  %v10581_v6 = vld [vmem:[#allocation6 + $0x78] sm:$0xff]  }
 0x439   :  { %7654 = vmatprep.subr.bf16.mxu1 %v10185_v43  ;;  %v1010_v62 = vld [vmem:[#allocation2 + $0x1c38] sm:$0xff]  ;;  %v9849_v1 = vcombine.high %v754_v13, %v762_v61  ;;  %v9848_v3 = vcombine.low %v754_v13, %v762_v61  ;;  %v7676_v43 = vmax.f32 %v11014_v32, 0.0  ;;  %v10597_v59 = vld [vmem:[#allocation6 + $0x58] sm:$0xff]   ;;  %v10603_v13 = vld [vmem:[#allocation6 + $0x10] sm:$0xff]  }
 0x43a   :  { %7614 = vmatpush2.bf16.msra.mxu0 %v9928_v36  ;;  %v1018_v54 = vld [vmem:[#allocation2 + $0x1c78] sm:$0xff]  ;;  %v10584_v36 = vld [vmem:[#allocation6 + $0xb8] sm:$0xff]   ;;  %v10604_v61 = vld [vmem:[#allocation6 + $0x90] sm:$0xff]  }
 0x43b   :  { %7615 = vmatprep.subr.bf16.mxu0 %v9913_v25  ;;  %v10105_v29 = vcombine.high %v1010_v62, %v1018_v54  ;;  %v10104_v4 = vcombine.low %v1010_v62, %v1018_v54  ;;  %v10585_v25 = vld [vmem:[#allocation6 + $0x70] sm:$0xff]   ;;  %v7692_v32 = vpack.c.bf16 %v7676_v43, %v7676_v43  ;;  %v10598_v52 = vld [vmem:[#allocation6 + $0xd8] sm:$0xff]   ;;  %v10605_v62 = vld [vmem:[#allocation6 + $0x48] sm:$0xff]   ;;  %v7677_v43 = vmax.f32 %v11035_v8, 0.0 }
 0x43c   :  { %7655 = vmatpush2.bf16.msra.mxu1 %v10184_v21  ;;  %v1190_v21 = vrot.slane %v11148_v14, %v1157_v44  ;;  %v10606_v54 = vld [vmem:[#allocation6 + $0xc8] sm:$0xff]   ;;  %v10619_v8 = vld [vmem:[#allocation6 + $0x130] sm:$0xff]  }
 0x43d   :  { %7656 = vmatprep.subr.bf16.mxu1 %v10169_v26 }
 0x43e   :  { %7616 = vmatpush2.bf16.msra.mxu0 %v9912_v49  ;;  %v10588_v49 = vld [vmem:[#allocation6 + $0xb0] sm:$0xff]  }
 0x43f   :  { %7617 = vmatprep.subr.bf16.mxu0 %v9897_v12 }
 0x440   :  { %7657 = vmatpush2.bf16.msra.mxu1 %v10168_v47  ;;  %v10589_v47 = vld [vmem:[#allocation6 + $0x68] sm:$0xff]  }
 0x441   :  { %7658 = vmatprep.subr.bf16.mxu1 %v10153_v41 }
 0x442   :  { %7618 = vmatpush2.bf16.msra.mxu0 %v9896_v48  ;;  %v10592_v48 = vld [vmem:[#allocation6 + $0xa8] sm:$0xff]  }
 0x443   :  { %7619 = vmatprep.subr.bf16.mxu0 %v9881_v50 }
 0x444   :  { %7659 = vmatpush2.bf16.msra.mxu1 %v10152_v16  ;;  %v10593_v16 = vld [vmem:[#allocation6 + $0x60] sm:$0xff]  }
 0x445   :  { %7660 = vmatprep.subr.bf16.mxu1 %v10137_v10  ;;  %v10594_v10 = vld [vmem:[#allocation6 + $0xe0] sm:$0xff]  }
 0x446   :  { %7620 = vmatpush2.bf16.msra.mxu0 %v9880_v5  ;;  %v10599_v5 = vld [vmem:[#allocation6 + $0x18] sm:$0xff]  }
 0x447   :  { %7621 = vmatprep.subr.bf16.mxu0 %v9865_v35  ;;  %v10601_v35 = vld [vmem:[#allocation6 + $0x50] sm:$0xff]  }
 0x448   :  { %7661 = vmatpush2.bf16.msra.mxu1 %v10136_v56  ;;  %v10600_v56 = vld [vmem:[#allocation6 + $0x98] sm:$0xff]  }
 0x449   :  { %7662 = vmatprep.subr.bf16.mxu1 %v10121_v57  ;;  %v10602_v57 = vld [vmem:[#allocation6 + $0xd0] sm:$0xff]  }
 0x44a   :  { %7622 = vmatpush2.bf16.msra.mxu0 %v9864_v63  ;;  %v10607_v63 = vld [vmem:[#allocation6 + $0x8] sm:$0xff]  }
 0x44b   :  { %7623 = vmatprep.subr.bf16.mxu0 %v9849_v1  ;;  %v10609_v1 = vld [vmem:[#allocation6 + $0x40] sm:$0xff]  }
 0x44c   :  { %7663 = vmatpush2.bf16.msra.mxu1 %v10120_v0  ;;  %v10608_v0 = vld [vmem:[#allocation6 + $0x88] sm:$0xff]  }
 0x44d   :  { %7664 = vmatprep.subr.bf16.mxu1 %v10105_v29  ;;  %v10610_v29 = vld [vmem:[#allocation6 + $0xc0] sm:$0xff]  }
 0x44e   :  { %7624 = vmatpush2.bf16.msra.mxu0 %v9848_v3  ;;  %v10611_v3 = vld [vmem:[#allocation6] sm:$0xff]  }
 0x44f   :  { %10357 = vmatprep.subr.bf16.mxu0 %v10581_v6  ;;  %v10612_v6 = vld [vmem:[#allocation6 + $0x80] sm:$0xff]  }
 0x450   :  { %7665 = vmatpush2.bf16.msra.mxu1 %v10104_v4  ;;  %v7675_v4 = vmax.f32 %v11009_v23, 0.0  ;;  %v10617_v23 = vld [vmem:[#allocation6 + $0x170] sm:$0xff]  }
 0x451   :  { %10379 = vmatprep.subr.bf16.mxu1 %v10582_v9  ;;  %v7381_v26 = vpop.f32.mrf.mxu0  ;;  %7626 = vmatmul.mubr.bf16.vlgmr.msra.gmra.mxu0 %v10972_v38  ;;  %v10590_v38 = vld [vmem:[#allocation6 + $0xe8] sm:$0xff]   ;;  %v10613_v9 = vld [vmem:[#allocation6 + $0x178] sm:$0xff]  }
 0x452   :  { %v7382_v31 = vadd.f32 %v7381_v26, %v1186_v15  ;;  %10358 = vmatpush3.bf16.msra.mxu0 %v10583_v17  ;;  %8770 = vmatprep.mubr.bf16.mxu0 %v7692_v32  ;;  %v7680_v15 = vmax.f32 %v11068_v42, 0.0  ;;  %v7682_v17 = vmax.f32 %v11094_v40, 0.0  ;;  %v7693_v32 = vpack.c.bf16 %v7677_v43, %v7677_v43  ;;  %v10620_v42 = vld [vmem:[#allocation6 + $0x1b0] sm:$0xff]   ;;  %v10621_v40 = vld [vmem:[#allocation6 + $0x168] sm:$0xff]  }
 0x453   :  { %v7422_v33 = vpop.f32.mrf.mxu1  ;;  %7667 = vmatmul.mubr.bf16.vlgmr.msra.gmra.mxu1 %v10976_v39  ;;  %v7383_v34 = vpop.f32.mrf.mxu0  ;;  %10359 = vmatprep.subr.bf16.mxu0 %v10585_v25  ;;  %v10591_v39 = vld [vmem:[#allocation6 + $0x28] sm:$0xff]   ;;  %v10616_v25 = vld [vmem:[#allocation6 + $0x1b8] sm:$0xff]   ;;  %v10652_v43 = vld [vmem:[#allocation6 + $0x2b0] sm:$0xff]  }
 0x454   :  { %10380 = vmatpush3.bf16.msra.mxu1 %v10584_v36  ;;  %v11158_v12 = vadd.f32 %v7422_v33, %v7382_v31  ;;  %8810 = vmatprep.mubr.bf16.mxu1 %v7694_v27  ;;  %v7384_v44 = vadd.f32 %v7383_v34, %v1190_v21  ;;  %v10615_v36 = vld [vmem:[#allocation6 + $0x138] sm:$0xff]   ;;  %v7691_v21 = vpack.c.bf16 %v7675_v4, %v7675_v4  ;;  %v10622_v31 = vld [vmem:[#allocation6 + $0x1e8] sm:$0xff]   ;;  %v10625_v34 = vld [vmem:[#allocation6 + $0x160] sm:$0xff]  }
 0x455   :  { %v7424_v41 = vpop.f32.mrf.mxu1  ;;  %v7385_v45 = vpop.f32.mrf.mxu0  ;;  %10381 = vmatprep.subr.bf16.mxu1 %v10586_v18  ;;  %v7696_v26 = vpack.c.bf16 %v7680_v15, %v7680_v15  ;;  %v10618_v18 = vld [vmem:[#allocation6 + $0x1f0] sm:$0xff]   ;;  %v7698_v27 = vpack.c.bf16 %v7682_v17, %v7682_v17  ;;  %v10623_v33 = vld [vmem:[#allocation6 + $0x128] sm:$0xff]  }
 0x456   :  { %v11160_v2 = vadd.f32 %v7424_v41, %v7384_v44  ;;  %10360 = vmatpush3.bf16.msra.mxu0 %v10587_v37  ;;  %v10624_v37 = vld [vmem:[#allocation6 + $0x1a8] sm:$0xff]   ;;  %v10628_v44 = vld [vmem:[#allocation6 + $0x1a0] sm:$0xff]   ;;  %v10629_v41 = vld [vmem:[#allocation6 + $0x158] sm:$0xff]  }
 0x457   :  { %v7426_v22 = vpop.f32.mrf.mxu1  ;;  %v7386_v58 = vpop.f32.mrf.mxu0  ;;  %10361 = vmatprep.subr.bf16.mxu0 %v10589_v47  ;;  %v10627_v47 = vld [vmem:[#allocation6 + $0x120] sm:$0xff]   ;;  %v10631_v45 = vld [vmem:[#allocation6 + $0x118] sm:$0xff]   ;;  %v10654_v17 = vld [vmem:[#allocation6 + $0x2e8] sm:$0xff]  }
 0x458   :  { %10382 = vmatpush3.bf16.msra.mxu1 %v10588_v49  ;;  %v10626_v49 = vld [vmem:[#allocation6 + $0x1e0] sm:$0xff]   ;;  %v10632_v22 = vld [vmem:[#allocation6 + $0x198] sm:$0xff]   ;;  %v10634_v58 = vld [vmem:[#allocation6 + $0x1d0] sm:$0xff]  }
 0x459   :  { %v7427_v50 = vpop.f32.mrf.mxu1  ;;  %10383 = vmatprep.subr.bf16.mxu1 %v10590_v38  ;;  %v10630_v38 = vld [vmem:[#allocation6 + $0x1d8] sm:$0xff]  }
 0x45a   :  { %10362 = vmatpush3.bf16.msra.mxu0 %v10591_v39  ;;  %v10633_v39 = vld [vmem:[#allocation6 + $0x150] sm:$0xff]   ;;  %v10637_v50 = vld [vmem:[#allocation6 + $0x148] sm:$0xff]  }
 0x45b   :  { %10363 = vmatprep.subr.bf16.mxu0 %v10593_v16  ;;  %v10636_v16 = vld [vmem:[#allocation6 + $0x190] sm:$0xff]  }
 0x45c   :  { %10384 = vmatpush3.bf16.msra.mxu1 %v10592_v48  ;;  %v10635_v48 = vld [vmem:[#allocation6 + $0x110] sm:$0xff]  }
 0x45d   :  { %10385 = vmatprep.subr.bf16.mxu1 %v10594_v10  ;;  %v10638_v10 = vld [vmem:[#allocation6 + $0x1c8] sm:$0xff]  }
 0x45e   :  { %10364 = vmatpush3.bf16.msra.mxu0 %v10595_v19  ;;  %v10639_v19 = vld [vmem:[#allocation6 + $0x108] sm:$0xff]  }
 0x45f   :  { %10365 = vmatprep.subr.bf16.mxu0 %v10597_v59  ;;  %v10641_v59 = vld [vmem:[#allocation6 + $0x140] sm:$0xff]  }
 0x460   :  { %10386 = vmatpush3.bf16.msra.mxu1 %v10596_v20  ;;  %v10640_v20 = vld [vmem:[#allocation6 + $0x188] sm:$0xff]  }
 0x461   :  { %10387 = vmatprep.subr.bf16.mxu1 %v10598_v52  ;;  %v10642_v52 = vld [vmem:[#allocation6 + $0x1c0] sm:$0xff]  }
 0x462   :  { %10366 = vmatpush3.bf16.msra.mxu0 %v10599_v5  ;;  %v10643_v5 = vld [vmem:[#allocation6 + $0x100] sm:$0xff]  }
 0x463   :  { %10367 = vmatprep.subr.bf16.mxu0 %v10601_v35  ;;  %v10644_v35 = vld [vmem:[#allocation6 + $0x180] sm:$0xff]  }
 0x464   :  { %10388 = vmatpush3.bf16.msra.mxu1 %v10600_v56  ;;  %v7679_v56 = vmax.f32 %v11063_v30, 0.0  ;;  %v10649_v30 = vld [vmem:[#allocation6 + $0x270] sm:$0xff]  }
 0x465   :  { %10389 = vmatprep.subr.bf16.mxu1 %v10602_v57  ;;  %v10645_v57 = vld [vmem:[#allocation6 + $0x278] sm:$0xff]  }
 0x466   :  { %10368 = vmatpush3.bf16.msra.mxu0 %v10603_v13  ;;  %v7681_v13 = vmax.f32 %v11089_v28, 0.0  ;;  %v10650_v28 = vld [vmem:[#allocation6 + $0x2f0] sm:$0xff]  }
 0x467   :  { %10369 = vmatprep.subr.bf16.mxu0 %v10605_v62  ;;  %v7684_v62 = vmax.f32 %v11120_v55, 0.0  ;;  %v10651_v55 = vld [vmem:[#allocation6 + $0x230] sm:$0xff]  }
 0x468   :  { %10390 = vmatpush3.bf16.msra.mxu1 %v10604_v61  ;;  %v10646_v61 = vld [vmem:[#allocation6 + $0x2f8] sm:$0xff]  }
 0x469   :  { %10391 = vmatprep.subr.bf16.mxu1 %v10606_v54  ;;  %v7686_v54 = vmax.f32 %v11144_v51, 0.0 }
 0x46a   :  { %10370 = vmatpush3.bf16.msra.mxu0 %v10607_v63  ;;  %v10647_v63 = vld [vmem:[#allocation6 + $0x238] sm:$0xff]  }
 0x46b   :  { %10371 = vmatprep.subr.bf16.mxu0 %v10609_v1  ;;  %v10648_v1 = vld [vmem:[#allocation6 + $0x2b8] sm:$0xff]  }
 0x46c   :  { %10392 = vmatpush3.bf16.msra.mxu1 %v10608_v0  ;;  %v7695_v0 = vpack.c.bf16 %v7679_v56, %v7679_v56 }
 0x46d   :  { %10393 = vmatprep.subr.bf16.mxu1 %v10610_v29  ;;  %v7697_v29 = vpack.c.bf16 %v7681_v13, %v7681_v13  ;;  %v10694_v13 = vld [vmem:[#allocation6 + $0x3b8] sm:$0xff]  }
 0x46e   :  { %10372 = vmatpush3.bf16.msra.mxu0 %v10611_v3  ;;  %v7700_v3 = vpack.c.bf16 %v7684_v62, %v7684_v62  ;;  %v10680_v62 = vld [vmem:[#allocation6 + $0x330] sm:$0xff]  }
 0x46f   :  { %10401 = vmatprep.subr.bf16.mxu0 %v10613_v9 }
 0x470   :  { %10394 = vmatpush3.bf16.msra.mxu1 %v10612_v6  ;;  %v7702_v6 = vpack.c.bf16 %v7686_v54, %v7686_v54  ;;  %v10696_v54 = vld [vmem:[#allocation6 + $0x3b0] sm:$0xff]  }
 0x471   :  { %10423 = vmatprep.subr.bf16.mxu1 %v10614_v11  ;;  %8771 = vmatmul.mubr.bf16.vlgmr.msra.gmra.mxu0 %v7691_v21  ;;  %v10653_v11 = vld [vmem:[#allocation6 + $0x268] sm:$0xff]  }
 0x472   :  { %10402 = vmatpush3.bf16.msra.mxu0 %v10615_v36  ;;  %8850 = vmatprep.mubr.bf16.mxu0 %v7696_v26  ;;  %v10657_v26 = vld [vmem:[#allocation6 + $0x260] sm:$0xff]  }
 0x473   :  { %8811 = vmatmul.mubr.bf16.vlgmr.msra.gmra.mxu1 %v7693_v32  ;;  %10403 = vmatprep.subr.bf16.mxu0 %v10617_v23  ;;  %v10656_v23 = vld [vmem:[#allocation6 + $0x2a8] sm:$0xff]  }
 0x474   :  { %10424 = vmatpush3.bf16.msra.mxu1 %v10616_v25  ;;  %8890 = vmatprep.mubr.bf16.mxu1 %v7698_v27  ;;  %v10655_v25 = vld [vmem:[#allocation6 + $0x228] sm:$0xff]   ;;  %v10658_v27 = vld [vmem:[#allocation6 + $0x2e0] sm:$0xff]  }
 0x475   :  { %10425 = vmatprep.subr.bf16.mxu1 %v10618_v18 }
 0x476   :  { %10404 = vmatpush3.bf16.msra.mxu0 %v10619_v8  ;;  %v10659_v8 = vld [vmem:[#allocation6 + $0x220] sm:$0xff]  }
 0x477   :  { %10405 = vmatprep.subr.bf16.mxu0 %v10621_v40  ;;  %v10661_v40 = vld [vmem:[#allocation6 + $0x258] sm:$0xff]  }
 0x478   :  { %10426 = vmatpush3.bf16.msra.mxu1 %v10620_v42  ;;  %v10660_v42 = vld [vmem:[#allocation6 + $0x2a0] sm:$0xff]  }
 0x479   :  { %10427 = vmatprep.subr.bf16.mxu1 %v10622_v31  ;;  %v10662_v31 = vld [vmem:[#allocation6 + $0x2d8] sm:$0xff]  }
 0x47a   :  { %10406 = vmatpush3.bf16.msra.mxu0 %v10623_v33  ;;  %v10663_v33 = vld [vmem:[#allocation6 + $0x218] sm:$0xff]  }
 0x47b   :  { %10407 = vmatprep.subr.bf16.mxu0 %v10625_v34  ;;  %v10665_v34 = vld [vmem:[#allocation6 + $0x250] sm:$0xff]  }
 0x47c   :  { %10428 = vmatpush3.bf16.msra.mxu1 %v10624_v37  ;;  %v10664_v37 = vld [vmem:[#allocation6 + $0x298] sm:$0xff]  }
 0x47d   :  { %10429 = vmatprep.subr.bf16.mxu1 %v10626_v49  ;;  %v10666_v49 = vld [vmem:[#allocation6 + $0x2d0] sm:$0xff]  }
 0x47e   :  { %10408 = vmatpush3.bf16.msra.mxu0 %v10627_v47  ;;  %v10667_v47 = vld [vmem:[#allocation6 + $0x210] sm:$0xff]  }
 0x47f   :  { %10409 = vmatprep.subr.bf16.mxu0 %v10629_v41  ;;  %v10669_v41 = vld [vmem:[#allocation6 + $0x248] sm:$0xff]  }
 0x480   :  { %10430 = vmatpush3.bf16.msra.mxu1 %v10628_v44  ;;  %v10668_v44 = vld [vmem:[#allocation6 + $0x290] sm:$0xff]  }
 0x481   :  { %10431 = vmatprep.subr.bf16.mxu1 %v10630_v38  ;;  %v10670_v38 = vld [vmem:[#allocation6 + $0x2c8] sm:$0xff]  }
 0x482   :  { %10410 = vmatpush3.bf16.msra.mxu0 %v10631_v45 }
 0x483   :  { %10411 = vmatprep.subr.bf16.mxu0 %v10633_v39  ;;  %v10672_v39 = vld [vmem:[#allocation6 + $0x288] sm:$0xff]  }
 0x484   :  { %10432 = vmatpush3.bf16.msra.mxu1 %v10632_v22  ;;  %v10671_v22 = vld [vmem:[#allocation6 + $0x208] sm:$0xff]  }
 0x485   :  { %10433 = vmatprep.subr.bf16.mxu1 %v10634_v58  ;;  %v10673_v58 = vld [vmem:[#allocation6 + $0x240] sm:$0xff]  }
 0x486   :  { %10412 = vmatpush3.bf16.msra.mxu0 %v10635_v48  ;;  %v10674_v48 = vld [vmem:[#allocation6 + $0x2c0] sm:$0xff]  }
 0x487   :  { %10413 = vmatprep.subr.bf16.mxu0 %v10637_v50  ;;  %v10675_v50 = vld [vmem:[#allocation6 + $0x200] sm:$0xff]  }
 0x488   :  { %10434 = vmatpush3.bf16.msra.mxu1 %v10636_v16 }
 0x489   :  { %10435 = vmatprep.subr.bf16.mxu1 %v10638_v10  ;;  %v7683_v10 = vmax.f32 %v11115_v46, 0.0  ;;  %v10695_v46 = vld [vmem:[#allocation6 + $0x3f0] sm:$0xff]  }
 0x48a   :  { %10414 = vmatpush3.bf16.msra.mxu0 %v10639_v19  ;;  %v10676_v19 = vld [vmem:[#allocation6 + $0x280] sm:$0xff]  }
 0x48b   :  { %10415 = vmatprep.subr.bf16.mxu0 %v10641_v59  ;;  %v7685_v59 = vmax.f32 %v11139_v24, 0.0  ;;  %v7699_v56 = vpack.c.bf16 %v7683_v10, %v7683_v10  ;;  %v10681_v24 = vld [vmem:[#allocation6 + $0x368] sm:$0xff]  }
 0x48c   :  { %10436 = vmatpush3.bf16.msra.mxu1 %v10640_v20  ;;  %v10677_v20 = vld [vmem:[#allocation6 + $0x378] sm:$0xff]  }
 0x48d   :  { %10437 = vmatprep.subr.bf16.mxu1 %v10642_v52 }
 0x48e   :  { %10416 = vmatpush3.bf16.msra.mxu0 %v10643_v5  ;;  %v10678_v5 = vld [vmem:[#allocation6 + $0x338] sm:$0xff]  }
 0x48f   :  { %10445 = vmatprep.subr.bf16.mxu0 %v10645_v57  ;;  %v7701_v57 = vpack.c.bf16 %v7685_v59, %v7685_v59 }
 0x490   :  { %10438 = vmatpush3.bf16.msra.mxu1 %v10644_v35  ;;  %v10679_v35 = vld [vmem:[#allocation6 + $0x370] sm:$0xff]  }
 0x491   :  { %10467 = vmatprep.subr.bf16.mxu1 %v10646_v61  ;;  %v11170_v4 = vpop.f32.mrf.mxu0  ;;  %8851 = vmatmul.mubr.bf16.vlgmr.msra.gmra.mxu0 %v7695_v0  ;;  %v10682_v0 = vld [vmem:[#allocation6 + $0x328] sm:$0xff]  }
 0x492   :  { %10446 = vmatpush3.bf16.msra.mxu0 %v10647_v63  ;;  %8930 = vmatprep.mubr.bf16.mxu0 %v7700_v3  ;;  %v10697_v63 = vld [vmem:[#allocation6 + $0x3e8] sm:$0xff]   ;;  %v10684_v3 = vld [vmem:[#allocation6 + $0x320] sm:$0xff]  }
 0x493   :  { %v11172_v9 = vpop.f32.mrf.mxu1  ;;  %8891 = vmatmul.mubr.bf16.vlgmr.msra.gmra.mxu1 %v7697_v29  ;;  %v7465_v51 = vpop.f32.mrf.mxu0  ;;  %10447 = vmatprep.subr.bf16.mxu0 %v10649_v30  ;;  %v10698_v29 = vld [vmem:[#allocation6 + $0x3a8] sm:$0xff]   ;;  %v10699_v30 = vld [vmem:[#allocation6 + $0x3e0] sm:$0xff]  }
 0x494   :  { %10468 = vmatpush3.bf16.msra.mxu1 %v10648_v1  ;;  %8970 = vmatprep.mubr.bf16.mxu1 %v7702_v6  ;;  %v7466_v45 = vadd.f32 %v7465_v51, %v11160_v2  ;;  %v10693_v2 = vld [vmem:[#allocation6 + $0x3f8] sm:$0xff]   ;;  %v10683_v1 = vld [vmem:[#allocation6 + $0x360] sm:$0xff]  }
 0x495   :  { %v7506_v15 = vpop.f32.mrf.mxu1  ;;  %v7467_v36 = vpop.f32.mrf.mxu0  ;;  %10469 = vmatprep.subr.bf16.mxu1 %v10650_v28  ;;  %v10685_v28 = vld [vmem:[#allocation6 + $0x358] sm:$0xff]   ;;  %v10700_v6 = vld [vmem:[#allocation6 + $0x3a0] sm:$0xff]  }
 0x496   :  { %10448 = vmatpush3.bf16.msra.mxu0 %v10651_v55  ;;  %v7507_v16 = vadd.f32 %v7506_v15, %v7466_v45  ;;  %v10701_v55 = vld [vmem:[#allocation6 + $0x3d8] sm:$0xff]   ;;  %v10703_v15 = vld [vmem:[#allocation6 + $0x3d0] sm:$0xff]   ;;  %v7464_v36 = vadd.f32 %v11170_v4, %v11158_v12  ;;  %v10708_v12 = vld [vmem:[#allocation6 + $0x380] sm:$0xff]  }
 0x497   :  { %v7508_v21 = vpop.f32.mrf.mxu1  ;;  %v7468_v32 = vpop.f32.mrf.mxu0  ;;  %10449 = vmatprep.subr.bf16.mxu0 %v10653_v11  ;;  %v10686_v51 = vld [vmem:[#allocation6 + $0x318] sm:$0xff]  }
 0x498   :  { %10470 = vmatpush3.bf16.msra.mxu1 %v10652_v43  ;;  %v7688_v52 = vmax.f32 %v7507_v16, 0.0  ;;  %v10687_v43 = vld [vmem:[#allocation6 + $0x350] sm:$0xff]   ;;  %v10702_v11 = vld [vmem:[#allocation6 + $0x398] sm:$0xff]   ;;  %v10689_v21 = vld [vmem:[#allocation6 + $0x348] sm:$0xff]  }
 0x499   :  { %v7509_v18 = vpop.f32.mrf.mxu1  ;;  %10471 = vmatprep.subr.bf16.mxu1 %v10654_v17  ;;  %v10688_v17 = vld [vmem:[#allocation6 + $0x310] sm:$0xff]   ;;  %v10705_v32 = vld [vmem:[#allocation6 + $0x3c8] sm:$0xff]  }
 0x49a   :  { %10450 = vmatpush3.bf16.msra.mxu0 %v10655_v25  ;;  %v7704_v61 = vpack.c.bf16 %v7688_v52, %v7688_v52  ;;  %v10704_v25 = vld [vmem:[#allocation6 + $0x390] sm:$0xff]   ;;  %v10691_v18 = vld [vmem:[#allocation6 + $0x340] sm:$0xff]  }
 0x49b   :  { %10451 = vmatprep.subr.bf16.mxu0 %v10657_v26  ;;  %v7505_v26 = vadd.f32 %v11172_v9, %v7464_v36 }
 0x49c   :  { %10472 = vmatpush3.bf16.msra.mxu1 %v10656_v23  ;;  %v10690_v23 = vld [vmem:[#allocation6 + $0x308] sm:$0xff]  }
 0x49d   :  { %10473 = vmatprep.subr.bf16.mxu1 %v10658_v27  ;;  %v10706_v27 = vld [vmem:[#allocation6 + $0x388] sm:$0xff]  }
 0x49e   :  { %10452 = vmatpush3.bf16.msra.mxu0 %v10659_v8  ;;  %v10707_v8 = vld [vmem:[#allocation6 + $0x3c0] sm:$0xff]  }
 0x49f   :  { %10453 = vmatprep.subr.bf16.mxu0 %v10661_v40  ;;  %v7687_v40 = vmax.f32 %v7505_v26, 0.0 }
 0x4a0   :  { %10474 = vmatpush3.bf16.msra.mxu1 %v10660_v42  ;;  %v10692_v42 = vld [vmem:[#allocation6 + $0x300] sm:$0xff]  }
 0x4a1   :  { %10475 = vmatprep.subr.bf16.mxu1 %v10662_v31  ;;  %v7703_v4 = vpack.c.bf16 %v7687_v40, %v7687_v40  ;;  %v10714_v40 = vld [vmem:[#allocation9 + $0x10] sm:$0xff]  }
 0x4a2   :  { %10454 = vmatpush3.bf16.msra.mxu0 %v10663_v33 }
 0x4a3   :  { %10455 = vmatprep.subr.bf16.mxu0 %v10665_v34 }
 0x4a4   :  { %10476 = vmatpush3.bf16.msra.mxu1 %v10664_v37 }
 0x4a5   :  { %10477 = vmatprep.subr.bf16.mxu1 %v10666_v49 }
 0x4a6   :  { %10456 = vmatpush3.bf16.msra.mxu0 %v10667_v47 }
 0x4a7   :  { %10457 = vmatprep.subr.bf16.mxu0 %v10669_v41  ;;  %v1194_v41 = vrot.slane %v11148_v14, %v1161_v7 }
 0x4a8   :  { %10478 = vmatpush3.bf16.msra.mxu1 %v10668_v44 }
 0x4a9   :  { %10479 = vmatprep.subr.bf16.mxu1 %v10670_v38  ;;  %v1198_v38 = vrot.slane %v11148_v14, %v1165_v53  ;;  %v10860_v53 = vmov 0.0   ;;  %v10710_v14 = vld [vmem:[#allocation9 + $0x30] sm:$0xff]  }
 0x4aa   :  { %10458 = vmatpush3.bf16.msra.mxu0 %v10671_v22 }
 0x4ab   :  { %10459 = vmatprep.subr.bf16.mxu0 %v10673_v58 }
 0x4ac   :  { %10480 = vmatpush3.bf16.msra.mxu1 %v10672_v39 }
 0x4ad   :  { %10481 = vmatprep.subr.bf16.mxu1 %v10674_v48 }
 0x4ae   :  { %10460 = vmatpush3.bf16.msra.mxu0 %v10675_v50 }
 0x4af   :  { %10489 = vmatprep.subr.bf16.mxu0 %v10677_v20 }
 0x4b0   :  { %10482 = vmatpush3.bf16.msra.mxu1 %v10676_v19 }
 0x4b1   :  { %10511 = vmatprep.subr.bf16.mxu1 %v10693_v2  ;;  %8931 = vmatmul.mubr.bf16.vlgmr.msra.gmra.mxu0 %v7699_v56 }
 0x4b2   :  { %10490 = vmatpush3.bf16.msra.mxu0 %v10678_v5  ;;  %9010 = vmatprep.mubr.bf16.mxu0 %v7704_v61 }
 0x4b3   :  { %8971 = vmatmul.mubr.bf16.vlgmr.msra.gmra.mxu1 %v7701_v57  ;;  %10491 = vmatprep.subr.bf16.mxu0 %v10679_v35  ;;  %v10709_v35 = vld [vmem:[#allocation9 + $0x38] sm:$0xff]  }
 0x4b4   :  { %10512 = vmatpush3.bf16.msra.mxu1 %v10694_v13 }
 0x4b5   :  { %10513 = vmatprep.subr.bf16.mxu1 %v10695_v46  ;;  %v10711_v46 = vld [vmem:[#allocation9 + $0x28] sm:$0xff]  }
 0x4b6   :  { %10492 = vmatpush3.bf16.msra.mxu0 %v10680_v62  ;;  %v10712_v62 = vld [vmem:[#allocation9 + $0x20] sm:$0xff]  }
 0x4b7   :  { %10493 = vmatprep.subr.bf16.mxu0 %v10681_v24  ;;  %v10713_v24 = vld [vmem:[#allocation9 + $0x18] sm:$0xff]  }
 0x4b8   :  { %10514 = vmatpush3.bf16.msra.mxu1 %v10696_v54 }
 0x4b9   :  { %10515 = vmatprep.subr.bf16.mxu1 %v10697_v63 }
 0x4ba   :  { %10494 = vmatpush3.bf16.msra.mxu0 %v10682_v0  ;;  %v10218_v0 = vld [vmem:[#allocation7] ss:$0 sm:$0xff] }
 0x4bb   :  { %10495 = vmatprep.subr.bf16.mxu0 %v10683_v1 }
 0x4bc   :  { %10516 = vmatpush3.bf16.msra.mxu1 %v10698_v29 }
 0x4bd   :  { %10517 = vmatprep.subr.bf16.mxu1 %v10699_v30 }
 0x4be   :  { %10496 = vmatpush3.bf16.msra.mxu0 %v10684_v3 }
 0x4bf   :  { %10497 = vmatprep.subr.bf16.mxu0 %v10685_v28 }
 0x4c0   :  { %10518 = vmatpush3.bf16.msra.mxu1 %v10700_v6 }
 0x4c1   :  { %10519 = vmatprep.subr.bf16.mxu1 %v10701_v55 }
 0x4c2   :  { %10498 = vmatpush3.bf16.msra.mxu0 %v10686_v51 }
 0x4c3   :  { %10499 = vmatprep.subr.bf16.mxu0 %v10687_v43 }
 0x4c4   :  { %10520 = vmatpush3.bf16.msra.mxu1 %v10702_v11 }
 0x4c5   :  { %10521 = vmatprep.subr.bf16.mxu1 %v10703_v15 }
 0x4c6   :  { %10500 = vmatpush3.bf16.msra.mxu0 %v10688_v17 }
 0x4c7   :  { %10501 = vmatprep.subr.bf16.mxu0 %v10689_v21 }
 0x4c8   :  { %10522 = vmatpush3.bf16.msra.mxu1 %v10704_v25 }
 0x4c9   :  { %10523 = vmatprep.subr.bf16.mxu1 %v10705_v32 }
 0x4ca   :  { %10502 = vmatpush3.bf16.msra.mxu0 %v10690_v23 }
 0x4cb   :  { %10503 = vmatprep.subr.bf16.mxu0 %v10691_v18 }
 0x4cc   :  { %10524 = vmatpush3.bf16.msra.mxu1 %v10706_v27 }
 0x4cd   :  { %10525 = vmatprep.subr.bf16.mxu1 %v10707_v8 }
 0x4ce   :  { %10504 = vmatpush3.bf16.msra.mxu0 %v10692_v42 }
 0x4cf   :  { %10542 = vmatprep.subr.bf16.mxu0 %v10860_v53 }
 0x4d0   :  { %10526 = vmatpush3.bf16.msra.mxu1 %v10708_v12  ;;  %v10715_v12 = vld [vmem:[#allocation9 + $0x8] sm:$0xff]  }
 0x4d1   :  { %v7545_v31 = vpop.f32.mrf.mxu0  ;;  %9011 = vmatmul.mubr.bf16.vlgmr.msra.gmra.mxu0 %v7703_v4  ;;  %v10716_v4 = vld [vmem:[#allocation9] sm:$0xff]  }
 0x4d2   :  { %v7546_v45 = vadd.f32 %v7545_v31, %v1194_v41  ;;  %10543 = vmatpush3.bf16.msra.mxu0 %v10709_v35  ;;  %10558 = vmatprep.mubr.msk.bf16.mxu0 %vm10861_vm0, %v10860_v53  ;;  %v10347_v35 = vld [vmem:[#allocation10] ss:$0 sm:$0xff] }
 0x4d3   :  { %v7586_v33 = vpop.f32.mrf.mxu1  ;;  %v7547_v9 = vpop.f32.mrf.mxu0  ;;  %10544 = vmatprep.subr.bf16.mxu0 %v10860_v53 }
 0x4d4   :  { %v7548_v22 = vadd.f32 %v7547_v9, %v1198_v38  ;;  %v7587_v39 = vadd.f32 %v7586_v33, %v7546_v45 }
 0x4d5   :  { %v7588_v37 = vpop.f32.mrf.mxu1  ;;  %v7549_v34 = vpop.f32.mrf.mxu0 }
 0x4d6   :  { %v7589_v48 = vadd.f32 %v7588_v37, %v7548_v22  ;;  %10545 = vmatpush3.bf16.msra.mxu0 %v10710_v14 }
 0x4d7   :  { %v7590_v49 = vpop.f32.mrf.mxu1  ;;  %v7550_v47 = vpop.f32.mrf.mxu0  ;;  %10546 = vmatprep.subr.bf16.mxu0 %v10860_v53 }
 0x4d9   :  { %v7591_v44 = vpop.f32.mrf.mxu1 }
 0x4da   :  { %10547 = vmatpush3.bf16.msra.mxu0 %v10711_v46 }
 0x4db   :  { %10548 = vmatprep.subr.bf16.mxu0 %v10860_v53 }
 0x4de   :  { %10549 = vmatpush3.bf16.msra.mxu0 %v10712_v62 }
 0x4df   :  { %10550 = vmatprep.subr.bf16.mxu0 %v10860_v53 }
 0x4e2   :  { %10551 = vmatpush3.bf16.msra.mxu0 %v10713_v24 }
 0x4e3   :  { %10552 = vmatprep.subr.bf16.mxu0 %v10860_v53 }
 0x4e6   :  { %10553 = vmatpush3.bf16.msra.mxu0 %v10714_v40 }
 0x4e7   :  { %10554 = vmatprep.subr.bf16.mxu0 %v10860_v53 }
 0x4ea   :  { %10555 = vmatpush3.bf16.msra.mxu0 %v10715_v12 }
 0x4eb   :  { %10556 = vmatprep.subr.bf16.mxu0 %v10860_v53 }
 0x4ee   :  { %10557 = vmatpush3.bf16.msra.mxu0 %v10716_v4 }
 0x511   :  { %v7627_v58 = vpop.f32.mrf.mxu0 }
 0x512   :  { %v7628_v16 = vadd.f32 %v7627_v58, %v7587_v39 }
 0x513   :  { %v7668_v50 = vpop.f32.mrf.mxu1  ;;  %v7629_v10 = vpop.f32.mrf.mxu0 }
 0x514   :  { %v7669_v19 = vadd.f32 %v7668_v50, %v7628_v16  ;;  %v7630_v20 = vadd.f32 %v7629_v10, %v7589_v48 }
 0x515   :  { %v7670_v59 = vpop.f32.mrf.mxu1  ;;  %v7631_v2 = vpop.f32.mrf.mxu0 }
 0x516   :  { %v7671_v52 = vadd.f32 %v7670_v59, %v7630_v20  ;;  %v7689_v56 = vmax.f32 %v7669_v19, 0.0 }
 0x517   :  { %v7672_v5 = vpop.f32.mrf.mxu1  ;;  %v7632_v7 = vpop.f32.mrf.mxu0 }
 0x518   :  { %v7690_v60 = vmax.f32 %v7671_v52, 0.0  ;;  %v7705_v61 = vpack.c.bf16 %v7689_v56, %v7689_v56 }
 0x519   :  { %v7673_v57 = vpop.f32.mrf.mxu1 }
 0x51a   :  { %v7706_v13 = vpack.c.bf16 %v7690_v60, %v7690_v60 }
 0x51c   :  { %9050 = vmatprep.mubr.bf16.mxu1 %v7706_v13 }
 0x51d   :  { %9051 = vmatmul.mubr.bf16.vlgmr.msra.gmra.mxu1 %v7705_v61 }
 0x531   :  { %v10373_v54 = vpop.f32.mrf.mxu0 }
 0x533   :  { %v10395_v63 = vpop.f32.mrf.mxu1  ;;  %v10374_v1 = vpop.f32.mrf.mxu0 }
 0x534   :  { %v10375_v29 = vadd.f32 %v10374_v1, %v10373_v54 }
 0x535   :  { %v10396_v30 = vpop.f32.mrf.mxu1  ;;  %v10376_v28 = vpop.f32.mrf.mxu0 }
 0x536   :  { %v10397_v3 = vadd.f32 %v10396_v30, %v10395_v63  ;;  %v8773_v6 = vadd.f32 %v10375_v29, %v10218_v0 }
 0x537   :  { %v10398_v55 = vpop.f32.mrf.mxu1  ;;  %v10377_v51 = vpop.f32.mrf.mxu0 }
 0x538   :  { %v8813_v43 = vadd.f32 %v10397_v3, %v8773_v6 }
 0x539   :  { %v10399_v11 = vpop.f32.mrf.mxu1 }
 0x551   :  { %v10417_v15 = vpop.f32.mrf.mxu0 }
 0x553   :  { %v10439_v17 = vpop.f32.mrf.mxu1  ;;  %v10418_v36 = vpop.f32.mrf.mxu0 }
 0x554   :  { %v10419_v21 = vadd.f32 %v10418_v36, %v10417_v15 }
 0x555   :  { %v10440_v25 = vpop.f32.mrf.mxu1  ;;  %v10420_v23 = vpop.f32.mrf.mxu0 }
 0x556   :  { %v10441_v32 = vadd.f32 %v10440_v25, %v10439_v17  ;;  %v8853_v26 = vadd.f32 %v10419_v21, %v8813_v43 }
 0x557   :  { %v10442_v18 = vpop.f32.mrf.mxu1  ;;  %v10421_v27 = vpop.f32.mrf.mxu0 }
 0x558   :  { %v8893_v8 = vadd.f32 %v10441_v32, %v8853_v26 }
 0x559   :  { %v10443_v42 = vpop.f32.mrf.mxu1 }
 0x571   :  { %v10461_v31 = vpop.f32.mrf.mxu0 }
 0x573   :  { %v10483_v33 = vpop.f32.mrf.mxu1  ;;  %v10462_v9 = vpop.f32.mrf.mxu0 }
 0x574   :  { %v10463_v37 = vadd.f32 %v10462_v9, %v10461_v31 }
 0x575   :  { %v10484_v34 = vpop.f32.mrf.mxu1  ;;  %v10464_v47 = vpop.f32.mrf.mxu0 }
 0x576   :  { %v10485_v49 = vadd.f32 %v10484_v34, %v10483_v33  ;;  %v8933_v44 = vadd.f32 %v10463_v37, %v8893_v8 }
 0x577   :  { %v10486_v41 = vpop.f32.mrf.mxu1  ;;  %v10465_v38 = vpop.f32.mrf.mxu0 }
 0x578   :  { %v8973_v45 = vadd.f32 %v10485_v49, %v8933_v44 }
 0x579   :  { %v10487_v22 = vpop.f32.mrf.mxu1 }
 0x591   :  { %v10505_v39 = vpop.f32.mrf.mxu0 }
 0x593   :  { %v10506_v58 = vpop.f32.mrf.mxu0 }
 0x594   :  { %v10507_v48 = vadd.f32 %v10506_v58, %v10505_v39 }
 0x595   :  { %v10508_v16 = vpop.f32.mrf.mxu0 }
 0x596   :  { %v9013_v50 = vadd.f32 %v10507_v48, %v8973_v45 }
 0x597   :  { %v10509_v10 = vpop.f32.mrf.mxu0 }
 0x5dd   :  { %v10527_v19 = vpop.f32.mrf.mxu1 }
 0x5df   :  { %v10528_v20 = vpop.f32.mrf.mxu1 }
 0x5e0   :  { %v10529_v59 = vadd.f32 %v10528_v20, %v10527_v19 }
 0x5e1   :  { %v10530_v2 = vpop.f32.mrf.mxu1 }
 0x5e2   :  { %v9053_v52 = vadd.f32 %v10529_v59, %v9013_v50 }
 0x5e3   :  { %v10531_v5 = vpop.f32.mrf.mxu1 }
 0x5e4   :  { %v9058_v56 = vmax.f32 %v9053_v52, 0.0 }
 0x5e6   :  { %v9059_v7 = vpack.c.bf16 %v9058_v56, %v9058_v56 }
 0x5e8   :  { %10559 = vmatmul.mubr.bf16.vlgmr.msra.gmra.mxu0 %v9059_v7 }
 0x6a8   :  { %v9165_v60 = vpop.f32.mrf.mxu0 }
 0x6a9   :  { %v9166_v57 = vadd.f32 %v10347_v35, %v9165_v60 }
 0x6aa   :  { %v10560_v53 = vpop.f32.mrf.mxu0 }
 0x6ab   :  { %v10356_v14 = vmul.f32 -1.442695, %v9166_v57 }
 0x6ac   :  { %v9168_v13 = vpop.f32.mrf.mxu0 }
 0x6ad   :  { %10717 = vpow2.f32 %v10356_v14 }
 0x6ae   :  { %v10561_v61 = vpop.f32.mrf.mxu0 }
 0x6ba   :  { %v10718_v46 = vpop.eup %10717 }
 0x6bb   :  { %v9174_v62 = vadd.f32 1.0, %v10718_v46 }
 0x6bd   :  { %10719 = vrcp.f32 %v9174_v62 }
 0x6ca   :  { %v10720_v24 = vpop.eup %10719 }
 0x6cb   :  { %9177 = vst [vmem:[%s11196_s7] sm:$0xff] %v10720_v24 }
 0x6cc   :  { %9182 = vsyncpa [#allocation3], 1 }
 0x6cd   :  { %9183 = vsyncpa [#allocation5], 1 }
 0x6ce   :  { %9184 = vsyncpa [#allocation8], 1 }
 0x6cf   :  { %9185 = vsyncpa [#allocation11], 1 }

</bundles_post_ra>
